<compile_context>
chip_gen: v7x
topology: tpu7x:2x2x1
jax: 0.10.0
libtpu: 0.0.40
codegen_flags: <defaults>
</compile_context>

<pallas_src>
import jax
import jax.numpy as jnp
from jax.experimental import pallas as pl
from jax.experimental.pallas import tpu as pltpu

L = 500        # self.L (logical)
L_PAD = 512    # L padded to a multiple of 128 for clean tiling
D = 128        # self.D
K = 1          # self.K
FEAT = 2048    # resnet50 feature dim


def _make_kernel(n_valid):
    """Kernel closure over the static number of valid (non-padded) instances."""

    def kernel(x_ref, w1_ref, b1_ref, wvu_ref, bvu_ref, wa_ref, ba_ref,
               wc_ref, bc_ref, y_ref, a_ref, m_sc, l_sc, acc_sc):
        i = pl.program_id(1)          # N-tile index ("arbitrary" reduction axis)
        tn = x_ref.shape[0]

        @pl.when(i == 0)
        def _():
            m_sc[...] = jnp.full_like(m_sc, -jnp.inf)
            l_sc[...] = jnp.zeros_like(l_sc)
            acc_sc[...] = jnp.zeros_like(acc_sc)

        # feature_extractor_part2: Linear(2048 -> L) + ReLU   (bf16 MXU, f32 accumulate)
        h = jnp.dot(x_ref[...], w1_ref[...],
                    preferred_element_type=jnp.float32) + b1_ref[...]
        h = jnp.maximum(h, 0.0)                                        # (TN, L_PAD) f32

        # fused attention_V | attention_U: one (L_PAD -> 2D) matmul, slice the halves
        vu = jnp.dot(h.astype(jnp.bfloat16), wvu_ref[...],
                     preferred_element_type=jnp.float32) + bvu_ref[...]  # (TN, 2D)
        gated = jnp.tanh(vu[:, :D]) * jax.nn.sigmoid(vu[:, D:])          # (TN, D) f32

        # attention score: VPU mul + lane reduce, then one (TN,1)->(1,TN) relayout
        s_col = jnp.sum(gated * wa_ref[...], axis=-1, keepdims=True)     # (TN, 1)
        s_row = s_col.T + ba_ref[...]                                    # (1, TN)

        # mask padded rows to -inf -> excluded from softmax / accumulators, zero in A
        start = pl.multiple_of(i * tn, tn)
        lane_ids = jax.lax.broadcasted_iota(jnp.int32, (1, tn), 1) + start
        s_row = jnp.where(lane_ids < n_valid, s_row, -jnp.inf)

        # stash raw scores lane-dense into the resident (1, N_pad) output buffer
        a_ref[:, pl.ds(start, tn)] = s_row

        # flash-style online softmax carry; weighted sum p_row @ h goes on the MXU
        m_prev = m_sc[...]                                               # (1, 1)
        m_new = jnp.maximum(m_prev, jnp.max(s_row, axis=-1, keepdims=True))
        scale = jnp.exp(m_prev - m_new)
        p_row = jnp.exp(s_row - m_new)                                   # (1, TN)
        l_sc[...] = l_sc[...] * scale + jnp.sum(p_row, axis=-1, keepdims=True)
        acc_sc[...] = acc_sc[...] * scale + jnp.dot(
            p_row, h, preferred_element_type=jnp.float32)                # (1, L_PAD)
        m_sc[...] = m_new

        @pl.when(i == pl.num_programs(1) - 1)
        def _():
            inv_l = pl.reciprocal(l_sc[...], approx=False)               # (1, 1)
            # normalize the whole resident score row -> softmax over instances
            a_ref[...] = jnp.exp(a_ref[...] - m_sc[...]) * inv_l         # padded -> 0
            # M = A @ H (attention-weighted bag feature), then classifier
            m_bag = acc_sc[...] * inv_l                                  # (1, L_PAD)
            y = jnp.dot(m_bag, wc_ref[...],
                        preferred_element_type=jnp.float32) + bc_ref[...]
            y_ref[...] = y.astype(y_ref.dtype)

    return kernel


def _tile_rows(n):
    """Large fixed N-tile: 256 / 512 / 1024 rows (always a multiple of 128)."""
    if n <= 256:
        return 256
    if n <= 512:
        return 512
    return 1024


def gated_attention_forward_batched(x, params, *, tile_rows=None):
    """x: (B, N, 2048) features. Returns (Y_logits (B, n_classes), A (B, N))."""
    bsz, n, feat = x.shape
    assert feat == FEAT
    n_classes = params["wc"].shape[1]

    tn = _tile_rows(n) if tile_rows is None else tile_rows
    num_tiles = (n + tn - 1) // tn
    n_pad = num_tiles * tn

    # zero-pad the instance axis and halve x HBM traffic with bf16
    x_p = jnp.pad(x.astype(jnp.bfloat16), ((0, 0), (0, n_pad - n), (0, 0)))

    const = lambda b, i: (0, 0)       # weights resident across the whole grid

    grid_spec = pltpu.PrefetchScalarGridSpec(
        num_scalar_prefetch=0,
        grid=(bsz, num_tiles),
        in_specs=[
            pl.BlockSpec((None, tn, FEAT), lambda b, i: (b, i, 0)),  # x tile
            pl.BlockSpec((FEAT, L_PAD), const),                      # w1 (bf16)
            pl.BlockSpec((1, L_PAD), const),                         # b1
            pl.BlockSpec((L_PAD, 2 * D), const),                     # wv|wu fused (bf16)
            pl.BlockSpec((1, 2 * D), const),                         # bv|bu fused
            pl.BlockSpec((1, D), const),                             # wa row
            pl.BlockSpec((1, 1), const),                             # ba
            pl.BlockSpec((L_PAD, n_classes), const),                 # wc
            pl.BlockSpec((1, n_classes), const),                     # bc
        ],
        out_specs=(
            pl.BlockSpec((None, 1, n_classes), lambda b, i: (b, 0, 0)),  # logits
            pl.BlockSpec((None, 1, n_pad), lambda b, i: (b, 0, 0)),      # attention row
        ),
        scratch_shapes=[
            pltpu.VMEM((1, 1), jnp.float32),       # running max
            pltpu.VMEM((1, 1), jnp.float32),       # running sum-exp
            pltpu.VMEM((1, L_PAD), jnp.float32),   # running weighted sum of H
        ],
    )

    flops = bsz * (2 * n_pad * (FEAT * L_PAD + L_PAD * 2 * D + D + L_PAD)
                   + 2 * L_PAD * n_classes)
    transcendentals = bsz * n_pad * (2 * D + 2)
    bytes_accessed = (bsz * n_pad * FEAT * 2                       # x (bf16)
                      + FEAT * L_PAD * 2 + L_PAD * 2 * D * 2       # bf16 weights
                      + (L_PAD + 2 * D + D + 1 + n_classes) * 4    # biases + wa
                      + L_PAD * n_classes * 4                      # wc
                      + bsz * (n_classes + n_pad) * 4)             # outputs

    y, attn = pl.pallas_call(
        _make_kernel(n),
        out_shape=(
            jax.ShapeDtypeStruct((bsz, 1, n_classes), jnp.float32),
            jax.ShapeDtypeStruct((bsz, 1, n_pad), jnp.float32),
        ),
        grid_spec=grid_spec,
        compiler_params=pltpu.CompilerParams(
            dimension_semantics=("parallel", "arbitrary"),  # bags parallel, N carried
            vmem_limit_bytes=48 * 1024 * 1024,              # safe on v5e/v6e/v7x
        ),
        cost_estimate=pl.CostEstimate(
            flops=int(flops),
            transcendentals=int(transcendentals),
            bytes_accessed=int(bytes_accessed)),
    )(x_p,
      params["w1"], params["b1"],
      params["wvu"], params["bvu"],
      params["wa"], params["ba"],
      params["wc"], params["bc"])

    return y[:, 0, :], attn[:, 0, :n]


def gated_attention_forward(x, params, *, tile_rows=None):
    """Single bag, x: (N, 2048). Returns (Y_logits (1, n_classes), A (1, N))."""
    return gated_attention_forward_batched(x[None], params, tile_rows=tile_rows)


def init_params(key, n_classes):
    """torch.nn.Linear-style init (U[-1/sqrt(fan_in), +]) with logical shapes."""
    def linear(k, fan_in, fan_out):
        kw, kb = jax.random.split(k)
        bound = 1.0 / jnp.sqrt(fan_in)
        w = jax.random.uniform(kw, (fan_in, fan_out), jnp.float32, -bound, bound)
        b = jax.random.uniform(kb, (fan_out,), jnp.float32, -bound, bound)
        return w, b

    k1, k2, k3, k4, k5 = jax.random.split(key, 5)
    w1, b1 = linear(k1, FEAT, L)            # feature_extractor_part2
    wv, bv = linear(k2, L, D)               # attention_V
    wu, bu = linear(k3, L, D)               # attention_U
    wa, ba = linear(k4, D, K)               # attention_weights
    wc, bc = linear(k5, L * K, n_classes)   # classifier
    return dict(w1=w1, b1=b1, wv=wv, bv=bv, wu=wu, bu=bu, wa=wa, ba=ba, wc=wc, bc=bc)


def pack_params(p):
    """Kernel layout: L padded 500->512 (zero fill), V|U fused, bf16 matmul weights."""
    n_classes = p["wc"].shape[1]
    w1 = jnp.zeros((FEAT, L_PAD), jnp.float32).at[:, :L].set(p["w1"]).astype(jnp.bfloat16)
    b1 = jnp.zeros((1, L_PAD), jnp.float32).at[:, :L].set(p["b1"])
    wvu = jnp.zeros((L_PAD, 2 * D), jnp.float32)
    wvu = wvu.at[:L, :D].set(p["wv"]).at[:L, D:].set(p["wu"]).astype(jnp.bfloat16)
    bvu = jnp.concatenate([p["bv"], p["bu"]])[None, :]                  # (1, 2D)
    wa = p["wa"].T                                                      # (1, D) row
    ba = p["ba"][None, :]                                               # (1, 1)
    wc = jnp.zeros((L_PAD, n_classes), jnp.float32).at[:L, :].set(p["wc"])
    bc = p["bc"][None, :]                                               # (1, n_classes)
    return dict(w1=w1, b1=b1, wvu=wvu, bvu=bvu, wa=wa, ba=ba, wc=wc, bc=bc)


def reference_forward(x, packed):
    """Pure-JAX reference with the same (bf16 matmul / f32 activation) precision."""
    h = jnp.maximum(
        jnp.dot(x.astype(jnp.bfloat16), packed["w1"],
                preferred_element_type=jnp.float32) + packed["b1"], 0.0)
    vu = jnp.dot(h.astype(jnp.bfloat16), packed["wvu"],
                 preferred_element_type=jnp.float32) + packed["bvu"]
    gated = jnp.tanh(vu[:, :D]) * jax.nn.sigmoid(vu[:, D:])
    s = jnp.sum(gated * packed["wa"], axis=-1, keepdims=True) + packed["ba"]
    a = jax.nn.softmax(s.T, axis=1)              # (1, N) -- torch: transpose, softmax
    m = a @ h                                    # (1, L_PAD)
    y = m @ packed["wc"] + packed["bc"]          # (1, n_classes)
    return y, a


if __name__ == "__main__":
    key = jax.random.PRNGKey(0)
    kp, kx1, kx2 = jax.random.split(key, 3)
    n_classes = 10

    params = pack_params(init_params(kp, n_classes))

    # --- single bag: 8 instances (frozen ResNet50 would map (8,3,32,32)->(8,2048)) ---
    n = 8
    x = jax.random.normal(kx1, (n, FEAT), jnp.float32)
    y_logits, attn = gated_attention_forward(x, params)
    y_logits, attn = jax.block_until_ready((y_logits, attn))

    y_ref, a_ref_vals = reference_forward(x, params)
    assert y_logits.shape == (1, n_classes)
    assert attn.shape == (1, n)
    assert jnp.allclose(jnp.sum(attn), 1.0, atol=1e-3)
    assert jnp.allclose(attn, a_ref_vals, atol=2e-3, rtol=2e-3)
    assert jnp.allclose(y_logits, y_ref, atol=2e-3, rtol=2e-3)

    # --- batched bags with ragged N: exercises padding/masking + multi-tile carry ---
    bsz, n2 = 3, 300
    xb = jax.random.normal(kx2, (bsz, n2, FEAT), jnp.float32)
    yb, ab = gated_attention_forward_batched(xb, params, tile_rows=256)  # 2 tiles/bag
    yb, ab = jax.block_until_ready((yb, ab))
    assert yb.shape == (bsz, n_classes) and ab.shape == (bsz, n2)
    for b in range(bsz):
        yr, ar = reference_forward(xb[b], params)
        assert jnp.allclose(jnp.sum(ab[b]), 1.0, atol=1e-3)
        assert jnp.allclose(ab[b:b + 1], ar, atol=2e-3, rtol=2e-3)
        assert jnp.allclose(yb[b:b + 1], yr, atol=2e-3, rtol=2e-3)

    print("KERNEL_OK")
</pallas_src>

<mosaic_0001>
module attributes {stable_mosaic.version = 11 : i64} {
  func.func @kernel(%arg0: i32, %arg1: i32, %arg2: memref<1x256x2048xbf16, #tpu.memory_space<vmem>>, %arg3: memref<2048x512xbf16, #tpu.memory_space<vmem>>, %arg4: memref<1x512xf32, #tpu.memory_space<vmem>>, %arg5: memref<512x256xbf16, #tpu.memory_space<vmem>>, %arg6: memref<1x256xf32, #tpu.memory_space<vmem>>, %arg7: memref<1x128xf32, #tpu.memory_space<vmem>>, %arg8: memref<1x1xf32, #tpu.memory_space<vmem>>, %arg9: memref<512x10xf32, #tpu.memory_space<vmem>>, %arg10: memref<1x10xf32, #tpu.memory_space<vmem>>, %arg11: memref<1x1x10xf32, #tpu.memory_space<vmem>>, %arg12: memref<1x1x256xf32, #tpu.memory_space<vmem>>, %arg13: memref<1x1xf32, #tpu.memory_space<vmem>>, %arg14: memref<1x1xf32, #tpu.memory_space<vmem>>, %arg15: memref<1x512xf32, #tpu.memory_space<vmem>>) attributes {dimension_semantics = [#tpu.dimension_semantics<parallel>, #tpu.dimension_semantics<arbitrary>], iteration_bounds = array<i64: 1, 1>, scalar_prefetch = 0 : i64, scratch_operands = 3 : i64, tpu.core_type = #tpu.core_type<tc>, window_params = [{transform_indices = @transform_0, window_bounds = array<i64: 1, 256, 2048>}, {pipeline_mode = #tpu.pipeline_mode<synchronous>, transform_indices = @transform_1, window_bounds = array<i64: 2048, 512>}, {pipeline_mode = #tpu.pipeline_mode<synchronous>, transform_indices = @transform_2, window_bounds = array<i64: 1, 512>}, {pipeline_mode = #tpu.pipeline_mode<synchronous>, transform_indices = @transform_3, window_bounds = array<i64: 512, 256>}, {pipeline_mode = #tpu.pipeline_mode<synchronous>, transform_indices = @transform_4, window_bounds = array<i64: 1, 256>}, {pipeline_mode = #tpu.pipeline_mode<synchronous>, transform_indices = @transform_5, window_bounds = array<i64: 1, 128>}, {pipeline_mode = #tpu.pipeline_mode<synchronous>, transform_indices = @transform_6, window_bounds = array<i64: 1, 1>}, {pipeline_mode = #tpu.pipeline_mode<synchronous>, transform_indices = @transform_7, window_bounds = array<i64: 512, 10>}, {pipeline_mode = #tpu.pipeline_mode<synchronous>, transform_indices = @transform_8, window_bounds = array<i64: 1, 10>}, {transform_indices = @transform_9, window_bounds = array<i64: 1, 1, 10>}, {transform_indices = @transform_10, window_bounds = array<i64: 1, 1, 256>}]} {
    %c0_i32 = arith.constant 0 : i32
    %0 = arith.cmpi eq, %arg1, %c0_i32 : i32
    %1 = arith.extui %0 : i1 to i32
    %c0_i32_0 = arith.constant 0 : i32
    %2 = arith.cmpi ne, %1, %c0_i32_0 : i32
    scf.if %2 {
      %cst_39 = arith.constant 0xFF800000 : f32
      %74 = vector.broadcast %cst_39 : f32 to vector<1x1xf32>
      %c0_40 = arith.constant 0 : index
      %c0_41 = arith.constant 0 : index
      %75 = vector.load %arg13[%c0_40, %c0_41] : memref<1x1xf32, #tpu.memory_space<vmem>>, vector<1x1xf32>
      tpu.vector_store %arg13[%c0_40, %c0_41], %74 {strides = array<i32>} : memref<1x1xf32, #tpu.memory_space<vmem>>, vector<1x1xf32>,
      %cst_42 = arith.constant 0.000000e+00 : f32
      %76 = vector.broadcast %cst_42 : f32 to vector<1x1xf32>
      %c0_43 = arith.constant 0 : index
      %c0_44 = arith.constant 0 : index
      %77 = vector.load %arg14[%c0_43, %c0_44] : memref<1x1xf32, #tpu.memory_space<vmem>>, vector<1x1xf32>
      tpu.vector_store %arg14[%c0_43, %c0_44], %76 {strides = array<i32>} : memref<1x1xf32, #tpu.memory_space<vmem>>, vector<1x1xf32>,
      %cst_45 = arith.constant 0.000000e+00 : f32
      %78 = vector.broadcast %cst_45 : f32 to vector<1x512xf32>
      %c0_46 = arith.constant 0 : index
      %c0_47 = arith.constant 0 : index
      %79 = vector.load %arg15[%c0_46, %c0_47] : memref<1x512xf32, #tpu.memory_space<vmem>>, vector<1x512xf32>
      tpu.vector_store %arg15[%c0_46, %c0_47], %78 {strides = array<i32>} : memref<1x512xf32, #tpu.memory_space<vmem>>, vector<1x512xf32>,
    } else {
    }
    %c0 = arith.constant 0 : index
    %c0_1 = arith.constant 0 : index
    %c0_2 = arith.constant 0 : index
    %3 = vector.load %arg2[%c0, %c0_1, %c0_2] : memref<1x256x2048xbf16, #tpu.memory_space<vmem>>, vector<1x256x2048xbf16>
    %4 = vector.shape_cast %3 : vector<1x256x2048xbf16> to vector<256x2048xbf16>
    %c0_3 = arith.constant 0 : index
    %c0_4 = arith.constant 0 : index
    %5 = vector.load %arg3[%c0_3, %c0_4] : memref<2048x512xbf16, #tpu.memory_space<vmem>>, vector<2048x512xbf16>
    %cst = arith.constant dense<0.000000e+00> : vector<256x512xf32>
    %6 = tpu.matmul %4, %5, %cst {dimension_numbers = #tpu.dot_dimension_numbers<[1], [0], [0], [1], [0, 0, 1, 1], [], []>} : vector<256x2048xbf16>, vector<2048x512xbf16>, vector<256x512xf32> -> vector<256x512xf32>
    %c0_5 = arith.constant 0 : index
    %c0_6 = arith.constant 0 : index
    %7 = vector.load %arg4[%c0_5, %c0_6] : memref<1x512xf32, #tpu.memory_space<vmem>>, vector<1x512xf32>
    %8 = vector.broadcast %7 : vector<1x512xf32> to vector<256x512xf32>
    %9 = arith.addf %6, %8 : vector<256x512xf32>
    %cst_7 = arith.constant 0.000000e+00 : f32
    %10 = vector.broadcast %cst_7 : f32 to vector<256x512xf32>
    %11 = arith.maximumf %9, %10 : vector<256x512xf32>
    %12 = arith.truncf %11 : vector<256x512xf32> to vector<256x512xbf16>
    %c0_8 = arith.constant 0 : index
    %c0_9 = arith.constant 0 : index
    %13 = vector.load %arg5[%c0_8, %c0_9] : memref<512x256xbf16, #tpu.memory_space<vmem>>, vector<512x256xbf16>
    %cst_10 = arith.constant dense<0.000000e+00> : vector<256x256xf32>
    %14 = tpu.matmul %12, %13, %cst_10 {dimension_numbers = #tpu.dot_dimension_numbers<[1], [0], [0], [1], [0, 0, 1, 1], [], []>} : vector<256x512xbf16>, vector<512x256xbf16>, vector<256x256xf32> -> vector<256x256xf32>
    %c0_11 = arith.constant 0 : index
    %c0_12 = arith.constant 0 : index
    %15 = vector.load %arg6[%c0_11, %c0_12] : memref<1x256xf32, #tpu.memory_space<vmem>>, vector<1x256xf32>
    %16 = vector.broadcast %15 : vector<1x256xf32> to vector<256x256xf32>
    %17 = arith.addf %14, %16 : vector<256x256xf32>
    %18 = vector.extract_strided_slice %17 {offsets = [0, 0], sizes = [256, 128], strides = [1, 1]} : vector<256x256xf32> to vector<256x128xf32>
    %19 = math.tanh %18 : vector<256x128xf32>
    %20 = vector.extract_strided_slice %17 {offsets = [0, 128], sizes = [256, 128], strides = [1, 1]} : vector<256x256xf32> to vector<256x128xf32>
    %21 = arith.negf %20 : vector<256x128xf32>
    %22 = math.exp %21 : vector<256x128xf32>
    %cst_13 = arith.constant 1.000000e+00 : f32
    %23 = vector.broadcast %cst_13 : f32 to vector<256x128xf32>
    %24 = arith.addf %23, %22 : vector<256x128xf32>
    %25 = arith.divf %23, %24 : vector<256x128xf32>
    %26 = arith.mulf %19, %25 : vector<256x128xf32>
    %c0_14 = arith.constant 0 : index
    %c0_15 = arith.constant 0 : index
    %27 = vector.load %arg7[%c0_14, %c0_15] : memref<1x128xf32, #tpu.memory_space<vmem>>, vector<1x128xf32>
    %28 = vector.broadcast %27 : vector<1x128xf32> to vector<256x128xf32>
    %29 = arith.mulf %26, %28 : vector<256x128xf32>
    %cst_16 = arith.constant dense<0.000000e+00> : vector<256xf32>
    %30 = vector.multi_reduction <add>, %29, %cst_16 [1] : vector<256x128xf32> to vector<256xf32>
    %31 = vector.shape_cast %30 : vector<256xf32> to vector<256x1xf32>
    %32 = tpu.transpose %31, [1, 0] : vector<256x1xf32> -> vector<1x256xf32>
    %c0_17 = arith.constant 0 : index
    %c0_18 = arith.constant 0 : index
    %33 = vector.load %arg8[%c0_17, %c0_18] : memref<1x1xf32, #tpu.memory_space<vmem>>, vector<1x1xf32>
    %34 = vector.broadcast %33 : vector<1x1xf32> to vector<1x256xf32>
    %35 = arith.addf %32, %34 : vector<1x256xf32>
    %c256_i32 = arith.constant 256 : i32
    %36 = arith.muli %arg1, %c256_i32 : i32
    %37 = tpu.assume_multiple %36, 256 : i32
    %38 = tpu.iota {dimensions = array<i32: 1>} : vector<1x256xi32>
    %39 = vector.broadcast %37 : i32 to vector<1x256xi32>
    %40 = arith.addi %38, %39 : vector<1x256xi32>
    %c8_i32 = arith.constant 8 : i32
    %41 = vector.broadcast %c8_i32 : i32 to vector<1x256xi32>
    %42 = arith.cmpi slt, %40, %41 : vector<1x256xi32>
    %cst_19 = arith.constant 0xFF800000 : f32
    %43 = vector.broadcast %cst_19 : f32 to vector<1x256xf32>
    %44 = arith.select %42, %35, %43 : vector<1x256xi1>, vector<1x256xf32>
    %c0_20 = arith.constant 0 : index
    %c0_21 = arith.constant 0 : index
    %45 = arith.index_cast %37 : i32 to index
    %46 = vector.load %arg12[%c0_20, %c0_21, %45] : memref<1x1x256xf32, #tpu.memory_space<vmem>>, vector<1x1x256xf32>
    %47 = vector.shape_cast %46 : vector<1x1x256xf32> to vector<1x256xf32>
    %48 = vector.shape_cast %44 : vector<1x256xf32> to vector<1x1x256xf32>
    tpu.vector_store %arg12[%c0_20, %c0_21, %45], %48 {strides = array<i32>} : memref<1x1x256xf32, #tpu.memory_space<vmem>>, vector<1x1x256xf32>,
    %c0_22 = arith.constant 0 : index
    %c0_23 = arith.constant 0 : index
    %49 = vector.load %arg13[%c0_22, %c0_23] : memref<1x1xf32, #tpu.memory_space<vmem>>, vector<1x1xf32>
    %cst_24 = arith.constant dense<0xFF800000> : vector<1xf32>
    %50 = vector.multi_reduction <maximumf>, %44, %cst_24 [1] : vector<1x256xf32> to vector<1xf32>
    %51 = vector.shape_cast %50 : vector<1xf32> to vector<1x1xf32>
    %52 = arith.maximumf %49, %51 : vector<1x1xf32>
    %53 = arith.subf %49, %52 : vector<1x1xf32>
    %54 = math.exp %53 : vector<1x1xf32>
    %55 = vector.broadcast %52 : vector<1x1xf32> to vector<1x256xf32>
    %56 = arith.subf %44, %55 : vector<1x256xf32>
    %57 = math.exp %56 : vector<1x256xf32>
    %c0_25 = arith.constant 0 : index
    %c0_26 = arith.constant 0 : index
    %58 = vector.load %arg14[%c0_25, %c0_26] : memref<1x1xf32, #tpu.memory_space<vmem>>, vector<1x1xf32>
    %59 = arith.mulf %58, %54 : vector<1x1xf32>
    %cst_27 = arith.constant dense<0.000000e+00> : vector<1xf32>
    %60 = vector.multi_reduction <add>, %57, %cst_27 [1] : vector<1x256xf32> to vector<1xf32>
    %61 = vector.shape_cast %60 : vector<1xf32> to vector<1x1xf32>
    %62 = arith.addf %59, %61 : vector<1x1xf32>
    %c0_28 = arith.constant 0 : index
    %c0_29 = arith.constant 0 : index
    %63 = vector.load %arg14[%c0_28, %c0_29] : memref<1x1xf32, #tpu.memory_space<vmem>>, vector<1x1xf32>
    tpu.vector_store %arg14[%c0_28, %c0_29], %62 {strides = array<i32>} : memref<1x1xf32, #tpu.memory_space<vmem>>, vector<1x1xf32>,
    %c0_30 = arith.constant 0 : index
    %c0_31 = arith.constant 0 : index
    %64 = vector.load %arg15[%c0_30, %c0_31] : memref<1x512xf32, #tpu.memory_space<vmem>>, vector<1x512xf32>
    %65 = vector.broadcast %54 : vector<1x1xf32> to vector<1x512xf32>
    %66 = arith.mulf %64, %65 : vector<1x512xf32>
    %cst_32 = arith.constant dense<0.000000e+00> : vector<1x512xf32>
    %67 = tpu.matmul %57, %11, %cst_32 {dimension_numbers = #tpu.dot_dimension_numbers<[1], [0], [0], [1], [0, 0, 1, 1], [], []>} : vector<1x256xf32>, vector<256x512xf32>, vector<1x512xf32> -> vector<1x512xf32>
    %68 = arith.addf %66, %67 : vector<1x512xf32>
    %c0_33 = arith.constant 0 : index
    %c0_34 = arith.constant 0 : index
    %69 = vector.load %arg15[%c0_33, %c0_34] : memref<1x512xf32, #tpu.memory_space<vmem>>, vector<1x512xf32>
    tpu.vector_store %arg15[%c0_33, %c0_34], %68 {strides = array<i32>} : memref<1x512xf32, #tpu.memory_space<vmem>>, vector<1x512xf32>,
    %c0_35 = arith.constant 0 : index
    %c0_36 = arith.constant 0 : index
    %70 = vector.load %arg13[%c0_35, %c0_36] : memref<1x1xf32, #tpu.memory_space<vmem>>, vector<1x1xf32>
    tpu.vector_store %arg13[%c0_35, %c0_36], %52 {strides = array<i32>} : memref<1x1xf32, #tpu.memory_space<vmem>>, vector<1x1xf32>,
    %c0_i32_37 = arith.constant 0 : i32
    %71 = arith.cmpi eq, %arg1, %c0_i32_37 : i32
    %72 = arith.extui %71 : i1 to i32
    %c0_i32_38 = arith.constant 0 : i32
    %73 = arith.cmpi ne, %72, %c0_i32_38 : i32
    scf.if %73 {
      %c0_39 = arith.constant 0 : index
      %c0_40 = arith.constant 0 : index
      %74 = vector.load %arg14[%c0_39, %c0_40] : memref<1x1xf32, #tpu.memory_space<vmem>>, vector<1x1xf32>
      %75 = tpu.reciprocal %74 : vector<1x1xf32> -> vector<1x1xf32>
      %c0_41 = arith.constant 0 : index
      %c0_42 = arith.constant 0 : index
      %c0_43 = arith.constant 0 : index
      %76 = vector.load %arg12[%c0_41, %c0_42, %c0_43] : memref<1x1x256xf32, #tpu.memory_space<vmem>>, vector<1x1x256xf32>
      %77 = vector.shape_cast %76 : vector<1x1x256xf32> to vector<1x256xf32>
      %c0_44 = arith.constant 0 : index
      %c0_45 = arith.constant 0 : index
      %78 = vector.load %arg13[%c0_44, %c0_45] : memref<1x1xf32, #tpu.memory_space<vmem>>, vector<1x1xf32>
      %79 = vector.broadcast %78 : vector<1x1xf32> to vector<1x256xf32>
      %80 = arith.subf %77, %79 : vector<1x256xf32>
      %81 = math.exp %80 : vector<1x256xf32>
      %82 = vector.broadcast %75 : vector<1x1xf32> to vector<1x256xf32>
      %83 = arith.mulf %81, %82 : vector<1x256xf32>
      %c0_46 = arith.constant 0 : index
      %c0_47 = arith.constant 0 : index
      %c0_48 = arith.constant 0 : index
      %84 = vector.load %arg12[%c0_46, %c0_47, %c0_48] : memref<1x1x256xf32, #tpu.memory_space<vmem>>, vector<1x1x256xf32>
      %85 = vector.shape_cast %84 : vector<1x1x256xf32> to vector<1x256xf32>
      %86 = vector.shape_cast %83 : vector<1x256xf32> to vector<1x1x256xf32>
      tpu.vector_store %arg12[%c0_46, %c0_47, %c0_48], %86 {strides = array<i32>} : memref<1x1x256xf32, #tpu.memory_space<vmem>>, vector<1x1x256xf32>,
      %c0_49 = arith.constant 0 : index
      %c0_50 = arith.constant 0 : index
      %87 = vector.load %arg15[%c0_49, %c0_50] : memref<1x512xf32, #tpu.memory_space<vmem>>, vector<1x512xf32>
      %88 = vector.broadcast %75 : vector<1x1xf32> to vector<1x512xf32>
      %89 = arith.mulf %87, %88 : vector<1x512xf32>
      %c0_51 = arith.constant 0 : index
      %c0_52 = arith.constant 0 : index
      %90 = vector.load %arg9[%c0_51, %c0_52] : memref<512x10xf32, #tpu.memory_space<vmem>>, vector<512x10xf32>
      %cst_53 = arith.constant dense<0.000000e+00> : vector<1x10xf32>
      %91 = tpu.matmul %89, %90, %cst_53 {dimension_numbers = #tpu.dot_dimension_numbers<[1], [0], [0], [1], [0, 0, 1, 1], [], []>} : vector<1x512xf32>, vector<512x10xf32>, vector<1x10xf32> -> vector<1x10xf32>
      %c0_54 = arith.constant 0 : index
      %c0_55 = arith.constant 0 : index
      %92 = vector.load %arg10[%c0_54, %c0_55] : memref<1x10xf32, #tpu.memory_space<vmem>>, vector<1x10xf32>
      %93 = arith.addf %91, %92 : vector<1x10xf32>
      %c0_56 = arith.constant 0 : index
      %c0_57 = arith.constant 0 : index
      %c0_58 = arith.constant 0 : index
      %94 = vector.load %arg11[%c0_56, %c0_57, %c0_58] : memref<1x1x10xf32, #tpu.memory_space<vmem>>, vector<1x1x10xf32>
      %95 = vector.shape_cast %94 : vector<1x1x10xf32> to vector<1x10xf32>
      %96 = vector.shape_cast %93 : vector<1x10xf32> to vector<1x1x10xf32>
      tpu.vector_store %arg11[%c0_56, %c0_57, %c0_58], %96 {strides = array<i32>} : memref<1x1x10xf32, #tpu.memory_space<vmem>>, vector<1x1x10xf32>,
    } else {
    }
    return
  }
  func.func @transform_0(%arg0: i32, %arg1: i32) -> (i32, i32, i32) {
    %c0_i32 = arith.constant 0 : i32
    %c0_i32_0 = arith.constant 0 : i32
    return %arg0, %arg1, %c0_i32 : i32, i32, i32
  }
  func.func @transform_1(%arg0: i32, %arg1: i32) -> (i32, i32) {
    %c0_i32 = arith.constant 0 : i32
    %c0_i32_0 = arith.constant 0 : i32
    %c0_i32_1 = arith.constant 0 : i32
    return %c0_i32, %c0_i32_0 : i32, i32
  }
  func.func @transform_2(%arg0: i32, %arg1: i32) -> (i32, i32) {
    %c0_i32 = arith.constant 0 : i32
    %c0_i32_0 = arith.constant 0 : i32
    %c0_i32_1 = arith.constant 0 : i32
    return %c0_i32, %c0_i32_0 : i32, i32
  }
  func.func @transform_3(%arg0: i32, %arg1: i32) -> (i32, i32) {
    %c0_i32 = arith.constant 0 : i32
    %c0_i32_0 = arith.constant 0 : i32
    %c0_i32_1 = arith.constant 0 : i32
    return %c0_i32, %c0_i32_0 : i32, i32
  }
  func.func @transform_4(%arg0: i32, %arg1: i32) -> (i32, i32) {
    %c0_i32 = arith.constant 0 : i32
    %c0_i32_0 = arith.constant 0 : i32
    %c0_i32_1 = arith.constant 0 : i32
    return %c0_i32, %c0_i32_0 : i32, i32
  }
  func.func @transform_5(%arg0: i32, %arg1: i32) -> (i32, i32) {
    %c0_i32 = arith.constant 0 : i32
    %c0_i32_0 = arith.constant 0 : i32
    %c0_i32_1 = arith.constant 0 : i32
    return %c0_i32, %c0_i32_0 : i32, i32
  }
  func.func @transform_6(%arg0: i32, %arg1: i32) -> (i32, i32) {
    %c0_i32 = arith.constant 0 : i32
    %c0_i32_0 = arith.constant 0 : i32
    %c0_i32_1 = arith.constant 0 : i32
    return %c0_i32, %c0_i32_0 : i32, i32
  }
  func.func @transform_7(%arg0: i32, %arg1: i32) -> (i32, i32) {
    %c0_i32 = arith.constant 0 : i32
    %c0_i32_0 = arith.constant 0 : i32
    %c0_i32_1 = arith.constant 0 : i32
    return %c0_i32, %c0_i32_0 : i32, i32
  }
  func.func @transform_8(%arg0: i32, %arg1: i32) -> (i32, i32) {
    %c0_i32 = arith.constant 0 : i32
    %c0_i32_0 = arith.constant 0 : i32
    %c0_i32_1 = arith.constant 0 : i32
    return %c0_i32, %c0_i32_0 : i32, i32
  }
  func.func @transform_9(%arg0: i32, %arg1: i32) -> (i32, i32, i32) {
    %c0_i32 = arith.constant 0 : i32
    %c0_i32_0 = arith.constant 0 : i32
    %c0_i32_1 = arith.constant 0 : i32
    return %arg0, %c0_i32, %c0_i32_0 : i32, i32, i32
  }
  func.func @transform_10(%arg0: i32, %arg1: i32) -> (i32, i32, i32) {
    %c0_i32 = arith.constant 0 : i32
    %c0_i32_0 = arith.constant 0 : i32
    %c0_i32_1 = arith.constant 0 : i32
    return %arg0, %c0_i32, %c0_i32_0 : i32, i32, i32
  }
}

</mosaic_0001>

<bundles_post_ra>
// kernel: tpu_custom_call.1
= control target key start
LH: loop header
LB: loop body
LE: loop exit
PB: predicated region body
PF: predicated region fallthrough
CT: control target
= control target key end

     0   :  { %s15181_s0 = inlined_call_operand.hbm [shape: bf16[1,256,2048], index: 0, kind: input, shape index: {}]   ;;  %s15182_s1 = inlined_call_operand.hbm [shape: bf16[2048,512], index: 1, kind: input, shape index: {}]   ;;  %s15183_s2 = inlined_call_operand.hbm [shape: f32[1,512], index: 2, kind: input, shape index: {}]   ;;  %s15184_s3 = inlined_call_operand.hbm [shape: bf16[512,256], index: 3, kind: input, shape index: {}]   ;;  %s15185_s4 = inlined_call_operand.hbm [shape: f32[1,256], index: 4, kind: input, shape index: {}]   ;;  %s15186_s5 = inlined_call_operand.hbm [shape: f32[1,128], index: 5, kind: input, shape index: {}]   ;;  %s15187_s6 = inlined_call_operand.<no memory space> [shape: f32[1,1], index: 6, kind: input, shape index: {}]   ;;  %s15188_s7 = inlined_call_operand.vmem [shape: f32[512,10], index: 7, kind: input, shape index: {}]   ;;  %s15189_s8 = inlined_call_operand.hbm [shape: f32[1,10], index: 8, kind: input, shape index: {}]   ;;  %s15190_s9 = inlined_call_operand.hbm [shape: f32[1,1,10], index: 9, kind: output, shape index: {0}]   ;;  %s15191_s10 = inlined_call_operand.hbm [shape: f32[1,1,256], index: 10, kind: output, shape index: {1}]  }
   0x1   :  { %v16_v0 = vstv %s15187_s6 }
   0x2   :  { %17 = vst [vmem:[#allocation5] sm:$0x1] %v16_v0 }
   0x3   :  { %18 = vsyncpa [#allocation7], 0 }
   0x4   :  { %19 = vsyncpa [#allocation10], 0 }
   0x5   :  { %20 = vsyncpa [#allocation13], 0 }
   0x6   :  { %21 = vsyncpa [#allocation16], 0 }
   0x7   :  { %22 = vsyncpa [#allocation8], 0 }
   0x8   :  { %23 = vsyncpa [#allocation20], 0  ;;  %s13265_s15 = smov [#allocation9]   ;;  %s13055_s19 = scalar_lea.hbm %s15182_s1, 65536 }
   0x9   :  { %s41_s16 = sshll.u32 %s13265_s15, 4  ;;  %p13056_p0 = scmp.ne.s32.totalorder %s15182_s1, %s13055_s19  ;;  %s42_s16 = int_to_ptr.vmem [resolvable:$true] %s41_s16 }
   0xa   :  { %p13059_p1 = scmp.lt.u32.totalorder %s13055_s19, %s15182_s1 }
   0xc   :  { %p13061_p2 = pnand %p13059_p1, %p13056_p0 }
   0xe   :  { %13064 = shalt.err (!%p13061_p2)
}
   0xf   :  { %s13065_s23 = scalar_lea.vmem %s42_s16, 65536  ;;  %p13070_p4 = scmp.lt.s32.totalorder %s42_s16, %s42_s16 }
  0x10   :  { %p13066_p3 = scmp.ne.s32.totalorder %s42_s16, %s13065_s23  ;;  %p13071_p5 = scmp.lt.s32.totalorder %s13065_s23, %s13065_s23 }
  0x12   :  { %p13072_p6 = por %p13071_p5, %p13070_p4 }
  0x14   :  { %p13073_p7 = pnand %p13072_p6, %p13066_p3 }
  0x16   :  { %13076 = shalt.err (!%p13073_p7)
}
  0x17   :  { %s13266_s24 = smov 256   ;;  %s13267_s25 = smov 16  }
  0x18   :  { %47 = dma.hbm_to_vmem [thread:$0]  %s15182_s1, 65536, %s42_s16, [#allocation10], %s13266_s24, %s13266_s24, %s13267_s25  }
  0x19   :  { %s13268_s28 = smov [#allocation12]   ;;  %s13077_s12 = scalar_lea.hbm %s15184_s3, 8192 }
  0x1a   :  { %s63_s29 = sshll.u32 %s13268_s28, 4  ;;  %p13078_p8 = scmp.ne.s32.totalorder %s15184_s3, %s13077_s12  ;;  %s64_s29 = int_to_ptr.vmem [resolvable:$true] %s63_s29 }
  0x1b   :  { %p13081_p9 = scmp.lt.u32.totalorder %s13077_s12, %s15184_s3 }
  0x1d   :  { %p13083_p10 = pnand %p13081_p9, %p13078_p8 }
  0x1f   :  { %13086 = shalt.err (!%p13083_p10)
}
  0x20   :  { %s13087_s18 = scalar_lea.vmem %s64_s29, 8192  ;;  %p13092_p12 = scmp.lt.s32.totalorder %s64_s29, %s64_s29 }
  0x21   :  { %p13088_p11 = scmp.ne.s32.totalorder %s64_s29, %s13087_s18  ;;  %p13093_p13 = scmp.lt.s32.totalorder %s13087_s18, %s13087_s18 }
  0x23   :  { %p13094_p0 = por %p13093_p13, %p13092_p12 }
  0x25   :  { %p13095_p1 = pnand %p13094_p0, %p13088_p11 }
  0x27   :  { %13098 = shalt.err (!%p13095_p1)
}
  0x28   :  { %s13269_s1 = smov 128   ;;  %s13270_s16 = smov 8  }
  0x29   :  { %69 = dma.hbm_to_vmem [thread:$0]  %s15184_s3, 8192, %s64_s29, [#allocation13], %s13269_s1, %s13269_s1, %s13270_s16  }
  0x2a   :  { %s13271_s21 = smov [#allocation15]   ;;  %s13272_s6 = smov [#allocation6]  }
  0x2b   :  { %s86_s22 = sshll.u32 %s13271_s21, 4  ;;  %s29_s23 = sshll.u32 %s13272_s6, 4  ;;  %s87_s22 = int_to_ptr.vmem [resolvable:$true] %s86_s22  ;;  %s13366_s23 = int_to_ptr.vmem [resolvable:$true] %s29_s23 }
  0x2c   :  { %s13099_s26 = scalar_lea.hbm %s15186_s5, 16 }
  0x2d   :  { %p13100_p2 = scmp.ne.s32.totalorder %s15186_s5, %s13099_s26  ;;  %p13103_p3 = scmp.lt.u32.totalorder %s13099_s26, %s15186_s5 }
  0x2f   :  { %p13105_p4 = pnand %p13103_p3, %p13100_p2 }
  0x31   :  { %13108 = shalt.err (!%p13105_p4)
}
  0x32   :  { %s13109_s3 = scalar_lea.vmem %s87_s22, 16  ;;  %s13113_s29 = scalar_lea.vmem %s87_s22, 32 }
  0x33   :  { %p13110_p5 = scmp.ne.s32.totalorder %s87_s22, %s13109_s3  ;;  %p13114_p6 = scmp.lt.s32.totalorder %s87_s22, %s87_s22 }
  0x34   :  { %p13115_p7 = scmp.lt.s32.totalorder %s13113_s29, %s13109_s3 }
  0x36   :  { %p13116_p8 = por %p13115_p7, %p13114_p6 }
  0x38   :  { %p13117_p9 = pnand %p13116_p8, %p13110_p5 }
  0x3a   :  { %13120 = shalt.err (!%p13117_p9)
}
  0x3b   :  { %89 = dma.hbm_to_vmem [thread:$0]  %s15186_s5, 16, %s87_s22, [#allocation16]  }
  0x3c   :  { %s13121_s17 = scalar_lea.hbm %s15181_s0, 32768 }
  0x3d   :  { %p13122_p10 = scmp.ne.s32.totalorder %s15181_s0, %s13121_s17  ;;  %p13125_p11 = scmp.lt.u32.totalorder %s13121_s17, %s15181_s0 }
  0x3f   :  { %p13127_p12 = pnand %p13125_p11, %p13122_p10 }
  0x41   :  { %13130 = shalt.err (!%p13127_p12)
}
  0x42   :  { %s13131_s20 = scalar_lea.vmem %s13366_s23, 32768  ;;  %p13136_p0 = scmp.lt.s32.totalorder %s13366_s23, %s13366_s23 }
  0x43   :  { %p13132_p13 = scmp.ne.s32.totalorder %s13366_s23, %s13131_s20  ;;  %p13137_p1 = scmp.lt.s32.totalorder %s13131_s20, %s13131_s20 }
  0x45   :  { %p13138_p2 = por %p13137_p1, %p13136_p0 }
  0x47   :  { %p13139_p3 = pnand %p13138_p2, %p13132_p13 }
  0x49   :  { %13142 = shalt.err (!%p13139_p3)
}
  0x4a   :  { %s13273_s5 = smov 1024   ;;  %s13274_s21 = smov 64  }
  0x4b   :  { %35 = dma.hbm_to_vmem [thread:$0]  %s15181_s0, 32768, %s13366_s23, [#allocation7], %s13273_s5, %s13273_s5, %s13274_s21  }
  0x4c   :  { %s13275_s24 = smov [#allocation11]   ;;  %s13276_s26 = smov [#allocation14]  }
  0x4d   :  { %s54_s25 = sshll.u32 %s13275_s24, 4  ;;  %s76_s27 = sshll.u32 %s13276_s26, 4  ;;  %s55_s25 = int_to_ptr.vmem [resolvable:$true] %s54_s25  ;;  %s77_s27 = int_to_ptr.vmem [resolvable:$true] %s76_s27 }
  0x4e   :  { %s13143_s11 = scalar_lea.hbm %s15183_s2, 64 }
  0x4f   :  { %p13144_p4 = scmp.ne.s32.totalorder %s15183_s2, %s13143_s11  ;;  %p13147_p5 = scmp.lt.u32.totalorder %s13143_s11, %s15183_s2 }
  0x51   :  { %p13149_p6 = pnand %p13147_p5, %p13144_p4 }
  0x53   :  { %13152 = shalt.err (!%p13149_p6)
}
  0x54   :  { %s13153_s0 = scalar_lea.vmem %s55_s25, 64  ;;  %p13158_p8 = scmp.lt.s32.totalorder %s55_s25, %s55_s25 }
  0x55   :  { %p13154_p7 = scmp.ne.s32.totalorder %s55_s25, %s13153_s0  ;;  %p13159_p9 = scmp.lt.s32.totalorder %s13153_s0, %s13153_s0 }
  0x57   :  { %p13160_p10 = por %p13159_p9, %p13158_p8 }
  0x59   :  { %p13161_p11 = pnand %p13160_p10, %p13154_p7 }
  0x5b   :  { %13164 = shalt.err (!%p13161_p11)
}
  0x5c   :  { %57 = dma.hbm_to_vmem [thread:$0]  %s15183_s2, 64, %s55_s25, [#allocation10]  }
  0x5d   :  { %s13165_s18 = scalar_lea.hbm %s15185_s4, 32 }
  0x5e   :  { %p13166_p12 = scmp.ne.s32.totalorder %s15185_s4, %s13165_s18  ;;  %p13169_p13 = scmp.lt.u32.totalorder %s13165_s18, %s15185_s4 }
  0x60   :  { %p13171_p0 = pnand %p13169_p13, %p13166_p12 }
  0x62   :  { %13174 = shalt.err (!%p13171_p0)
}
  0x63   :  { %s13175_s5 = scalar_lea.vmem %s77_s27, 32  ;;  %p13180_p2 = scmp.lt.s32.totalorder %s77_s27, %s77_s27 }
  0x64   :  { %p13176_p1 = scmp.ne.s32.totalorder %s77_s27, %s13175_s5  ;;  %p13181_p3 = scmp.lt.s32.totalorder %s13175_s5, %s13175_s5 }
  0x66   :  { %p13182_p4 = por %p13181_p3, %p13180_p2 }
  0x68   :  { %p13183_p5 = pnand %p13182_p4, %p13176_p1 }
  0x6a   :  { %13186 = shalt.err (!%p13183_p5)
}
  0x6b   :  { %79 = dma.hbm_to_vmem [thread:$0]  %s15185_s4, 32, %s77_s27, [#allocation13]  }
  0x6c   :  { %s13277_s22 = smov [#allocation17]   ;;  %s13187_s26 = scalar_lea.hbm %s15189_s8, 16 }
  0x6d   :  { %s100_s6 = sshll.u32 %s13277_s22, 4  ;;  %p13188_p6 = scmp.ne.s32.totalorder %s15189_s8, %s13187_s26  ;;  %s101_s6 = int_to_ptr.vmem [resolvable:$true] %s100_s6 }
  0x6e   :  { %p13191_p7 = scmp.lt.u32.totalorder %s13187_s26, %s15189_s8 }
  0x70   :  { %p13193_p8 = pnand %p13191_p7, %p13188_p6 }
  0x72   :  { %13196 = shalt.err (!%p13193_p8)
}
  0x73   :  { %s13197_s29 = scalar_lea.vmem %s101_s6, 16  ;;  %s13201_s4 = scalar_lea.vmem %s101_s6, 32 }
  0x74   :  { %p13198_p9 = scmp.ne.s32.totalorder %s101_s6, %s13197_s29  ;;  %p13202_p10 = scmp.lt.s32.totalorder %s101_s6, %s101_s6 }
  0x75   :  { %p13203_p11 = scmp.lt.s32.totalorder %s13201_s4, %s13197_s29 }
  0x77   :  { %p13204_p12 = por %p13203_p11, %p13202_p10 }
  0x79   :  { %p13205_p13 = pnand %p13204_p12, %p13198_p9 }
  0x7b   :  { %13208 = shalt.err (!%p13205_p13)
}
  0x7c   :  { %103 = dma.hbm_to_vmem [thread:$0]  %s15189_s8, 16, %s101_s6, [#allocation16]  }
  0x7d   :  { %13253 = dma.done.wait [#allocation7], 32768  }
  0x7e   :  { %13254 = vsyncadd [#allocation7], 4294934528 }
  0x7f   :  { %13255 = dma.done.wait [#allocation10], 65600  }
  0x80   :  { %13256 = vsyncadd [#allocation10], 4294901696 }
  0x81   :  { %13257 = dma.done.wait [#allocation13], 8224  }
  0x82   :  { %13258 = vsyncadd [#allocation13], 4294959072 }
  0x83   :  { %13259 = dma.done.wait [#allocation16], 32  }
  0x84   :  { %13260 = vsyncadd [#allocation16], 4294967264  ;;  %v12085_v1 = vld [vmem:[#allocation9 + $0x4] ss:$16 sps:$4 sm:$0xff]   ;;  %v12087_v2 = vld [vmem:[#allocation9] ss:$16 sps:$4 sm:$0xff]  }
  0x85   :  { %4767 = vmatprep.subr.bf16.mxu0 %v12085_v1  ;;  %10944 = vmatprep.subr.bf16.mxu1 %v12085_v1  ;;  %v12088_v3 = vld [vmem:[#allocation9 + $0x24] ss:$16 sps:$4 sm:$0xff]   ;;  %v12090_v4 = vld [vmem:[#allocation9 + $0x20] ss:$16 sps:$4 sm:$0xff]   ;;  %v12138_v40 = vld [vmem:[#allocation9 + $0xc] ss:$16 sps:$4 sm:$0xff]  }
  0x86   :  { %4768 = vmatpush1.bf16.msra.mxu0 %v12087_v2  ;;  %10960 = vmatpush1.bf16.msra.mxu1 %v12087_v2  ;;  %v12091_v5 = vld [vmem:[#allocation9 + $0x44] ss:$16 sps:$4 sm:$0xff]   ;;  %v12093_v6 = vld [vmem:[#allocation9 + $0x40] ss:$16 sps:$4 sm:$0xff]   ;;  %v12136_v48 = vld [vmem:[#allocation9 + $0x8] ss:$16 sps:$4 sm:$0xff]  }
  0x87   :  { %4769 = vmatprep.subr.bf16.mxu0 %v12088_v3  ;;  %10945 = vmatprep.subr.bf16.mxu1 %v12088_v3  ;;  %v12094_v7 = vld [vmem:[#allocation9 + $0x64] ss:$16 sps:$4 sm:$0xff]   ;;  %v12096_v8 = vld [vmem:[#allocation9 + $0x60] ss:$16 sps:$4 sm:$0xff]   ;;  %v12144_v50 = vld [vmem:[#allocation9 + $0x2c] ss:$16 sps:$4 sm:$0xff]  }
  0x88   :  { %v12097_v9 = vld [vmem:[#allocation9 + $0x84] ss:$16 sps:$4 sm:$0xff]   ;;  %v12099_v10 = vld [vmem:[#allocation9 + $0x80] ss:$16 sps:$4 sm:$0xff]   ;;  %v12142_v54 = vld [vmem:[#allocation9 + $0x28] ss:$16 sps:$4 sm:$0xff]  }
  0x89   :  { %v12100_v11 = vld [vmem:[#allocation9 + $0xa4] ss:$16 sps:$4 sm:$0xff]   ;;  %v12102_v12 = vld [vmem:[#allocation9 + $0xa0] ss:$16 sps:$4 sm:$0xff]   ;;  %v12150_v56 = vld [vmem:[#allocation9 + $0x4c] ss:$16 sps:$4 sm:$0xff]  }
  0x8a   :  { %4770 = vmatpush1.bf16.msra.mxu0 %v12090_v4  ;;  %10961 = vmatpush1.bf16.msra.mxu1 %v12090_v4  ;;  %v12103_v13 = vld [vmem:[#allocation9 + $0xc4] ss:$16 sps:$4 sm:$0xff]   ;;  %v12105_v19 = vld [vmem:[#allocation9 + $0xc0] ss:$16 sps:$4 sm:$0xff]   ;;  %v12148_v0 = vld [vmem:[#allocation9 + $0x48] ss:$16 sps:$4 sm:$0xff]  }
  0x8b   :  { %4771 = vmatprep.subr.bf16.mxu0 %v12091_v5  ;;  %10946 = vmatprep.subr.bf16.mxu1 %v12091_v5  ;;  %v13433_v14 = vld [vmem:[#allocation6] sm:$0xff]  ;;  %v12156_v2 = vld [vmem:[#allocation9 + $0x6c] ss:$16 sps:$4 sm:$0xff]   ;;  %vm129_vm0 = vcmask 0   ;;  %vm9302_vm2 = vcmask 1040384   ;;  %s13282_s6 = smov [#allocation19]  }
  0x8c   :  { %v13435_v15 = vld [vmem:[#allocation6 + $0x40] sm:$0xff]  ;;  %s9800_s24 = sshll.u32 %s13282_s6, 4  ;;  %s9801_s24 = int_to_ptr.vmem [resolvable:$true] %s9800_s24 }
  0x8d   :  { %v13439_v16 = vcombine.high %v13433_v14, %v13435_v15  ;;  %v13441_v17 = vld [vmem:[#allocation6 + $0x400] sm:$0xff]  ;;  %v13453_v44 = vcombine.low %v13433_v14, %v13435_v15  ;;  %s13209_s25 = scalar_lea.vmem %s9801_s24, 32  ;;  %p13214_p1 = scmp.lt.s32.totalorder %s9801_s24, %s9801_s24 }
  0x8e   :  { %4772 = vmatpush1.bf16.msra.mxu0 %v12093_v6  ;;  %10962 = vmatpush1.bf16.msra.mxu1 %v12093_v6  ;;  %v13443_v18 = vld [vmem:[#allocation6 + $0x440] sm:$0xff]  ;;  %v12154_v6 = vld [vmem:[#allocation9 + $0x68] ss:$16 sps:$4 sm:$0xff]   ;;  %p13210_p0 = scmp.ne.s32.totalorder %s9801_s24, %s13209_s25  ;;  %p13215_p2 = scmp.lt.s32.totalorder %s13209_s25, %s13209_s25 }
  0x8f   :  { %4773 = vmatprep.subr.bf16.mxu0 %v12094_v7  ;;  %10947 = vmatprep.subr.bf16.mxu1 %v12094_v7  ;;  %v13447_v20 = vcombine.high %v13441_v17, %v13443_v18  ;;  %v12106_v21 = vld [vmem:[#allocation9 + $0xe4] ss:$16 sps:$4 sm:$0xff]   ;;  %v12108_v22 = vld [vmem:[#allocation9 + $0xe0] ss:$16 sps:$4 sm:$0xff]   ;;  %v13457_v45 = vcombine.low %v13441_v17, %v13443_v18  ;;  %v12160_v17 = vld [vmem:[#allocation9 + $0x88] ss:$16 sps:$4 sm:$0xff]  }
  0x90   :  { %4799 = vmatprep.mubr.bf16.mxu0 %v13439_v16  ;;  %v12109_v23 = vld [vmem:[#allocation9 + $0x104] ss:$16 sps:$4 sm:$0xff]   ;;  %v12111_v24 = vld [vmem:[#allocation9 + $0x100] ss:$16 sps:$4 sm:$0xff]   ;;  %p13216_p3 = por %p13215_p2, %p13214_p1 }
  0x91   :  { %4879 = vmatprep.mubr.bf16.mxu1 %v13447_v20  ;;  %v12112_v25 = vld [vmem:[#allocation9 + $0x124] ss:$16 sps:$4 sm:$0xff]   ;;  %v12114_v26 = vld [vmem:[#allocation9 + $0x120] ss:$16 sps:$4 sm:$0xff]  }
  0x92   :  { %4774 = vmatpush1.bf16.msra.mxu0 %v12096_v8  ;;  %10963 = vmatpush1.bf16.msra.mxu1 %v12096_v8  ;;  %v12115_v27 = vld [vmem:[#allocation9 + $0x144] ss:$16 sps:$4 sm:$0xff]   ;;  %v12117_v28 = vld [vmem:[#allocation9 + $0x140] ss:$16 sps:$4 sm:$0xff]   ;;  %v12162_v8 = vld [vmem:[#allocation9 + $0x8c] ss:$16 sps:$4 sm:$0xff]   ;;  %p13217_p4 = pnand %p13216_p3, %p13210_p0 }
  0x93   :  { %4775 = vmatprep.subr.bf16.mxu0 %v12097_v9  ;;  %10948 = vmatprep.subr.bf16.mxu1 %v12097_v9  ;;  %v12118_v29 = vld [vmem:[#allocation9 + $0x164] ss:$16 sps:$4 sm:$0xff]   ;;  %v12120_v30 = vld [vmem:[#allocation9 + $0x160] ss:$16 sps:$4 sm:$0xff]  }
  0x94   :  { %v12121_v31 = vld [vmem:[#allocation9 + $0x184] ss:$16 sps:$4 sm:$0xff]   ;;  %v12123_v32 = vld [vmem:[#allocation9 + $0x180] ss:$16 sps:$4 sm:$0xff]  }
  0x95   :  { %v12124_v33 = vld [vmem:[#allocation9 + $0x1a4] ss:$16 sps:$4 sm:$0xff]   ;;  %v12126_v34 = vld [vmem:[#allocation9 + $0x1a0] ss:$16 sps:$4 sm:$0xff]  }
  0x96   :  { %4776 = vmatpush1.bf16.msra.mxu0 %v12099_v10  ;;  %10964 = vmatpush1.bf16.msra.mxu1 %v12099_v10  ;;  %v12127_v35 = vld [vmem:[#allocation9 + $0x1c4] ss:$16 sps:$4 sm:$0xff]   ;;  %v12129_v36 = vld [vmem:[#allocation9 + $0x1c0] ss:$16 sps:$4 sm:$0xff]  }
  0x97   :  { %4777 = vmatprep.subr.bf16.mxu0 %v12100_v11  ;;  %10949 = vmatprep.subr.bf16.mxu1 %v12100_v11  ;;  %v12130_v37 = vld [vmem:[#allocation9 + $0x1e4] ss:$16 sps:$4 sm:$0xff]   ;;  %v12132_v38 = vld [vmem:[#allocation9 + $0x1e0] ss:$16 sps:$4 sm:$0xff]  }
  0x98   :  { %v12135_v39 = vld [vmem:[#allocation9 + $0x204] ss:$16 sps:$4 sm:$0xff]   ;;  %v12133_v41 = vld [vmem:[#allocation9 + $0x200] ss:$16 sps:$4 sm:$0xff]  }
  0x99   :  { %v153_v42 = vld [vmem:[#allocation6 + $0x80] sm:$0xff] }
  0x9a   :  { %4778 = vmatpush1.bf16.msra.mxu0 %v12102_v12  ;;  %10965 = vmatpush1.bf16.msra.mxu1 %v12102_v12  ;;  %v161_v43 = vld [vmem:[#allocation6 + $0xc0] sm:$0xff] }
  0x9b   :  { %4779 = vmatprep.subr.bf16.mxu0 %v12103_v13  ;;  %10950 = vmatprep.subr.bf16.mxu1 %v12103_v13  ;;  %v281_v46 = vld [vmem:[#allocation6 + $0x480] sm:$0xff]  ;;  %v13459_v51 = vcombine.high %v153_v42, %v161_v43  ;;  %v13467_v60 = vcombine.low %v153_v42, %v161_v43  ;;  %v12186_v42 = vld [vmem:[#allocation9 + $0x10c] ss:$16 sps:$4 sm:$0xff]  }
  0x9c   :  { %v289_v47 = vld [vmem:[#allocation6 + $0x4c0] sm:$0xff] }
  0x9d   :  { %v12141_v49 = vld [vmem:[#allocation9 + $0x224] ss:$16 sps:$4 sm:$0xff]   ;;  %v13461_v52 = vcombine.high %v281_v46, %v289_v47  ;;  %v12139_v53 = vld [vmem:[#allocation9 + $0x220] ss:$16 sps:$4 sm:$0xff]   ;;  %v13469_v61 = vcombine.low %v281_v46, %v289_v47 }
  0x9e   :  { %4780 = vmatpush1.bf16.msra.mxu0 %v12105_v19  ;;  %10966 = vmatpush1.bf16.msra.mxu1 %v12105_v19  ;;  %v12147_v55 = vld [vmem:[#allocation9 + $0x244] ss:$16 sps:$4 sm:$0xff]   ;;  %v12145_v58 = vld [vmem:[#allocation9 + $0x240] ss:$16 sps:$4 sm:$0xff]   ;;  %v12168_v19 = vld [vmem:[#allocation9 + $0xac] ss:$16 sps:$4 sm:$0xff]  }
  0x9f   :  { %4781 = vmatprep.subr.bf16.mxu0 %v12106_v21  ;;  %10951 = vmatprep.subr.bf16.mxu1 %v12106_v21  ;;  %v169_v57 = vld [vmem:[#allocation6 + $0x100] sm:$0xff] }
  0xa0   :  { %v177_v59 = vld [vmem:[#allocation6 + $0x140] sm:$0xff] }
  0xa1   :  { %v297_v62 = vld [vmem:[#allocation6 + $0x500] sm:$0xff]  ;;  %v13471_v3 = vcombine.high %v169_v57, %v177_v59  ;;  %v13479_v12 = vcombine.low %v169_v57, %v177_v59 }
  0xa2   :  { %4782 = vmatpush1.bf16.msra.mxu0 %v12108_v22  ;;  %10967 = vmatpush1.bf16.msra.mxu1 %v12108_v22  ;;  %v305_v63 = vld [vmem:[#allocation6 + $0x540] sm:$0xff] }
  0xa3   :  { %4783 = vmatprep.subr.bf16.mxu0 %v12109_v23  ;;  %10952 = vmatprep.subr.bf16.mxu1 %v12109_v23  ;;  %v12153_v1 = vld [vmem:[#allocation9 + $0x264] ss:$16 sps:$4 sm:$0xff]   ;;  %v13473_v4 = vcombine.high %v297_v62, %v305_v63  ;;  %v12151_v5 = vld [vmem:[#allocation9 + $0x260] ss:$16 sps:$4 sm:$0xff]   ;;  %v13481_v13 = vcombine.low %v297_v62, %v305_v63  ;;  %v12190_v62 = vld [vmem:[#allocation9 + $0x128] ss:$16 sps:$4 sm:$0xff]  }
  0xa4   :  { %v12159_v7 = vld [vmem:[#allocation9 + $0x284] ss:$16 sps:$4 sm:$0xff]   ;;  %v12157_v9 = vld [vmem:[#allocation9 + $0x280] ss:$16 sps:$4 sm:$0xff]  }
  0xa5   :  { %v185_v10 = vld [vmem:[#allocation6 + $0x180] sm:$0xff] }
  0xa6   :  { %4784 = vmatpush1.bf16.msra.mxu0 %v12111_v24  ;;  %10968 = vmatpush1.bf16.msra.mxu1 %v12111_v24  ;;  %v193_v11 = vld [vmem:[#allocation6 + $0x1c0] sm:$0xff]  ;;  %v12166_v24 = vld [vmem:[#allocation9 + $0xa8] ss:$16 sps:$4 sm:$0xff]  }
  0xa7   :  { %4785 = vmatprep.subr.bf16.mxu0 %v12112_v25  ;;  %10953 = vmatprep.subr.bf16.mxu1 %v12112_v25  ;;  %v313_v14 = vld [vmem:[#allocation6 + $0x580] sm:$0xff]  ;;  %v13483_v21 = vcombine.high %v185_v10, %v193_v11 }
  0xa8   :  { %v321_v15 = vld [vmem:[#allocation6 + $0x5c0] sm:$0xff] }
  0xa9   :  { %v12165_v18 = vld [vmem:[#allocation9 + $0x2a4] ss:$16 sps:$4 sm:$0xff]   ;;  %v13485_v22 = vcombine.high %v313_v14, %v321_v15  ;;  %v12163_v23 = vld [vmem:[#allocation9 + $0x2a0] ss:$16 sps:$4 sm:$0xff]  }
  0xaa   :  { %4786 = vmatpush1.bf16.msra.mxu0 %v12114_v26  ;;  %10969 = vmatpush1.bf16.msra.mxu1 %v12114_v26  ;;  %v12171_v25 = vld [vmem:[#allocation9 + $0x2c4] ss:$16 sps:$4 sm:$0xff]   ;;  %v12174_v26 = vld [vmem:[#allocation9 + $0xcc] ss:$16 sps:$4 sm:$0xff]   ;;  %v12181_v43 = vld [vmem:[#allocation9 + $0x300] ss:$16 sps:$4 sm:$0xff]  }
  0xab   :  { %4787 = vmatprep.subr.bf16.mxu0 %v12115_v27  ;;  %10954 = vmatprep.subr.bf16.mxu1 %v12115_v27  ;;  %v201_v27 = vld [vmem:[#allocation6 + $0x200] sm:$0xff] }
  0xac   :  { %v217_v46 = vld [vmem:[#allocation6 + $0x280] sm:$0xff] }
  0xad   :  { %v12187_v59 = vld [vmem:[#allocation9 + $0x320] ss:$16 sps:$4 sm:$0xff]   ;;  %v12195_v63 = vld [vmem:[#allocation9 + $0x344] ss:$16 sps:$4 sm:$0xff]  }
  0xae   :  { %4788 = vmatpush1.bf16.msra.mxu0 %v12117_v28  ;;  %10970 = vmatpush1.bf16.msra.mxu1 %v12117_v28  ;;  %v209_v28 = vld [vmem:[#allocation6 + $0x240] sm:$0xff] }
  0xaf   :  { %4789 = vmatprep.subr.bf16.mxu0 %v12118_v29  ;;  %10955 = vmatprep.subr.bf16.mxu1 %v12118_v29  ;;  %v13491_v29 = vcombine.low %v185_v10, %v193_v11  ;;  %v13503_v47 = vcombine.low %v201_v27, %v209_v28  ;;  %v12196_v10 = vld [vmem:[#allocation9 + $0x148] ss:$16 sps:$4 sm:$0xff]   ;;  %v12201_v11 = vld [vmem:[#allocation9 + $0x364] ss:$16 sps:$4 sm:$0xff]  }
  0xb2   :  { %4790 = vmatpush1.bf16.msra.mxu0 %v12120_v30  ;;  %10971 = vmatpush1.bf16.msra.mxu1 %v12120_v30  ;;  %v13493_v30 = vcombine.low %v313_v14, %v321_v15  ;;  %v12204_v14 = vld [vmem:[#allocation9 + $0x16c] ss:$16 sps:$4 sm:$0xff]  }
  0xb3   :  { %4791 = vmatprep.subr.bf16.mxu0 %v12121_v31  ;;  %10956 = vmatprep.subr.bf16.mxu1 %v12121_v31  ;;  %v329_v31 = vld [vmem:[#allocation6 + $0x600] sm:$0xff] }
  0xb6   :  { %4792 = vmatpush1.bf16.msra.mxu0 %v12123_v32  ;;  %10972 = vmatpush1.bf16.msra.mxu1 %v12123_v32  ;;  %v337_v32 = vld [vmem:[#allocation6 + $0x640] sm:$0xff] }
  0xb7   :  { %4793 = vmatprep.subr.bf16.mxu0 %v12124_v33  ;;  %10957 = vmatprep.subr.bf16.mxu1 %v12124_v33  ;;  %v12169_v33 = vld [vmem:[#allocation9 + $0x2c0] ss:$16 sps:$4 sm:$0xff]  }
  0xba   :  { %4794 = vmatpush1.bf16.msra.mxu0 %v12126_v34  ;;  %10973 = vmatpush1.bf16.msra.mxu1 %v12126_v34  ;;  %v12172_v34 = vld [vmem:[#allocation9 + $0xc8] ss:$16 sps:$4 sm:$0xff]  }
  0xbb   :  { %4795 = vmatprep.subr.bf16.mxu0 %v12127_v35  ;;  %10958 = vmatprep.subr.bf16.mxu1 %v12127_v35  ;;  %v12177_v35 = vld [vmem:[#allocation9 + $0x2e4] ss:$16 sps:$4 sm:$0xff]  }
  0xbe   :  { %4796 = vmatpush1.bf16.msra.mxu0 %v12129_v36  ;;  %10974 = vmatpush1.bf16.msra.mxu1 %v12129_v36  ;;  %v12180_v36 = vld [vmem:[#allocation9 + $0xec] ss:$16 sps:$4 sm:$0xff]  }
  0xbf   :  { %4797 = vmatprep.subr.bf16.mxu0 %v12130_v37  ;;  %10959 = vmatprep.subr.bf16.mxu1 %v12130_v37  ;;  %v13495_v37 = vcombine.high %v201_v27, %v209_v28  ;;  %v377_v27 = vld [vmem:[#allocation6 + $0x780] sm:$0xff] }
  0xc2   :  { %4798 = vmatpush1.bf16.msra.mxu0 %v12132_v38  ;;  %10975 = vmatpush1.bf16.msra.mxu1 %v12132_v38  ;;  %v13497_v38 = vcombine.high %v329_v31, %v337_v32 }
  0xc3   :  { %4960 = vmatprep.subr.bf16.mxu0 %v12135_v39  ;;  %6311 = vmatprep.subr.bf16.mxu1 %v12138_v40  ;;  %v12175_v39 = vld [vmem:[#allocation9 + $0x2e0] ss:$16 sps:$4 sm:$0xff]   ;;  %v12178_v40 = vld [vmem:[#allocation9 + $0xe8] ss:$16 sps:$4 sm:$0xff]  }
  0xc5   :  { %4800 = vmatmul.mubr.bf16.vlgmr.msra.gmra.mrb[0].mxu0 %v13453_v44  ;;  %4880 = vmatmul.mubr.bf16.vlgmr.msra.gmra.mrb[0].mxu1 %v13457_v45 }
  0xc6   :  { %4961 = vmatpush1.bf16.msra.mxu0 %v12133_v41  ;;  %6312 = vmatpush1.bf16.msra.mxu1 %v12136_v48  ;;  %v12183_v41 = vld [vmem:[#allocation9 + $0x304] ss:$16 sps:$4 sm:$0xff]   ;;  %v13505_v48 = vcombine.low %v329_v31, %v337_v32 }
  0xc7   :  { %4962 = vmatprep.subr.bf16.mxu0 %v12141_v49  ;;  %6313 = vmatprep.subr.bf16.mxu1 %v12144_v50  ;;  %v225_v49 = vld [vmem:[#allocation6 + $0x2c0] sm:$0xff] }
  0xc8   :  { %4809 = vmatprep.mubr.bf16.mxu0 %v13459_v51  ;;  %4889 = vmatprep.mubr.bf16.mxu1 %v13461_v52  ;;  %v345_v50 = vld [vmem:[#allocation6 + $0x680] sm:$0xff]  ;;  %v13507_v57 = vcombine.high %v217_v46, %v225_v49 }
  0xc9   :  { %v385_v32 = vld [vmem:[#allocation6 + $0x7c0] sm:$0xff] }
  0xca   :  { %4963 = vmatpush1.bf16.msra.mxu0 %v12139_v53  ;;  %6314 = vmatpush1.bf16.msra.mxu1 %v12142_v54  ;;  %v353_v53 = vld [vmem:[#allocation6 + $0x6c0] sm:$0xff]  ;;  %v12184_v54 = vld [vmem:[#allocation9 + $0x108] ss:$16 sps:$4 sm:$0xff]  }
  0xcb   :  { %4964 = vmatprep.subr.bf16.mxu0 %v12147_v55  ;;  %6315 = vmatprep.subr.bf16.mxu1 %v12150_v56  ;;  %v12189_v55 = vld [vmem:[#allocation9 + $0x324] ss:$16 sps:$4 sm:$0xff]   ;;  %v12192_v56 = vld [vmem:[#allocation9 + $0x12c] ss:$16 sps:$4 sm:$0xff]  }
  0xcd   :  { %4810 = vmatmul.mubr.bf16.gmra.mrb[4].mxu0 %v13467_v60  ;;  %4890 = vmatmul.mubr.bf16.gmra.mrb[4].mxu1 %v13469_v61 }
  0xce   :  { %4965 = vmatpush1.bf16.msra.mxu0 %v12145_v58  ;;  %6316 = vmatpush1.bf16.msra.mxu1 %v12148_v0  ;;  %v13509_v58 = vcombine.high %v345_v50, %v353_v53  ;;  %v12198_v0 = vld [vmem:[#allocation9 + $0x14c] ss:$16 sps:$4 sm:$0xff]  }
  0xcf   :  { %4966 = vmatprep.subr.bf16.mxu0 %v12153_v1  ;;  %6317 = vmatprep.subr.bf16.mxu1 %v12156_v2  ;;  %v12193_v1 = vld [vmem:[#allocation9 + $0x340] ss:$16 sps:$4 sm:$0xff]  }
  0xd0   :  { %4819 = vmatprep.mubr.bf16.mxu0 %v13471_v3  ;;  %4899 = vmatprep.mubr.bf16.mxu1 %v13473_v4  ;;  %v233_v2 = vld [vmem:[#allocation6 + $0x300] sm:$0xff] }
  0xd2   :  { %4967 = vmatpush1.bf16.msra.mxu0 %v12151_v5  ;;  %6318 = vmatpush1.bf16.msra.mxu1 %v12154_v6  ;;  %v241_v5 = vld [vmem:[#allocation6 + $0x340] sm:$0xff] }
  0xd3   :  { %4968 = vmatprep.subr.bf16.mxu0 %v12159_v7  ;;  %6319 = vmatprep.subr.bf16.mxu1 %v12162_v8  ;;  %v361_v6 = vld [vmem:[#allocation6 + $0x700] sm:$0xff]  ;;  %v13515_v7 = vcombine.low %v217_v46, %v225_v49  ;;  %v13517_v8 = vcombine.low %v345_v50, %v353_v53  ;;  %v13519_v15 = vcombine.high %v233_v2, %v241_v5  ;;  %v12222_v46 = vld [vmem:[#allocation9 + $0x1cc] ss:$16 sps:$4 sm:$0xff]  }
  0xd4   :  { %v13527_v28 = vcombine.low %v233_v2, %v241_v5  ;;  %v12217_v49 = vld [vmem:[#allocation9 + $0x3c0] ss:$16 sps:$4 sm:$0xff]   ;;  %v13541_v53 = vcombine.low %v377_v27, %v385_v32  ;;  %v12231_v2 = vld [vmem:[#allocation9 + $0x404] ss:$16 sps:$4 sm:$0xff]   ;;  %v12234_v5 = vld [vmem:[#allocation9 + $0x20c] ss:$16 sps:$4 sm:$0xff]  }
  0xd5   :  { %4820 = vmatmul.mubr.bf16.gmra.mrb[8].mxu0 %v13479_v12  ;;  %4900 = vmatmul.mubr.bf16.gmra.mrb[8].mxu1 %v13481_v13 }
  0xd6   :  { %4969 = vmatpush1.bf16.msra.mxu0 %v12157_v9  ;;  %6320 = vmatpush1.bf16.msra.mxu1 %v12160_v17  ;;  %v369_v9 = vld [vmem:[#allocation6 + $0x740] sm:$0xff] }
  0xd7   :  { %4970 = vmatprep.subr.bf16.mxu0 %v12165_v18  ;;  %6321 = vmatprep.subr.bf16.mxu1 %v12168_v19  ;;  %v13521_v17 = vcombine.high %v361_v6, %v369_v9  ;;  %v12199_v18 = vld [vmem:[#allocation9 + $0x360] ss:$16 sps:$4 sm:$0xff]   ;;  %v12202_v19 = vld [vmem:[#allocation9 + $0x168] ss:$16 sps:$4 sm:$0xff]   ;;  %v13529_v31 = vcombine.low %v361_v6, %v369_v9 }
  0xd8   :  { %4829 = vmatprep.mubr.bf16.mxu0 %v13483_v21  ;;  %4909 = vmatprep.mubr.bf16.mxu1 %v13485_v22  ;;  %v154_v6 = vld [vmem:[#allocation6 + $0x88] sm:$0xff] }
  0xd9   :  { %v162_v9 = vld [vmem:[#allocation6 + $0xc8] sm:$0xff] }
  0xda   :  { %4971 = vmatpush1.bf16.msra.mxu0 %v12163_v23  ;;  %6322 = vmatpush1.bf16.msra.mxu1 %v12166_v24  ;;  %v12207_v23 = vld [vmem:[#allocation9 + $0x384] ss:$16 sps:$4 sm:$0xff]   ;;  %v12210_v24 = vld [vmem:[#allocation9 + $0x18c] ss:$16 sps:$4 sm:$0xff]  }
  0xdb   :  { %4972 = vmatprep.subr.bf16.mxu0 %v12171_v25  ;;  %6323 = vmatprep.subr.bf16.mxu1 %v12174_v26  ;;  %v249_v25 = vld [vmem:[#allocation6 + $0x380] sm:$0xff] }
  0xdc   :  { %v257_v26 = vld [vmem:[#allocation6 + $0x3c0] sm:$0xff] }
  0xdd   :  { %4830 = vmatmul.mubr.bf16.gmra.mrb[12].mxu0 %v13491_v29  ;;  %4910 = vmatmul.mubr.bf16.gmra.mrb[12].mxu1 %v13493_v30  ;;  %v13539_v50 = vcombine.low %v249_v25, %v257_v26 }
  0xde   :  { %4973 = vmatpush1.bf16.msra.mxu0 %v12169_v33  ;;  %6324 = vmatpush1.bf16.msra.mxu1 %v12172_v34  ;;  %v12205_v33 = vld [vmem:[#allocation9 + $0x380] ss:$16 sps:$4 sm:$0xff]   ;;  %v12208_v34 = vld [vmem:[#allocation9 + $0x188] ss:$16 sps:$4 sm:$0xff]  }
  0xdf   :  { %4974 = vmatprep.subr.bf16.mxu0 %v12177_v35  ;;  %6325 = vmatprep.subr.bf16.mxu1 %v12180_v36  ;;  %v12213_v35 = vld [vmem:[#allocation9 + $0x3a4] ss:$16 sps:$4 sm:$0xff]   ;;  %v12216_v36 = vld [vmem:[#allocation9 + $0x1ac] ss:$16 sps:$4 sm:$0xff]  }
  0xe0   :  { %4839 = vmatprep.mubr.bf16.mxu0 %v13495_v37  ;;  %4919 = vmatprep.mubr.bf16.mxu1 %v13497_v38 }
  0xe2   :  { %4975 = vmatpush1.bf16.msra.mxu0 %v12175_v39  ;;  %6326 = vmatpush1.bf16.msra.mxu1 %v12178_v40  ;;  %v13531_v39 = vcombine.high %v249_v25, %v257_v26  ;;  %v13533_v40 = vcombine.high %v377_v27, %v385_v32  ;;  %v12238_v25 = vld [vmem:[#allocation9 + $0x228] ss:$16 sps:$4 sm:$0xff]   ;;  %v12243_v27 = vld [vmem:[#allocation9 + $0x444] ss:$16 sps:$4 sm:$0xff]   ;;  %v12246_v32 = vld [vmem:[#allocation9 + $0x24c] ss:$16 sps:$4 sm:$0xff]  }
  0xe3   :  { %4976 = vmatprep.subr.bf16.mxu0 %v12183_v41  ;;  %6327 = vmatprep.subr.bf16.mxu1 %v12186_v42  ;;  %v12211_v41 = vld [vmem:[#allocation9 + $0x3a0] ss:$16 sps:$4 sm:$0xff]   ;;  %v12214_v42 = vld [vmem:[#allocation9 + $0x1a8] ss:$16 sps:$4 sm:$0xff]  }
  0xe4   :  { %v178_v26 = vld [vmem:[#allocation6 + $0x148] sm:$0xff] }
  0xe5   :  { %4840 = vmatmul.mubr.bf16.gmra.mrb[16].mxu0 %v13503_v47  ;;  %4920 = vmatmul.mubr.bf16.gmra.mrb[16].mxu1 %v13505_v48 }
  0xe6   :  { %4977 = vmatpush1.bf16.msra.mxu0 %v12181_v43  ;;  %6328 = vmatpush1.bf16.msra.mxu1 %v12184_v54  ;;  %v12219_v43 = vld [vmem:[#allocation9 + $0x3c4] ss:$16 sps:$4 sm:$0xff]   ;;  %v138_v54 = vld [vmem:[#allocation6 + $0x8] sm:$0xff] }
  0xe7   :  { %4978 = vmatprep.subr.bf16.mxu0 %v12189_v55  ;;  %6329 = vmatprep.subr.bf16.mxu1 %v12192_v56  ;;  %v146_v55 = vld [vmem:[#allocation6 + $0x48] sm:$0xff] }
  0xe8   :  { %4849 = vmatprep.mubr.bf16.mxu0 %v13507_v57  ;;  %4929 = vmatprep.mubr.bf16.mxu1 %v13509_v58  ;;  %v12220_v56 = vld [vmem:[#allocation9 + $0x1c8] ss:$16 sps:$4 sm:$0xff]  }
  0xea   :  { %4979 = vmatpush1.bf16.msra.mxu0 %v12187_v59  ;;  %6330 = vmatpush1.bf16.msra.mxu1 %v12190_v62  ;;  %v12225_v59 = vld [vmem:[#allocation9 + $0x3e4] ss:$16 sps:$4 sm:$0xff]   ;;  %v12228_v62 = vld [vmem:[#allocation9 + $0x1ec] ss:$16 sps:$4 sm:$0xff]  }
  0xeb   :  { %4980 = vmatprep.subr.bf16.mxu0 %v12195_v63  ;;  %6331 = vmatprep.subr.bf16.mxu1 %v12198_v0  ;;  %v13543_v63 = vcombine.high %v138_v54, %v146_v55  ;;  %v12223_v0 = vld [vmem:[#allocation9 + $0x3e0] ss:$16 sps:$4 sm:$0xff]  }
  0xed   :  { %4850 = vmatmul.mubr.bf16.gmra.mrb[20].mxu0 %v13515_v7  ;;  %4930 = vmatmul.mubr.bf16.gmra.mrb[20].mxu1 %v13517_v8 }
  0xee   :  { %4981 = vmatpush1.bf16.msra.mxu0 %v12193_v1  ;;  %6332 = vmatpush1.bf16.msra.mxu1 %v12196_v10  ;;  %v12226_v1 = vld [vmem:[#allocation9 + $0x1e8] ss:$16 sps:$4 sm:$0xff]   ;;  %v13549_v10 = vcombine.low %v138_v54, %v146_v55  ;;  %v12258_v54 = vld [vmem:[#allocation9 + $0x28c] ss:$16 sps:$4 sm:$0xff]  }
  0xef   :  { %4982 = vmatprep.subr.bf16.mxu0 %v12201_v11  ;;  %6333 = vmatprep.subr.bf16.mxu1 %v12204_v14  ;;  %v12229_v11 = vld [vmem:[#allocation9 + $0x400] ss:$16 sps:$4 sm:$0xff]   ;;  %v12232_v14 = vld [vmem:[#allocation9 + $0x208] ss:$16 sps:$4 sm:$0xff]  }
  0xf0   :  { %4859 = vmatprep.mubr.bf16.mxu0 %v13519_v15  ;;  %4939 = vmatprep.mubr.bf16.mxu1 %v13521_v17 }
  0xf2   :  { %4983 = vmatpush1.bf16.msra.mxu0 %v12199_v18  ;;  %6334 = vmatpush1.bf16.msra.mxu1 %v12202_v19  ;;  %v13551_v18 = vcombine.high %v154_v6, %v162_v9  ;;  %v12237_v19 = vld [vmem:[#allocation9 + $0x424] ss:$16 sps:$4 sm:$0xff]  }
  0xf3   :  { %4984 = vmatprep.subr.bf16.mxu0 %v12207_v23  ;;  %6335 = vmatprep.subr.bf16.mxu1 %v12210_v24  ;;  %v12240_v23 = vld [vmem:[#allocation9 + $0x22c] ss:$16 sps:$4 sm:$0xff]   ;;  %v12235_v24 = vld [vmem:[#allocation9 + $0x420] ss:$16 sps:$4 sm:$0xff]  }
  0xf5   :  { %4860 = vmatmul.mubr.bf16.gmra.mrb[24].mxu0 %v13527_v28  ;;  %4940 = vmatmul.mubr.bf16.gmra.mrb[24].mxu1 %v13529_v31 }
  0xf6   :  { %4985 = vmatpush1.bf16.msra.mxu0 %v12205_v33  ;;  %6336 = vmatpush1.bf16.msra.mxu1 %v12208_v34  ;;  %v13557_v33 = vcombine.low %v154_v6, %v162_v9  ;;  %v12241_v34 = vld [vmem:[#allocation9 + $0x440] ss:$16 sps:$4 sm:$0xff]   ;;  %v12267_v6 = vld [vmem:[#allocation9 + $0x4c4] ss:$16 sps:$4 sm:$0xff]   ;;  %v12270_v9 = vld [vmem:[#allocation9 + $0x2cc] ss:$16 sps:$4 sm:$0xff]  }
  0xf7   :  { %4986 = vmatprep.subr.bf16.mxu0 %v12213_v35  ;;  %6337 = vmatprep.subr.bf16.mxu1 %v12216_v36  ;;  %v12244_v35 = vld [vmem:[#allocation9 + $0x248] ss:$16 sps:$4 sm:$0xff]   ;;  %v12249_v36 = vld [vmem:[#allocation9 + $0x464] ss:$16 sps:$4 sm:$0xff]  }
  0xf8   :  { %4869 = vmatprep.mubr.bf16.mxu0 %v13531_v39  ;;  %4949 = vmatprep.mubr.bf16.mxu1 %v13533_v40 }
  0xfa   :  { %4987 = vmatpush1.bf16.msra.mxu0 %v12211_v41  ;;  %6338 = vmatpush1.bf16.msra.mxu1 %v12214_v42  ;;  %v12252_v41 = vld [vmem:[#allocation9 + $0x26c] ss:$16 sps:$4 sm:$0xff]  }
  0xfb   :  { %4988 = vmatprep.subr.bf16.mxu0 %v12219_v43  ;;  %6339 = vmatprep.subr.bf16.mxu1 %v12222_v46  ;;  %v186_v42 = vld [vmem:[#allocation6 + $0x188] sm:$0xff]  ;;  %v12247_v43 = vld [vmem:[#allocation9 + $0x460] ss:$16 sps:$4 sm:$0xff]  }
  0xfc   :  { %v12250_v46 = vld [vmem:[#allocation9 + $0x268] ss:$16 sps:$4 sm:$0xff]  }
  0xfd   :  { %4870 = vmatmul.mubr.bf16.gmra.mrb[28].mxu0 %v13539_v50  ;;  %4950 = vmatmul.mubr.bf16.gmra.mrb[28].mxu1 %v13541_v53 }
  0xfe   :  { %4989 = vmatpush1.bf16.msra.mxu0 %v12217_v49  ;;  %6340 = vmatpush1.bf16.msra.mxu1 %v12220_v56  ;;  %v12255_v49 = vld [vmem:[#allocation9 + $0x484] ss:$16 sps:$4 sm:$0xff]   ;;  %v12253_v56 = vld [vmem:[#allocation9 + $0x480] ss:$16 sps:$4 sm:$0xff]  }
  0xff   :  { %4990 = vmatprep.subr.bf16.mxu0 %v12225_v59  ;;  %6341 = vmatprep.subr.bf16.mxu1 %v12228_v62  ;;  %v12256_v59 = vld [vmem:[#allocation9 + $0x288] ss:$16 sps:$4 sm:$0xff]  }
 0x100   :  { %4992 = vmatprep.mubr.bf16.mxu0 %v13543_v63  ;;  %6343 = vmatprep.mubr.bf16.mxu1 %v13439_v16  ;;  %v170_v16 = vld [vmem:[#allocation6 + $0x108] sm:$0xff] }
 0x101   :  { %v13565_v55 = vcombine.low %v170_v16, %v178_v26 }
 0x102   :  { %4991 = vmatpush1.bf16.msra.mxu0 %v12223_v0  ;;  %6342 = vmatpush1.bf16.msra.mxu1 %v12226_v1  ;;  %v12264_v0 = vld [vmem:[#allocation9 + $0x2ac] ss:$16 sps:$4 sm:$0xff]  }
 0x103   :  { %5153 = vmatprep.subr.bf16.mxu0 %v12231_v2  ;;  %6504 = vmatprep.subr.bf16.mxu1 %v12234_v5  ;;  %v210_v1 = vld [vmem:[#allocation6 + $0x248] sm:$0xff]  ;;  %v12259_v2 = vld [vmem:[#allocation9 + $0x4a0] ss:$16 sps:$4 sm:$0xff]  }
 0x104   :  { %v12262_v5 = vld [vmem:[#allocation9 + $0x2a8] ss:$16 sps:$4 sm:$0xff]  }
 0x105   :  { %4993 = vmatmul.mubr.bf16.vlgmr.msra.gmra.mrb[0].mxu0 %v13549_v10  ;;  %6344 = vmatmul.mubr.bf16.vlgmr.msra.gmra.mrb[32].mxu1 %v13453_v44  ;;  %v13559_v44 = vcombine.high %v170_v16, %v178_v26  ;;  %v12271_v16 = vld [vmem:[#allocation9 + $0x4e0] ss:$16 sps:$4 sm:$0xff]   ;;  %v12274_v26 = vld [vmem:[#allocation9 + $0x2e8] ss:$16 sps:$4 sm:$0xff]  }
 0x106   :  { %5154 = vmatpush1.bf16.msra.mxu0 %v12229_v11  ;;  %6505 = vmatpush1.bf16.msra.mxu1 %v12232_v14  ;;  %v12265_v14 = vld [vmem:[#allocation9 + $0x4c0] ss:$16 sps:$4 sm:$0xff]  }
 0x107   :  { %5002 = vmatprep.mubr.bf16.mxu0 %v13551_v18  ;;  %6353 = vmatprep.mubr.bf16.mxu1 %v13459_v51  ;;  %v194_v51 = vld [vmem:[#allocation6 + $0x1c8] sm:$0xff] }
 0x108   :  { %5155 = vmatprep.subr.bf16.mxu0 %v12237_v19  ;;  %6506 = vmatprep.subr.bf16.mxu1 %v12240_v23  ;;  %v13567_v62 = vcombine.high %v186_v42, %v194_v51  ;;  %v13573_v11 = vcombine.low %v186_v42, %v194_v51  ;;  %v12268_v19 = vld [vmem:[#allocation9 + $0x2c8] ss:$16 sps:$4 sm:$0xff]   ;;  %v12288_v42 = vld [vmem:[#allocation9 + $0x32c] ss:$16 sps:$4 sm:$0xff]  }
 0x109   :  { %v242_v51 = vld [vmem:[#allocation6 + $0x348] sm:$0xff] }
 0x10a   :  { %5156 = vmatpush1.bf16.msra.mxu0 %v12235_v24  ;;  %6507 = vmatpush1.bf16.msra.mxu1 %v12238_v25  ;;  %v12276_v24 = vld [vmem:[#allocation9 + $0x2ec] ss:$16 sps:$4 sm:$0xff]  }
 0x10b   :  { %5157 = vmatprep.subr.bf16.mxu0 %v12243_v27  ;;  %6508 = vmatprep.subr.bf16.mxu1 %v12246_v32  ;;  %v226_v25 = vld [vmem:[#allocation6 + $0x2c8] sm:$0xff]  ;;  %v12279_v27 = vld [vmem:[#allocation9 + $0x504] ss:$16 sps:$4 sm:$0xff]  }
 0x10c   :  { %v12282_v32 = vld [vmem:[#allocation9 + $0x30c] ss:$16 sps:$4 sm:$0xff]  }
 0x10d   :  { %5003 = vmatmul.mubr.bf16.gmra.mrb[4].mxu0 %v13557_v33  ;;  %6354 = vmatmul.mubr.bf16.gmra.mrb[36].mxu1 %v13467_v60  ;;  %v12261_v60 = vld [vmem:[#allocation9 + $0x4a4] ss:$16 sps:$4 sm:$0xff]  }
 0x10e   :  { %5012 = vmatprep.mubr.bf16.mxu0 %v13559_v44  ;;  %6363 = vmatprep.mubr.bf16.mxu1 %v13471_v3  ;;  %v202_v3 = vld [vmem:[#allocation6 + $0x208] sm:$0xff] }
 0x10f   :  { %5158 = vmatpush1.bf16.msra.mxu0 %v12241_v34  ;;  %6509 = vmatpush1.bf16.msra.mxu1 %v12244_v35  ;;  %v13575_v23 = vcombine.high %v202_v3, %v210_v1  ;;  %v13581_v34 = vcombine.low %v202_v3, %v210_v1  ;;  %v12277_v35 = vld [vmem:[#allocation9 + $0x500] ss:$16 sps:$4 sm:$0xff]   ;;  %v12300_v3 = vld [vmem:[#allocation9 + $0x36c] ss:$16 sps:$4 sm:$0xff]  }
 0x110   :  { %5159 = vmatprep.subr.bf16.mxu0 %v12249_v36  ;;  %6510 = vmatprep.subr.bf16.mxu1 %v12252_v41  ;;  %v12280_v36 = vld [vmem:[#allocation9 + $0x308] ss:$16 sps:$4 sm:$0xff]  }
 0x111   :  { %v258_v1 = vld [vmem:[#allocation6 + $0x3c8] sm:$0xff] }
 0x113   :  { %5160 = vmatpush1.bf16.msra.mxu0 %v12247_v43  ;;  %6511 = vmatpush1.bf16.msra.mxu1 %v12250_v46  ;;  %v12283_v43 = vld [vmem:[#allocation9 + $0x520] ss:$16 sps:$4 sm:$0xff]   ;;  %v12286_v46 = vld [vmem:[#allocation9 + $0x328] ss:$16 sps:$4 sm:$0xff]  }
 0x114   :  { %5161 = vmatprep.subr.bf16.mxu0 %v12255_v49  ;;  %6512 = vmatprep.subr.bf16.mxu1 %v12258_v54  ;;  %v12291_v49 = vld [vmem:[#allocation9 + $0x544] ss:$16 sps:$4 sm:$0xff]   ;;  %v12294_v54 = vld [vmem:[#allocation9 + $0x34c] ss:$16 sps:$4 sm:$0xff]  }
 0x115   :  { %5013 = vmatmul.mubr.bf16.gmra.mrb[8].mxu0 %v13565_v55  ;;  %6364 = vmatmul.mubr.bf16.gmra.mrb[40].mxu1 %v13479_v12  ;;  %v12273_v12 = vld [vmem:[#allocation9 + $0x4e4] ss:$16 sps:$4 sm:$0xff]  }
 0x116   :  { %5022 = vmatprep.mubr.bf16.mxu0 %v13567_v62  ;;  %6373 = vmatprep.mubr.bf16.mxu1 %v13483_v21  ;;  %v218_v21 = vld [vmem:[#allocation6 + $0x288] sm:$0xff] }
 0x117   :  { %5162 = vmatpush1.bf16.msra.mxu0 %v12253_v56  ;;  %6513 = vmatpush1.bf16.msra.mxu1 %v12256_v59  ;;  %v13583_v41 = vcombine.high %v218_v21, %v226_v25  ;;  %v13589_v56 = vcombine.low %v218_v21, %v226_v25  ;;  %v12289_v59 = vld [vmem:[#allocation9 + $0x540] ss:$16 sps:$4 sm:$0xff]   ;;  %v12312_v21 = vld [vmem:[#allocation9 + $0x3ac] ss:$16 sps:$4 sm:$0xff]  }
 0x118   :  { %5163 = vmatprep.subr.bf16.mxu0 %v12261_v60  ;;  %6514 = vmatprep.subr.bf16.mxu1 %v12264_v0  ;;  %v12292_v60 = vld [vmem:[#allocation9 + $0x348] ss:$16 sps:$4 sm:$0xff]  }
 0x119   :  { %v274_v25 = vld [vmem:[#allocation6 + $0x448] sm:$0xff] }
 0x11b   :  { %5164 = vmatpush1.bf16.msra.mxu0 %v12259_v2  ;;  %6515 = vmatpush1.bf16.msra.mxu1 %v12262_v5  ;;  %v12295_v2 = vld [vmem:[#allocation9 + $0x560] ss:$16 sps:$4 sm:$0xff]   ;;  %v12298_v5 = vld [vmem:[#allocation9 + $0x368] ss:$16 sps:$4 sm:$0xff]  }
 0x11c   :  { %5165 = vmatprep.subr.bf16.mxu0 %v12267_v6  ;;  %6516 = vmatprep.subr.bf16.mxu1 %v12270_v9  ;;  %v12303_v6 = vld [vmem:[#allocation9 + $0x584] ss:$16 sps:$4 sm:$0xff]   ;;  %v12306_v9 = vld [vmem:[#allocation9 + $0x38c] ss:$16 sps:$4 sm:$0xff]  }
 0x11d   :  { %5023 = vmatmul.mubr.bf16.gmra.mrb[12].mxu0 %v13573_v11  ;;  %6374 = vmatmul.mubr.bf16.gmra.mrb[44].mxu1 %v13491_v29  ;;  %v12285_v29 = vld [vmem:[#allocation9 + $0x524] ss:$16 sps:$4 sm:$0xff]  }
 0x11e   :  { %5032 = vmatprep.mubr.bf16.mxu0 %v13575_v23  ;;  %6383 = vmatprep.mubr.bf16.mxu1 %v13495_v37  ;;  %v234_v37 = vld [vmem:[#allocation6 + $0x308] sm:$0xff] }
 0x11f   :  { %5166 = vmatpush1.bf16.msra.mxu0 %v12265_v14  ;;  %6517 = vmatpush1.bf16.msra.mxu1 %v12268_v19  ;;  %v13591_v0 = vcombine.high %v234_v37, %v242_v51  ;;  %v13597_v14 = vcombine.low %v234_v37, %v242_v51  ;;  %v12301_v19 = vld [vmem:[#allocation9 + $0x580] ss:$16 sps:$4 sm:$0xff]   ;;  %v12324_v37 = vld [vmem:[#allocation9 + $0x3ec] ss:$16 sps:$4 sm:$0xff]  }
 0x120   :  { %5167 = vmatprep.subr.bf16.mxu0 %v12273_v12  ;;  %6518 = vmatprep.subr.bf16.mxu1 %v12276_v24  ;;  %v12304_v12 = vld [vmem:[#allocation9 + $0x388] ss:$16 sps:$4 sm:$0xff]  }
 0x121   :  { %v290_v51 = vld [vmem:[#allocation6 + $0x4c8] sm:$0xff] }
 0x123   :  { %5168 = vmatpush1.bf16.msra.mxu0 %v12271_v16  ;;  %6519 = vmatpush1.bf16.msra.mxu1 %v12274_v26  ;;  %v12307_v16 = vld [vmem:[#allocation9 + $0x5a0] ss:$16 sps:$4 sm:$0xff]   ;;  %v12310_v26 = vld [vmem:[#allocation9 + $0x3a8] ss:$16 sps:$4 sm:$0xff]  }
 0x124   :  { %5169 = vmatprep.subr.bf16.mxu0 %v12279_v27  ;;  %6520 = vmatprep.subr.bf16.mxu1 %v12282_v32  ;;  %v12315_v27 = vld [vmem:[#allocation9 + $0x5c4] ss:$16 sps:$4 sm:$0xff]   ;;  %v12318_v32 = vld [vmem:[#allocation9 + $0x3cc] ss:$16 sps:$4 sm:$0xff]  }
 0x125   :  { %5033 = vmatmul.mubr.bf16.gmra.mrb[16].mxu0 %v13581_v34  ;;  %6384 = vmatmul.mubr.bf16.gmra.mrb[48].mxu1 %v13503_v47  ;;  %v12297_v47 = vld [vmem:[#allocation9 + $0x564] ss:$16 sps:$4 sm:$0xff]  }
 0x126   :  { %5042 = vmatprep.mubr.bf16.mxu0 %v13583_v41  ;;  %6393 = vmatprep.mubr.bf16.mxu1 %v13507_v57  ;;  %v250_v57 = vld [vmem:[#allocation6 + $0x388] sm:$0xff] }
 0x127   :  { %5170 = vmatpush1.bf16.msra.mxu0 %v12277_v35  ;;  %6521 = vmatpush1.bf16.msra.mxu1 %v12280_v36  ;;  %v13599_v24 = vcombine.high %v250_v57, %v258_v1  ;;  %v13605_v35 = vcombine.low %v250_v57, %v258_v1  ;;  %v12313_v36 = vld [vmem:[#allocation9 + $0x5c0] ss:$16 sps:$4 sm:$0xff]   ;;  %v314_v57 = vld [vmem:[#allocation6 + $0x588] sm:$0xff] }
 0x128   :  { %5171 = vmatprep.subr.bf16.mxu0 %v12285_v29  ;;  %6522 = vmatprep.subr.bf16.mxu1 %v12288_v42  ;;  %v12316_v29 = vld [vmem:[#allocation9 + $0x3c8] ss:$16 sps:$4 sm:$0xff]  }
 0x12b   :  { %5172 = vmatpush1.bf16.msra.mxu0 %v12283_v43  ;;  %6523 = vmatpush1.bf16.msra.mxu1 %v12286_v46  ;;  %v12319_v43 = vld [vmem:[#allocation9 + $0x5e0] ss:$16 sps:$4 sm:$0xff]   ;;  %v12322_v46 = vld [vmem:[#allocation9 + $0x3e8] ss:$16 sps:$4 sm:$0xff]  }
 0x12c   :  { %5173 = vmatprep.subr.bf16.mxu0 %v12291_v49  ;;  %6524 = vmatprep.subr.bf16.mxu1 %v12294_v54  ;;  %v12327_v49 = vld [vmem:[#allocation9 + $0x604] ss:$16 sps:$4 sm:$0xff]   ;;  %v12330_v54 = vld [vmem:[#allocation9 + $0x40c] ss:$16 sps:$4 sm:$0xff]  }
 0x12d   :  { %5043 = vmatmul.mubr.bf16.gmra.mrb[20].mxu0 %v13589_v56  ;;  %6394 = vmatmul.mubr.bf16.gmra.mrb[52].mxu1 %v13515_v7  ;;  %v12309_v7 = vld [vmem:[#allocation9 + $0x5a4] ss:$16 sps:$4 sm:$0xff]  }
 0x12e   :  { %5052 = vmatprep.mubr.bf16.mxu0 %v13591_v0  ;;  %6403 = vmatprep.mubr.bf16.mxu1 %v13519_v15  ;;  %v266_v15 = vld [vmem:[#allocation6 + $0x408] sm:$0xff] }
 0x12f   :  { %5174 = vmatpush1.bf16.msra.mxu0 %v12289_v59  ;;  %6525 = vmatpush1.bf16.msra.mxu1 %v12292_v60  ;;  %v13607_v42 = vcombine.high %v266_v15, %v274_v25  ;;  %v13613_v59 = vcombine.low %v266_v15, %v274_v25 }
 0x130   :  { %5175 = vmatprep.subr.bf16.mxu0 %v12297_v47  ;;  %6526 = vmatprep.subr.bf16.mxu1 %v12300_v3 }
 0x133   :  { %5176 = vmatpush1.bf16.msra.mxu0 %v12295_v2  ;;  %6527 = vmatpush1.bf16.msra.mxu1 %v12298_v5 }
 0x134   :  { %5177 = vmatprep.subr.bf16.mxu0 %v12303_v6  ;;  %6528 = vmatprep.subr.bf16.mxu1 %v12306_v9 }
 0x135   :  { %5053 = vmatmul.mubr.bf16.gmra.mrb[24].mxu0 %v13597_v14  ;;  %6404 = vmatmul.mubr.bf16.gmra.mrb[56].mxu1 %v13527_v28  ;;  %v12321_v28 = vld [vmem:[#allocation9 + $0x5e4] ss:$16 sps:$4 sm:$0xff]  }
 0x136   :  { %5062 = vmatprep.mubr.bf16.mxu0 %v13599_v24  ;;  %6413 = vmatprep.mubr.bf16.mxu1 %v13531_v39  ;;  %v282_v39 = vld [vmem:[#allocation6 + $0x488] sm:$0xff] }
 0x137   :  { %5178 = vmatpush1.bf16.msra.mxu0 %v12301_v19  ;;  %6529 = vmatpush1.bf16.msra.mxu1 %v12304_v12  ;;  %v13615_v60 = vcombine.high %v282_v39, %v290_v51  ;;  %v13621_v47 = vcombine.low %v282_v39, %v290_v51  ;;  %v12339_v39 = vld [vmem:[#allocation9 + $0x644] ss:$16 sps:$4 sm:$0xff]   ;;  %v12342_v51 = vld [vmem:[#allocation9 + $0x44c] ss:$16 sps:$4 sm:$0xff]  }
 0x138   :  { %5179 = vmatprep.subr.bf16.mxu0 %v12309_v7  ;;  %6530 = vmatprep.subr.bf16.mxu1 %v12312_v21 }
 0x13b   :  { %5180 = vmatpush1.bf16.msra.mxu0 %v12307_v16  ;;  %6531 = vmatpush1.bf16.msra.mxu1 %v12310_v26  ;;  %v12325_v26 = vld [vmem:[#allocation9 + $0x600] ss:$16 sps:$4 sm:$0xff]  }
 0x13c   :  { %5181 = vmatprep.subr.bf16.mxu0 %v12315_v27  ;;  %6532 = vmatprep.subr.bf16.mxu1 %v12318_v32  ;;  %v12328_v27 = vld [vmem:[#allocation9 + $0x408] ss:$16 sps:$4 sm:$0xff]  }
 0x13d   :  { %5063 = vmatmul.mubr.bf16.gmra.mrb[28].mxu0 %v13605_v35  ;;  %6414 = vmatmul.mubr.bf16.gmra.mrb[60].mxu1 %v13539_v50  ;;  %v298_v50 = vld [vmem:[#allocation6 + $0x508] sm:$0xff] }
 0x13e   :  { %5072 = vmatprep.mubr.bf16.mxu0 %v13607_v42  ;;  %6423 = vmatprep.mubr.bf16.mxu1 %v13447_v20  ;;  %v306_v20 = vld [vmem:[#allocation6 + $0x548] sm:$0xff] }
 0x13f   :  { %5182 = vmatpush1.bf16.msra.mxu0 %v12313_v36  ;;  %6533 = vmatpush1.bf16.msra.mxu1 %v12316_v29  ;;  %v13623_v3 = vcombine.high %v298_v50, %v306_v20  ;;  %v13629_v1 = vcombine.low %v298_v50, %v306_v20  ;;  %v12336_v36 = vld [vmem:[#allocation9 + $0x42c] ss:$16 sps:$4 sm:$0xff]   ;;  %v187_v20 = vld [vmem:[#allocation6 + $0x190] sm:$0xff] }
 0x140   :  { %5183 = vmatprep.subr.bf16.mxu0 %v12321_v28  ;;  %6534 = vmatprep.subr.bf16.mxu1 %v12324_v37  ;;  %v12331_v28 = vld [vmem:[#allocation9 + $0x620] ss:$16 sps:$4 sm:$0xff]   ;;  %v12348_v50 = vld [vmem:[#allocation9 + $0x46c] ss:$16 sps:$4 sm:$0xff]  }
 0x141   :  { %v171_v37 = vld [vmem:[#allocation6 + $0x110] sm:$0xff] }
 0x143   :  { %5184 = vmatpush1.bf16.msra.mxu0 %v12319_v43  ;;  %6535 = vmatpush1.bf16.msra.mxu1 %v12322_v46  ;;  %v12337_v46 = vld [vmem:[#allocation9 + $0x640] ss:$16 sps:$4 sm:$0xff]  }
 0x144   :  { %5346 = vmatprep.subr.bf16.mxu0 %v12327_v49  ;;  %6697 = vmatprep.subr.bf16.mxu1 %v12330_v54  ;;  %v12340_v49 = vld [vmem:[#allocation9 + $0x448] ss:$16 sps:$4 sm:$0xff]   ;;  %v12345_v54 = vld [vmem:[#allocation9 + $0x664] ss:$16 sps:$4 sm:$0xff]  }
 0x145   :  { %5073 = vmatmul.mubr.bf16.gmra.mrb[32].mxu0 %v13613_v59  ;;  %6424 = vmatmul.mubr.bf16.gmra.mrb[64].mxu1 %v13457_v45  ;;  %v322_v45 = vld [vmem:[#allocation6 + $0x5c8] sm:$0xff] }
 0x146   :  { %5082 = vmatprep.mubr.bf16.mxu0 %v13615_v60  ;;  %6433 = vmatprep.mubr.bf16.mxu1 %v13461_v52  ;;  %v13631_v2 = vcombine.high %v314_v57, %v322_v45  ;;  %v330_v52 = vld [vmem:[#allocation6 + $0x608] sm:$0xff]  ;;  %v13637_v5 = vcombine.low %v314_v57, %v322_v45  ;;  %v12343_v57 = vld [vmem:[#allocation9 + $0x660] ss:$16 sps:$4 sm:$0xff]  }
 0x147   :  { %v12346_v45 = vld [vmem:[#allocation9 + $0x468] ss:$16 sps:$4 sm:$0xff]  }
 0x14d   :  { %5083 = vmatmul.mubr.bf16.gmra.mrb[36].mxu0 %v13621_v47  ;;  %6434 = vmatmul.mubr.bf16.gmra.mrb[68].mxu1 %v13469_v61  ;;  %v338_v61 = vld [vmem:[#allocation6 + $0x648] sm:$0xff] }
 0x14e   :  { %5092 = vmatprep.mubr.bf16.mxu0 %v13623_v3  ;;  %6443 = vmatprep.mubr.bf16.mxu1 %v13473_v4  ;;  %v13639_v6 = vcombine.high %v330_v52, %v338_v61  ;;  %v346_v4 = vld [vmem:[#allocation6 + $0x688] sm:$0xff]  ;;  %v13645_v9 = vcombine.low %v330_v52, %v338_v61  ;;  %v12351_v52 = vld [vmem:[#allocation9 + $0x684] ss:$16 sps:$4 sm:$0xff]  }
 0x14f   :  { %v12354_v61 = vld [vmem:[#allocation9 + $0x48c] ss:$16 sps:$4 sm:$0xff]  }
 0x155   :  { %5093 = vmatmul.mubr.bf16.gmra.mrb[40].mxu0 %v13629_v1  ;;  %6444 = vmatmul.mubr.bf16.gmra.mrb[72].mxu1 %v13481_v13  ;;  %v354_v13 = vld [vmem:[#allocation6 + $0x6c8] sm:$0xff] }
 0x156   :  { %5102 = vmatprep.mubr.bf16.mxu0 %v13631_v2  ;;  %6453 = vmatprep.mubr.bf16.mxu1 %v13485_v22  ;;  %v13647_v19 = vcombine.high %v346_v4, %v354_v13  ;;  %v362_v22 = vld [vmem:[#allocation6 + $0x708] sm:$0xff]  ;;  %v13653_v12 = vcombine.low %v346_v4, %v354_v13  ;;  %v12349_v13 = vld [vmem:[#allocation9 + $0x680] ss:$16 sps:$4 sm:$0xff]  }
 0x15d   :  { %5103 = vmatmul.mubr.bf16.gmra.mrb[44].mxu0 %v13637_v5  ;;  %6454 = vmatmul.mubr.bf16.gmra.mrb[76].mxu1 %v13493_v30  ;;  %v370_v30 = vld [vmem:[#allocation6 + $0x748] sm:$0xff] }
 0x15e   :  { %5112 = vmatprep.mubr.bf16.mxu0 %v13639_v6  ;;  %6463 = vmatprep.mubr.bf16.mxu1 %v13497_v38  ;;  %v13655_v7 = vcombine.high %v362_v22, %v370_v30  ;;  %v378_v38 = vld [vmem:[#allocation6 + $0x788] sm:$0xff]  ;;  %v13661_v21 = vcombine.low %v362_v22, %v370_v30 }
 0x15f   :  { %v12352_v22 = vld [vmem:[#allocation9 + $0x488] ss:$16 sps:$4 sm:$0xff]  }
 0x165   :  { %5113 = vmatmul.mubr.bf16.gmra.mrb[48].mxu0 %v13645_v9  ;;  %6464 = vmatmul.mubr.bf16.gmra.mrb[80].mxu1 %v13505_v48  ;;  %v386_v48 = vld [vmem:[#allocation6 + $0x7c8] sm:$0xff] }
 0x166   :  { %5122 = vmatprep.mubr.bf16.mxu0 %v13647_v19  ;;  %6473 = vmatprep.mubr.bf16.mxu1 %v13509_v58  ;;  %v13663_v15 = vcombine.high %v378_v38, %v386_v48  ;;  %v139_v58 = vld [vmem:[#allocation6 + $0x10] sm:$0xff]  ;;  %v13669_v25 = vcombine.low %v378_v38, %v386_v48  ;;  %v12360_v38 = vld [vmem:[#allocation9 + $0x4ac] ss:$16 sps:$4 sm:$0xff]  }
 0x167   :  { %v211_v48 = vld [vmem:[#allocation6 + $0x250] sm:$0xff] }
 0x16d   :  { %5123 = vmatmul.mubr.bf16.gmra.mrb[52].mxu0 %v13653_v12  ;;  %6474 = vmatmul.mubr.bf16.gmra.mrb[84].mxu1 %v13517_v8  ;;  %v147_v8 = vld [vmem:[#allocation6 + $0x50] sm:$0xff] }
 0x16e   :  { %5132 = vmatprep.mubr.bf16.mxu0 %v13655_v7  ;;  %6483 = vmatprep.mubr.bf16.mxu1 %v13521_v17  ;;  %v13671_v16 = vcombine.high %v139_v58, %v147_v8  ;;  %v155_v17 = vld [vmem:[#allocation6 + $0x90] sm:$0xff]  ;;  %v13677_v32 = vcombine.low %v139_v58, %v147_v8  ;;  %v12358_v8 = vld [vmem:[#allocation9 + $0x4a8] ss:$16 sps:$4 sm:$0xff]  }
 0x16f   :  { %v12355_v58 = vld [vmem:[#allocation9 + $0x6a0] ss:$16 sps:$4 sm:$0xff]  }
 0x175   :  { %5133 = vmatmul.mubr.bf16.gmra.mrb[56].mxu0 %v13661_v21  ;;  %6484 = vmatmul.mubr.bf16.gmra.mrb[88].mxu1 %v13529_v31  ;;  %v163_v31 = vld [vmem:[#allocation6 + $0xd0] sm:$0xff] }
 0x176   :  { %5142 = vmatprep.mubr.bf16.mxu0 %v13663_v15  ;;  %6493 = vmatprep.mubr.bf16.mxu1 %v13533_v40  ;;  %v12333_v40 = vld [vmem:[#allocation9 + $0x624] ss:$16 sps:$4 sm:$0xff]   ;;  %v13679_v29 = vcombine.high %v155_v17, %v163_v31  ;;  %v13685_v43 = vcombine.low %v155_v17, %v163_v31  ;;  %v12366_v31 = vld [vmem:[#allocation9 + $0x4cc] ss:$16 sps:$4 sm:$0xff]  }
 0x177   :  { %v12363_v17 = vld [vmem:[#allocation9 + $0x6c4] ss:$16 sps:$4 sm:$0xff]  }
 0x17d   :  { %5143 = vmatmul.mubr.bf16.gmra.mrb[60].mxu0 %v13669_v25  ;;  %6494 = vmatmul.mubr.bf16.gmra.mrb[92].mxu1 %v13541_v53  ;;  %v12334_v53 = vld [vmem:[#allocation9 + $0x428] ss:$16 sps:$4 sm:$0xff]  }
 0x17e   :  { %5185 = vmatprep.mubr.bf16.mxu0 %v13671_v16  ;;  %6536 = vmatprep.mubr.bf16.mxu1 %v13543_v63  ;;  %v179_v63 = vld [vmem:[#allocation6 + $0x150] sm:$0xff] }
 0x17f   :  { %v13693_v4 = vcombine.low %v171_v37, %v179_v63 }
 0x185   :  { %5186 = vmatmul.mubr.bf16.vlgmr.msra.gmra.mrb[0].mxu0 %v13677_v32  ;;  %6537 = vmatmul.mubr.bf16.vlgmr.msra.gmra.mrb[32].mxu1 %v13549_v10  ;;  %v13687_v10 = vcombine.high %v171_v37, %v179_v63  ;;  %v12372_v37 = vld [vmem:[#allocation9 + $0x4ec] ss:$16 sps:$4 sm:$0xff]  }
 0x186   :  { %5347 = vmatpush1.bf16.msra.mxu0 %v12325_v26  ;;  %6698 = vmatpush1.bf16.msra.mxu1 %v12328_v27 }
 0x187   :  { %5195 = vmatprep.mubr.bf16.mxu0 %v13679_v29  ;;  %6546 = vmatprep.mubr.bf16.mxu1 %v13551_v18  ;;  %v195_v18 = vld [vmem:[#allocation6 + $0x1d0] sm:$0xff] }
 0x188   :  { %5348 = vmatprep.subr.bf16.mxu0 %v12333_v40  ;;  %6699 = vmatprep.subr.bf16.mxu1 %v12336_v36  ;;  %v13695_v30 = vcombine.high %v187_v20, %v195_v18  ;;  %v13705_v40 = vcombine.low %v187_v20, %v195_v18  ;;  %v12364_v36 = vld [vmem:[#allocation9 + $0x4c8] ss:$16 sps:$4 sm:$0xff]  }
 0x18a   :  { %5349 = vmatpush1.bf16.msra.mxu0 %v12331_v28  ;;  %6700 = vmatpush1.bf16.msra.mxu1 %v12334_v53 }
 0x18b   :  { %5350 = vmatprep.subr.bf16.mxu0 %v12339_v39  ;;  %6701 = vmatprep.subr.bf16.mxu1 %v12342_v51  ;;  %v219_v39 = vld [vmem:[#allocation6 + $0x290] sm:$0xff] }
 0x18c   :  { %v227_v51 = vld [vmem:[#allocation6 + $0x2d0] sm:$0xff] }
 0x18d   :  { %5196 = vmatmul.mubr.bf16.gmra.mrb[4].mxu0 %v13685_v43  ;;  %6547 = vmatmul.mubr.bf16.gmra.mrb[36].mxu1 %v13557_v33  ;;  %v12357_v33 = vld [vmem:[#allocation9 + $0x6a4] ss:$16 sps:$4 sm:$0xff]  }
 0x18e   :  { %5205 = vmatprep.mubr.bf16.mxu0 %v13687_v10  ;;  %6556 = vmatprep.mubr.bf16.mxu1 %v13559_v44  ;;  %v203_v44 = vld [vmem:[#allocation6 + $0x210] sm:$0xff] }
 0x18f   :  { %5351 = vmatpush1.bf16.msra.mxu0 %v12337_v46  ;;  %6702 = vmatpush1.bf16.msra.mxu1 %v12340_v49  ;;  %v13709_v53 = vcombine.high %v203_v44, %v211_v48  ;;  %v12367_v46 = vld [vmem:[#allocation9 + $0x6e0] ss:$16 sps:$4 sm:$0xff]   ;;  %v12370_v49 = vld [vmem:[#allocation9 + $0x4e8] ss:$16 sps:$4 sm:$0xff]  }
 0x190   :  { %5352 = vmatprep.subr.bf16.mxu0 %v12345_v54  ;;  %6703 = vmatprep.subr.bf16.mxu1 %v12348_v50  ;;  %v12375_v54 = vld [vmem:[#allocation9 + $0x704] ss:$16 sps:$4 sm:$0xff]   ;;  %v12378_v50 = vld [vmem:[#allocation9 + $0x50c] ss:$16 sps:$4 sm:$0xff]  }
 0x193   :  { %5353 = vmatpush1.bf16.msra.mxu0 %v12343_v57  ;;  %6704 = vmatpush1.bf16.msra.mxu1 %v12346_v45  ;;  %v13721_v57 = vcombine.low %v203_v44, %v211_v48  ;;  %v12376_v45 = vld [vmem:[#allocation9 + $0x508] ss:$16 sps:$4 sm:$0xff]   ;;  %v12379_v44 = vld [vmem:[#allocation9 + $0x720] ss:$16 sps:$4 sm:$0xff]  }
 0x194   :  { %5354 = vmatprep.subr.bf16.mxu0 %v12351_v52  ;;  %6705 = vmatprep.subr.bf16.mxu1 %v12354_v61  ;;  %v13725_v61 = vcombine.high %v219_v39, %v227_v51  ;;  %v12382_v48 = vld [vmem:[#allocation9 + $0x528] ss:$16 sps:$4 sm:$0xff]  }
 0x195   :  { %5206 = vmatmul.mubr.bf16.gmra.mrb[8].mxu0 %v13693_v4  ;;  %6557 = vmatmul.mubr.bf16.gmra.mrb[40].mxu1 %v13565_v55  ;;  %v12361_v55 = vld [vmem:[#allocation9 + $0x6c0] ss:$16 sps:$4 sm:$0xff]  }
 0x196   :  { %5215 = vmatprep.mubr.bf16.mxu0 %v13695_v30  ;;  %6566 = vmatprep.mubr.bf16.mxu1 %v13567_v62  ;;  %v12369_v62 = vld [vmem:[#allocation9 + $0x6e4] ss:$16 sps:$4 sm:$0xff]  }
 0x197   :  { %5355 = vmatpush1.bf16.msra.mxu0 %v12349_v13  ;;  %6706 = vmatpush1.bf16.msra.mxu1 %v12352_v22  ;;  %v12384_v13 = vld [vmem:[#allocation9 + $0x52c] ss:$16 sps:$4 sm:$0xff]  }
 0x198   :  { %v13701_v26 = vpop.f32.mrb[0].mxu1  ;;  %5356 = vmatprep.subr.bf16.mxu0 %v12357_v33  ;;  %6707 = vmatprep.subr.bf16.mxu1 %v12360_v38  ;;  %v235_v33 = vld [vmem:[#allocation6 + $0x310] sm:$0xff] }
 0x199   :  { %v13703_v27 = vpop.f32.mrb[1].mxu1  ;;  %v243_v38 = vld [vmem:[#allocation6 + $0x350] sm:$0xff] }
 0x19a   :  { %v13707_v28 = vpop.f32.mrb[2].mxu1 }
 0x19b   :  { %v13711_v63 = vpop.f32.mrb[3].mxu1  ;;  %5357 = vmatpush1.bf16.msra.mxu0 %v12355_v58  ;;  %6708 = vmatpush1.bf16.msra.mxu1 %v12358_v8  ;;  %v12387_v58 = vld [vmem:[#allocation9 + $0x744] ss:$16 sps:$4 sm:$0xff]   ;;  %v12390_v8 = vld [vmem:[#allocation9 + $0x54c] ss:$16 sps:$4 sm:$0xff]  }
 0x19c   :  { %5358 = vmatprep.subr.bf16.mxu0 %v12363_v17  ;;  %6709 = vmatprep.subr.bf16.mxu1 %v12366_v31 }
 0x19d   :  { %5216 = vmatmul.mubr.bf16.gmra.mrb[12].mxu0 %v13705_v40  ;;  %6567 = vmatmul.mubr.bf16.gmra.mrb[44].mxu1 %v13573_v11  ;;  %v12373_v11 = vld [vmem:[#allocation9 + $0x700] ss:$16 sps:$4 sm:$0xff]  }
 0x19e   :  { %5225 = vmatprep.mubr.bf16.mxu0 %v13709_v53  ;;  %6576 = vmatprep.mubr.bf16.mxu1 %v13575_v23  ;;  %v12381_v23 = vld [vmem:[#allocation9 + $0x724] ss:$16 sps:$4 sm:$0xff]  }
 0x19f   :  { %5359 = vmatpush1.bf16.msra.mxu0 %v12361_v55  ;;  %6710 = vmatpush1.bf16.msra.mxu1 %v12364_v36  ;;  %v13737_v55 = vcombine.low %v219_v39, %v227_v51  ;;  %v12388_v36 = vld [vmem:[#allocation9 + $0x548] ss:$16 sps:$4 sm:$0xff]   ;;  %v251_v39 = vld [vmem:[#allocation6 + $0x390] sm:$0xff] }
 0x1a0   :  { %v13717_v20 = vpop.f32.mrb[4].mxu1  ;;  %5360 = vmatprep.subr.bf16.mxu0 %v12369_v62  ;;  %6711 = vmatprep.subr.bf16.mxu1 %v12372_v37  ;;  %v13741_v37 = vcombine.high %v235_v33, %v243_v38  ;;  %v259_v51 = vld [vmem:[#allocation6 + $0x3d0] sm:$0xff] }
 0x1a1   :  { %v13719_v18 = vpop.f32.mrb[5].mxu1 }
 0x1a2   :  { %v13723_v52 = vpop.f32.mrb[6].mxu1 }
 0x1a3   :  { %v13727_v22 = vpop.f32.mrb[7].mxu1  ;;  %5361 = vmatpush1.bf16.msra.mxu0 %v12367_v46  ;;  %6712 = vmatpush1.bf16.msra.mxu1 %v12370_v49  ;;  %v12396_v46 = vld [vmem:[#allocation9 + $0x56c] ss:$16 sps:$4 sm:$0xff]  }
 0x1a4   :  { %5362 = vmatprep.subr.bf16.mxu0 %v12375_v54  ;;  %6713 = vmatprep.subr.bf16.mxu1 %v12378_v50  ;;  %v12391_v54 = vld [vmem:[#allocation9 + $0x760] ss:$16 sps:$4 sm:$0xff]   ;;  %v12394_v50 = vld [vmem:[#allocation9 + $0x568] ss:$16 sps:$4 sm:$0xff]  }
 0x1a5   :  { %5226 = vmatmul.mubr.bf16.gmra.mrb[16].mxu0 %v13721_v57  ;;  %6577 = vmatmul.mubr.bf16.gmra.mrb[48].mxu1 %v13581_v34  ;;  %v12385_v34 = vld [vmem:[#allocation9 + $0x740] ss:$16 sps:$4 sm:$0xff]  }
 0x1a6   :  { %5235 = vmatprep.mubr.bf16.mxu0 %v13725_v61  ;;  %6586 = vmatprep.mubr.bf16.mxu1 %v13583_v41  ;;  %v12393_v41 = vld [vmem:[#allocation9 + $0x764] ss:$16 sps:$4 sm:$0xff]  }
 0x1a7   :  { %5363 = vmatpush1.bf16.msra.mxu0 %v12373_v11  ;;  %6714 = vmatpush1.bf16.msra.mxu1 %v12376_v45  ;;  %v12399_v11 = vld [vmem:[#allocation9 + $0x784] ss:$16 sps:$4 sm:$0xff]   ;;  %v12402_v45 = vld [vmem:[#allocation9 + $0x58c] ss:$16 sps:$4 sm:$0xff]  }
 0x1a8   :  { %v13733_v17 = vpop.f32.mrb[8].mxu1  ;;  %5364 = vmatprep.subr.bf16.mxu0 %v12381_v23  ;;  %6715 = vmatprep.subr.bf16.mxu1 %v12384_v13 }
 0x1a9   :  { %v13735_v31 = vpop.f32.mrb[9].mxu1 }
 0x1aa   :  { %v13739_v62 = vpop.f32.mrb[10].mxu1 }
 0x1ab   :  { %15192 = vst [vmem:[#allocation27_spill] sm:$0xff] %v13739_v62  ;;  %v13743_v49 = vpop.f32.mrb[11].mxu1  ;;  %5365 = vmatpush1.bf16.msra.mxu0 %v12379_v44  ;;  %6716 = vmatpush1.bf16.msra.mxu1 %v12382_v48  ;;  %v13753_v44 = vcombine.low %v235_v33, %v243_v38  ;;  %v12400_v48 = vld [vmem:[#allocation9 + $0x588] ss:$16 sps:$4 sm:$0xff]   ;;  %v267_v33 = vld [vmem:[#allocation6 + $0x410] sm:$0xff] }
 0x1ac   :  { %15193 = vst [vmem:[#allocation28_spill] sm:$0xff] %v13743_v49  ;;  %5366 = vmatprep.subr.bf16.mxu0 %v12387_v58  ;;  %6717 = vmatprep.subr.bf16.mxu1 %v12390_v8  ;;  %v13757_v8 = vcombine.high %v251_v39, %v259_v51  ;;  %v12408_v49 = vld [vmem:[#allocation9 + $0x5ac] ss:$16 sps:$4 sm:$0xff]   ;;  %v275_v38 = vld [vmem:[#allocation6 + $0x450] sm:$0xff] }
 0x1ad   :  { %5236 = vmatmul.mubr.bf16.gmra.mrb[20].mxu0 %v13737_v55  ;;  %6587 = vmatmul.mubr.bf16.gmra.mrb[52].mxu1 %v13589_v56  ;;  %v12397_v56 = vld [vmem:[#allocation9 + $0x780] ss:$16 sps:$4 sm:$0xff]  }
 0x1ae   :  { %5245 = vmatprep.mubr.bf16.mxu0 %v13741_v37  ;;  %6596 = vmatprep.mubr.bf16.mxu1 %v13591_v0  ;;  %v12405_v0 = vld [vmem:[#allocation9 + $0x7a4] ss:$16 sps:$4 sm:$0xff]  }
 0x1af   :  { %5367 = vmatpush1.bf16.msra.mxu0 %v12385_v34  ;;  %6718 = vmatpush1.bf16.msra.mxu1 %v12388_v36  ;;  %v12403_v34 = vld [vmem:[#allocation9 + $0x7a0] ss:$16 sps:$4 sm:$0xff]   ;;  %v12406_v36 = vld [vmem:[#allocation9 + $0x5a8] ss:$16 sps:$4 sm:$0xff]  }
 0x1b0   :  { %v13749_v23 = vpop.f32.mrb[12].mxu1  ;;  %5368 = vmatprep.subr.bf16.mxu0 %v12393_v41  ;;  %6719 = vmatprep.subr.bf16.mxu1 %v12396_v46  ;;  %v12411_v41 = vld [vmem:[#allocation9 + $0x7c4] ss:$16 sps:$4 sm:$0xff]   ;;  %v12414_v46 = vld [vmem:[#allocation9 + $0x5cc] ss:$16 sps:$4 sm:$0xff]  }
 0x1b1   :  { %15194 = vst [vmem:[#allocation29_spill] sm:$0xff] %v13749_v23  ;;  %v13751_v13 = vpop.f32.mrb[13].mxu1 }
 0x1b2   :  { %15195 = vst [vmem:[#allocation30_spill] sm:$0xff] %v13751_v13  ;;  %v13755_v58 = vpop.f32.mrb[14].mxu1  ;;  %v12420_v13 = vld [vmem:[#allocation9 + $0x5ec] ss:$16 sps:$4 sm:$0xff]  }
 0x1b3   :  { %15196 = vst [vmem:[#allocation31_spill] sm:$0xff] %v13755_v58  ;;  %v13759_v62 = vpop.f32.mrb[15].mxu1  ;;  %5369 = vmatpush1.bf16.msra.mxu0 %v12391_v54  ;;  %6720 = vmatpush1.bf16.msra.mxu1 %v12394_v50  ;;  %v13773_v58 = vcombine.high %v267_v33, %v275_v38 }
 0x1b4   :  { %15197 = vst [vmem:[#allocation32_spill] sm:$0xff] %v13759_v62  ;;  %5370 = vmatprep.subr.bf16.mxu0 %v12399_v11  ;;  %6721 = vmatprep.subr.bf16.mxu1 %v12402_v45  ;;  %v13769_v11 = vcombine.low %v251_v39, %v259_v51  ;;  %v12412_v45 = vld [vmem:[#allocation9 + $0x5c8] ss:$16 sps:$4 sm:$0xff]   ;;  %v291_v39 = vld [vmem:[#allocation6 + $0x4d0] sm:$0xff] }
 0x1b5   :  { %5246 = vmatmul.mubr.bf16.gmra.mrb[24].mxu0 %v13753_v44  ;;  %6597 = vmatmul.mubr.bf16.gmra.mrb[56].mxu1 %v13597_v14  ;;  %v12409_v14 = vld [vmem:[#allocation9 + $0x7c0] ss:$16 sps:$4 sm:$0xff]  }
 0x1b6   :  { %5255 = vmatprep.mubr.bf16.mxu0 %v13757_v8  ;;  %6606 = vmatprep.mubr.bf16.mxu1 %v13599_v24  ;;  %v12417_v24 = vld [vmem:[#allocation9 + $0x7e4] ss:$16 sps:$4 sm:$0xff]   ;;  %v12415_v51 = vld [vmem:[#allocation9 + $0x7e0] ss:$16 sps:$4 sm:$0xff]  }
 0x1b7   :  { %5371 = vmatpush1.bf16.msra.mxu0 %v12397_v56  ;;  %6722 = vmatpush1.bf16.msra.mxu1 %v12400_v48  ;;  %v12418_v56 = vld [vmem:[#allocation9 + $0x5e8] ss:$16 sps:$4 sm:$0xff]  }
 0x1b8   :  { %v13765_v54 = vpop.f32.mrb[16].mxu1  ;;  %5372 = vmatprep.subr.bf16.mxu0 %v12405_v0  ;;  %6723 = vmatprep.subr.bf16.mxu1 %v12408_v49  ;;  %v283_v49 = vld [vmem:[#allocation6 + $0x490] sm:$0xff] }
 0x1b9   :  { %v13767_v50 = vpop.f32.mrb[17].mxu1  ;;  %v12423_v0 = vld [vmem:[#allocation9 + $0x804] ss:$16 sps:$4 sm:$0xff]  }
 0x1ba   :  { %v13771_v62 = vpop.f32.mrb[18].mxu1 }
 0x1bb   :  { %v13775_v23 = vpop.f32.mrb[19].mxu1  ;;  %5373 = vmatpush1.bf16.msra.mxu0 %v12403_v34  ;;  %6724 = vmatpush1.bf16.msra.mxu1 %v12406_v36  ;;  %v12426_v34 = vld [vmem:[#allocation9 + $0x60c] ss:$16 sps:$4 sm:$0xff]  }
 0x1bc   :  { %5374 = vmatprep.subr.bf16.mxu0 %v12411_v41  ;;  %6725 = vmatprep.subr.bf16.mxu1 %v12414_v46  ;;  %v13785_v41 = vcombine.low %v267_v33, %v275_v38  ;;  %v13789_v46 = vcombine.high %v283_v49, %v291_v39  ;;  %v307_v33 = vld [vmem:[#allocation6 + $0x550] sm:$0xff] }
 0x1bd   :  { %5256 = vmatmul.mubr.bf16.gmra.mrb[28].mxu0 %v13769_v11  ;;  %6607 = vmatmul.mubr.bf16.gmra.mrb[60].mxu1 %v13605_v35 }
 0x1be   :  { %5265 = vmatprep.mubr.bf16.mxu0 %v13773_v58  ;;  %6616 = vmatprep.mubr.bf16.mxu1 %v13607_v42 }
 0x1bf   :  { %5375 = vmatpush1.bf16.msra.mxu0 %v12409_v14  ;;  %6726 = vmatpush1.bf16.msra.mxu1 %v12412_v45  ;;  %v13801_v45 = vcombine.low %v283_v49, %v291_v39 }
 0x1c0   :  { %v13781_v48 = vpop.f32.mrb[20].mxu1  ;;  %5376 = vmatprep.subr.bf16.mxu0 %v12417_v24  ;;  %6727 = vmatprep.subr.bf16.mxu1 %v12420_v13  ;;  %v299_v13 = vld [vmem:[#allocation6 + $0x510] sm:$0xff] }
 0x1c1   :  { %15198 = vst [vmem:[#allocation33_spill] sm:$0xff] %v13781_v48  ;;  %v13783_v36 = vpop.f32.mrb[21].mxu1  ;;  %v13817_v39 = vcombine.low %v299_v13, %v307_v33  ;;  %v12468_v48 = vld [vmem:[#allocation9 + $0x6ec] ss:$16 sps:$4 sm:$0xff]  }
 0x1c2   :  { %15199 = vst [vmem:[#allocation34_spill] sm:$0xff] %v13783_v36  ;;  %v13787_v35 = vpop.f32.mrb[22].mxu1  ;;  %v12444_v36 = vld [vmem:[#allocation9 + $0x66c] ss:$16 sps:$4 sm:$0xff]  }
 0x1c3   :  { %15200 = vst [vmem:[#allocation35_spill] sm:$0xff] %v13787_v35  ;;  %v13791_v42 = vpop.f32.mrb[23].mxu1  ;;  %5377 = vmatpush1.bf16.msra.mxu0 %v12415_v51  ;;  %6728 = vmatpush1.bf16.msra.mxu1 %v12418_v56  ;;  %v13805_v51 = vcombine.high %v299_v13, %v307_v33  ;;  %v347_v33 = vld [vmem:[#allocation6 + $0x690] sm:$0xff] }
 0x1c4   :  { %15201 = vst [vmem:[#allocation36_spill] sm:$0xff] %v13791_v42  ;;  %5539 = vmatprep.subr.bf16.mxu0 %v12423_v0  ;;  %6890 = vmatprep.subr.bf16.mxu1 %v12426_v34 }
 0x1c5   :  { %5266 = vmatmul.mubr.bf16.gmra.mrb[32].mxu0 %v13785_v41  ;;  %6617 = vmatmul.mubr.bf16.gmra.mrb[64].mxu1 %v13613_v59  ;;  %v315_v59 = vld [vmem:[#allocation6 + $0x590] sm:$0xff] }
 0x1c6   :  { %5275 = vmatprep.mubr.bf16.mxu0 %v13789_v46  ;;  %6626 = vmatprep.mubr.bf16.mxu1 %v13615_v60  ;;  %v323_v60 = vld [vmem:[#allocation6 + $0x5d0] sm:$0xff] }
 0x1c8   :  { %v13797_v38 = vpop.f32.mrb[24].mxu1 }
 0x1c9   :  { %15202 = vst [vmem:[#allocation37_spill] sm:$0xff] %v13797_v38  ;;  %v13799_v14 = vpop.f32.mrb[25].mxu1  ;;  %v172_v38 = vld [vmem:[#allocation6 + $0x118] sm:$0xff] }
 0x1ca   :  { %15203 = vst [vmem:[#allocation38_spill] sm:$0xff] %v13799_v14  ;;  %v13803_v24 = vpop.f32.mrb[26].mxu1  ;;  %v12430_v14 = vld [vmem:[#allocation9 + $0x628] ss:$16 sps:$4 sm:$0xff]  }
 0x1cb   :  { %15204 = vst [vmem:[#allocation39_spill] sm:$0xff] %v13803_v24  ;;  %v13807_v56 = vpop.f32.mrb[27].mxu1  ;;  %v13821_v24 = vcombine.high %v315_v59, %v323_v60 }
 0x1cc   :  { %15205 = vst [vmem:[#allocation40_spill] sm:$0xff] %v13807_v56 }
 0x1cd   :  { %5276 = vmatmul.mubr.bf16.gmra.mrb[36].mxu0 %v13801_v45  ;;  %6627 = vmatmul.mubr.bf16.gmra.mrb[68].mxu1 %v13621_v47  ;;  %v331_v47 = vld [vmem:[#allocation6 + $0x610] sm:$0xff] }
 0x1ce   :  { %5285 = vmatprep.mubr.bf16.mxu0 %v13805_v51  ;;  %6636 = vmatprep.mubr.bf16.mxu1 %v13623_v3  ;;  %v339_v3 = vld [vmem:[#allocation6 + $0x650] sm:$0xff] }
 0x1cf   :  { %v13831_v13 = vcombine.high %v331_v47, %v339_v3 }
 0x1d0   :  { %v13813_v0 = vpop.f32.mrb[28].mxu1 }
 0x1d1   :  { %15206 = vst [vmem:[#allocation41_spill] sm:$0xff] %v13813_v0  ;;  %v13815_v49 = vpop.f32.mrb[29].mxu1  ;;  %v13829_v0 = vcombine.low %v315_v59, %v323_v60 }
 0x1d2   :  { %15207 = vst [vmem:[#allocation42_spill] sm:$0xff] %v13815_v49  ;;  %v13819_v34 = vpop.f32.mrb[30].mxu1 }
 0x1d3   :  { %15208 = vst [vmem:[#allocation43_spill] sm:$0xff] %v13819_v34  ;;  %v13823_v56 = vpop.f32.mrb[31].mxu1 }
 0x1d4   :  { %15209 = vst [vmem:[#allocation44_spill] sm:$0xff] %v13823_v56  ;;  %v13837_v56 = vcombine.low %v331_v47, %v339_v3 }
 0x1d5   :  { %5286 = vmatmul.mubr.bf16.gmra.mrb[40].mxu0 %v13817_v39  ;;  %6637 = vmatmul.mubr.bf16.gmra.mrb[72].mxu1 %v13629_v1  ;;  %v355_v1 = vld [vmem:[#allocation6 + $0x6d0] sm:$0xff] }
 0x1d6   :  { %5295 = vmatprep.mubr.bf16.mxu0 %v13821_v24  ;;  %6646 = vmatprep.mubr.bf16.mxu1 %v13631_v2  ;;  %v13839_v34 = vcombine.high %v347_v33, %v355_v1  ;;  %v363_v2 = vld [vmem:[#allocation6 + $0x710] sm:$0xff]  ;;  %v13845_v59 = vcombine.low %v347_v33, %v355_v1 }
 0x1dd   :  { %5296 = vmatmul.mubr.bf16.gmra.mrb[44].mxu0 %v13829_v0  ;;  %6647 = vmatmul.mubr.bf16.gmra.mrb[76].mxu1 %v13637_v5  ;;  %v371_v5 = vld [vmem:[#allocation6 + $0x750] sm:$0xff] }
 0x1de   :  { %5305 = vmatprep.mubr.bf16.mxu0 %v13831_v13  ;;  %6656 = vmatprep.mubr.bf16.mxu1 %v13639_v6  ;;  %v13847_v60 = vcombine.high %v363_v2, %v371_v5  ;;  %v379_v6 = vld [vmem:[#allocation6 + $0x790] sm:$0xff]  ;;  %v13853_v47 = vcombine.low %v363_v2, %v371_v5 }
 0x1df   :  { %v12421_v5 = vld [vmem:[#allocation9 + $0x800] ss:$16 sps:$4 sm:$0xff]  }
 0x1e5   :  { %5306 = vmatmul.mubr.bf16.gmra.mrb[48].mxu0 %v13837_v56  ;;  %6657 = vmatmul.mubr.bf16.gmra.mrb[80].mxu1 %v13645_v9  ;;  %v387_v9 = vld [vmem:[#allocation6 + $0x7d0] sm:$0xff] }
 0x1e6   :  { %5315 = vmatprep.mubr.bf16.mxu0 %v13839_v34  ;;  %6666 = vmatprep.mubr.bf16.mxu1 %v13647_v19  ;;  %v13855_v3 = vcombine.high %v379_v6, %v387_v9  ;;  %v140_v19 = vld [vmem:[#allocation6 + $0x18] sm:$0xff]  ;;  %v13861_v33 = vcombine.low %v379_v6, %v387_v9  ;;  %v12429_v6 = vld [vmem:[#allocation9 + $0x824] ss:$16 sps:$4 sm:$0xff]  }
 0x1e7   :  { %v12432_v9 = vld [vmem:[#allocation9 + $0x62c] ss:$16 sps:$4 sm:$0xff]  }
 0x1ed   :  { %5316 = vmatmul.mubr.bf16.gmra.mrb[52].mxu0 %v13845_v59  ;;  %6667 = vmatmul.mubr.bf16.gmra.mrb[84].mxu1 %v13653_v12  ;;  %v148_v12 = vld [vmem:[#allocation6 + $0x58] sm:$0xff] }
 0x1ee   :  { %5325 = vmatprep.mubr.bf16.mxu0 %v13847_v60  ;;  %6676 = vmatprep.mubr.bf16.mxu1 %v13655_v7  ;;  %v13863_v1 = vcombine.high %v140_v19, %v148_v12  ;;  %v156_v7 = vld [vmem:[#allocation6 + $0x98] sm:$0xff]  ;;  %v13869_v2 = vcombine.low %v140_v19, %v148_v12  ;;  %v12435_v19 = vld [vmem:[#allocation9 + $0x844] ss:$16 sps:$4 sm:$0xff]  }
 0x1ef   :  { %v12438_v12 = vld [vmem:[#allocation9 + $0x64c] ss:$16 sps:$4 sm:$0xff]  }
 0x1f5   :  { %5326 = vmatmul.mubr.bf16.gmra.mrb[56].mxu0 %v13853_v47  ;;  %6677 = vmatmul.mubr.bf16.gmra.mrb[88].mxu1 %v13661_v21  ;;  %v164_v21 = vld [vmem:[#allocation6 + $0xd8] sm:$0xff] }
 0x1f6   :  { %5335 = vmatprep.mubr.bf16.mxu0 %v13855_v3  ;;  %6686 = vmatprep.mubr.bf16.mxu1 %v13663_v15  ;;  %v12424_v15 = vld [vmem:[#allocation9 + $0x608] ss:$16 sps:$4 sm:$0xff]   ;;  %v13871_v49 = vcombine.high %v156_v7, %v164_v21  ;;  %v13877_v42 = vcombine.low %v156_v7, %v164_v21  ;;  %v12439_v7 = vld [vmem:[#allocation9 + $0x860] ss:$16 sps:$4 sm:$0xff]  }
 0x1f7   :  { %v12442_v21 = vld [vmem:[#allocation9 + $0x668] ss:$16 sps:$4 sm:$0xff]  }
 0x1fd   :  { %5336 = vmatmul.mubr.bf16.gmra.mrb[60].mxu0 %v13861_v33  ;;  %6687 = vmatmul.mubr.bf16.gmra.mrb[92].mxu1 %v13669_v25  ;;  %v12427_v25 = vld [vmem:[#allocation9 + $0x820] ss:$16 sps:$4 sm:$0xff]  }
 0x1fe   :  { %5378 = vmatprep.mubr.bf16.mxu0 %v13863_v1  ;;  %6729 = vmatprep.mubr.bf16.mxu1 %v13671_v16  ;;  %v180_v16 = vld [vmem:[#allocation6 + $0x158] sm:$0xff] }
 0x1ff   :  { %v13879_v35 = vcombine.high %v172_v38, %v180_v16 }
 0x205   :  { %5379 = vmatmul.mubr.bf16.vlgmr.msra.gmra.mrb[0].mxu0 %v13869_v2  ;;  %6730 = vmatmul.mubr.bf16.vlgmr.msra.gmra.mrb[32].mxu1 %v13677_v32  ;;  %v12433_v32 = vld [vmem:[#allocation9 + $0x840] ss:$16 sps:$4 sm:$0xff]  }
 0x206   :  { %5540 = vmatpush1.bf16.msra.mxu0 %v12421_v5  ;;  %6891 = vmatpush1.bf16.msra.mxu1 %v12424_v15  ;;  %v12436_v5 = vld [vmem:[#allocation9 + $0x648] ss:$16 sps:$4 sm:$0xff]   ;;  %v12441_v15 = vld [vmem:[#allocation9 + $0x864] ss:$16 sps:$4 sm:$0xff]  }
 0x207   :  { %5388 = vmatprep.mubr.bf16.mxu0 %v13871_v49  ;;  %6739 = vmatprep.mubr.bf16.mxu1 %v13679_v29  ;;  %v188_v29 = vld [vmem:[#allocation6 + $0x198] sm:$0xff] }
 0x208   :  { %5541 = vmatprep.subr.bf16.mxu0 %v12429_v6  ;;  %6892 = vmatprep.subr.bf16.mxu1 %v12432_v9  ;;  %v12447_v6 = vld [vmem:[#allocation9 + $0x884] ss:$16 sps:$4 sm:$0xff]   ;;  %v12450_v9 = vld [vmem:[#allocation9 + $0x68c] ss:$16 sps:$4 sm:$0xff]  }
 0x20a   :  { %5542 = vmatpush1.bf16.msra.mxu0 %v12427_v25  ;;  %6893 = vmatpush1.bf16.msra.mxu1 %v12430_v14  ;;  %v196_v14 = vld [vmem:[#allocation6 + $0x1d8] sm:$0xff]  ;;  %v13885_v25 = vcombine.low %v172_v38, %v180_v16  ;;  %v12451_v16 = vld [vmem:[#allocation9 + $0x8a0] ss:$16 sps:$4 sm:$0xff]  }
 0x20b   :  { %5543 = vmatprep.subr.bf16.mxu0 %v12435_v19  ;;  %6894 = vmatprep.subr.bf16.mxu1 %v12438_v12  ;;  %v13887_v19 = vcombine.high %v188_v29, %v196_v14  ;;  %v12448_v12 = vld [vmem:[#allocation9 + $0x688] ss:$16 sps:$4 sm:$0xff]  }
 0x20c   :  { %v212_v38 = vld [vmem:[#allocation6 + $0x258] sm:$0xff] }
 0x20d   :  { %5389 = vmatmul.mubr.bf16.gmra.mrb[4].mxu0 %v13877_v42  ;;  %6740 = vmatmul.mubr.bf16.gmra.mrb[36].mxu1 %v13685_v43  ;;  %v12445_v43 = vld [vmem:[#allocation9 + $0x880] ss:$16 sps:$4 sm:$0xff]  }
 0x20e   :  { %5398 = vmatprep.mubr.bf16.mxu0 %v13879_v35  ;;  %6749 = vmatprep.mubr.bf16.mxu1 %v13687_v10  ;;  %v12453_v10 = vld [vmem:[#allocation9 + $0x8a4] ss:$16 sps:$4 sm:$0xff]  }
 0x20f   :  { %5544 = vmatpush1.bf16.msra.mxu0 %v12433_v32  ;;  %6895 = vmatpush1.bf16.msra.mxu1 %v12436_v5  ;;  %v12456_v32 = vld [vmem:[#allocation9 + $0x6ac] ss:$16 sps:$4 sm:$0xff]   ;;  %v12454_v5 = vld [vmem:[#allocation9 + $0x6a8] ss:$16 sps:$4 sm:$0xff]  }
 0x210   :  { %5545 = vmatprep.subr.bf16.mxu0 %v12441_v15  ;;  %6896 = vmatprep.subr.bf16.mxu1 %v12444_v36  ;;  %v204_v36 = vld [vmem:[#allocation6 + $0x218] sm:$0xff]  ;;  %v12459_v15 = vld [vmem:[#allocation9 + $0x8c4] ss:$16 sps:$4 sm:$0xff]  }
 0x213   :  { %5546 = vmatpush1.bf16.msra.mxu0 %v12439_v7  ;;  %6897 = vmatpush1.bf16.msra.mxu1 %v12442_v21  ;;  %v12462_v7 = vld [vmem:[#allocation9 + $0x6cc] ss:$16 sps:$4 sm:$0xff]   ;;  %v13893_v21 = vcombine.low %v188_v29, %v196_v14 }
 0x214   :  { %5547 = vmatprep.subr.bf16.mxu0 %v12447_v6  ;;  %6898 = vmatprep.subr.bf16.mxu1 %v12450_v9  ;;  %v13895_v6 = vcombine.high %v204_v36, %v212_v38  ;;  %v12460_v9 = vld [vmem:[#allocation9 + $0x6c8] ss:$16 sps:$4 sm:$0xff]  }
 0x215   :  { %5399 = vmatmul.mubr.bf16.gmra.mrb[8].mxu0 %v13885_v25  ;;  %6750 = vmatmul.mubr.bf16.gmra.mrb[40].mxu1 %v13693_v4  ;;  %v12457_v4 = vld [vmem:[#allocation9 + $0x8c0] ss:$16 sps:$4 sm:$0xff]   ;;  %v220_v29 = vld [vmem:[#allocation6 + $0x298] sm:$0xff] }
 0x216   :  { %5408 = vmatprep.mubr.bf16.mxu0 %v13887_v19  ;;  %6759 = vmatprep.mubr.bf16.mxu1 %v13695_v30  ;;  %v12465_v30 = vld [vmem:[#allocation9 + $0x8e4] ss:$16 sps:$4 sm:$0xff]   ;;  %v228_v14 = vld [vmem:[#allocation6 + $0x2d8] sm:$0xff] }
 0x217   :  { %5548 = vmatpush1.bf16.msra.mxu0 %v12445_v43  ;;  %6899 = vmatpush1.bf16.msra.mxu1 %v12448_v12  ;;  %v12463_v43 = vld [vmem:[#allocation9 + $0x8e0] ss:$16 sps:$4 sm:$0xff]   ;;  %v12466_v12 = vld [vmem:[#allocation9 + $0x6e8] ss:$16 sps:$4 sm:$0xff]  }
 0x218   :  { %5549 = vmatprep.subr.bf16.mxu0 %v12453_v10  ;;  %6900 = vmatprep.subr.bf16.mxu1 %v12456_v32  ;;  %v12471_v10 = vld [vmem:[#allocation9 + $0x904] ss:$16 sps:$4 sm:$0xff]   ;;  %v12474_v32 = vld [vmem:[#allocation9 + $0x70c] ss:$16 sps:$4 sm:$0xff]  }
 0x21b   :  { %5550 = vmatpush1.bf16.msra.mxu0 %v12451_v16  ;;  %6901 = vmatpush1.bf16.msra.mxu1 %v12454_v5  ;;  %v13901_v16 = vcombine.low %v204_v36, %v212_v38  ;;  %v13903_v5 = vcombine.high %v220_v29, %v228_v14  ;;  %v244_v36 = vld [vmem:[#allocation6 + $0x358] sm:$0xff]  ;;  %v12475_v38 = vld [vmem:[#allocation9 + $0x920] ss:$16 sps:$4 sm:$0xff]  }
 0x21c   :  { %5551 = vmatprep.subr.bf16.mxu0 %v12459_v15  ;;  %6902 = vmatprep.subr.bf16.mxu1 %v12462_v7  ;;  %v12472_v15 = vld [vmem:[#allocation9 + $0x708] ss:$16 sps:$4 sm:$0xff]   ;;  %v12480_v7 = vld [vmem:[#allocation9 + $0x72c] ss:$16 sps:$4 sm:$0xff]  }
 0x21d   :  { %5409 = vmatmul.mubr.bf16.gmra.mrb[12].mxu0 %v13893_v21  ;;  %6760 = vmatmul.mubr.bf16.gmra.mrb[44].mxu1 %v13705_v40  ;;  %v12469_v40 = vld [vmem:[#allocation9 + $0x900] ss:$16 sps:$4 sm:$0xff]  }
 0x21e   :  { %5418 = vmatprep.mubr.bf16.mxu0 %v13895_v6  ;;  %6769 = vmatprep.mubr.bf16.mxu1 %v13709_v53  ;;  %v12477_v53 = vld [vmem:[#allocation9 + $0x924] ss:$16 sps:$4 sm:$0xff]  }
 0x21f   :  { %5552 = vmatpush1.bf16.msra.mxu0 %v12457_v4  ;;  %6903 = vmatpush1.bf16.msra.mxu1 %v12460_v9  ;;  %v12478_v4 = vld [vmem:[#allocation9 + $0x728] ss:$16 sps:$4 sm:$0xff]   ;;  %v12483_v9 = vld [vmem:[#allocation9 + $0x944] ss:$16 sps:$4 sm:$0xff]  }
 0x220   :  { %5553 = vmatprep.subr.bf16.mxu0 %v12465_v30  ;;  %6904 = vmatprep.subr.bf16.mxu1 %v12468_v48  ;;  %v236_v48 = vld [vmem:[#allocation6 + $0x318] sm:$0xff] }
 0x221   :  { %v12486_v30 = vld [vmem:[#allocation9 + $0x74c] ss:$16 sps:$4 sm:$0xff]  }
 0x223   :  { %5554 = vmatpush1.bf16.msra.mxu0 %v12463_v43  ;;  %6905 = vmatpush1.bf16.msra.mxu1 %v12466_v12  ;;  %v13909_v43 = vcombine.low %v220_v29, %v228_v14  ;;  %v13911_v12 = vcombine.high %v236_v48, %v244_v36  ;;  %v252_v29 = vld [vmem:[#allocation6 + $0x398] sm:$0xff] }
 0x224   :  { %5555 = vmatprep.subr.bf16.mxu0 %v12471_v10  ;;  %6906 = vmatprep.subr.bf16.mxu1 %v12474_v32  ;;  %v12484_v10 = vld [vmem:[#allocation9 + $0x748] ss:$16 sps:$4 sm:$0xff]   ;;  %v12492_v32 = vld [vmem:[#allocation9 + $0x76c] ss:$16 sps:$4 sm:$0xff]  }
 0x225   :  { %5419 = vmatmul.mubr.bf16.gmra.mrb[16].mxu0 %v13901_v16  ;;  %6770 = vmatmul.mubr.bf16.gmra.mrb[48].mxu1 %v13721_v57  ;;  %v12481_v57 = vld [vmem:[#allocation9 + $0x940] ss:$16 sps:$4 sm:$0xff]   ;;  %v260_v14 = vld [vmem:[#allocation6 + $0x3d8] sm:$0xff] }
 0x226   :  { %5428 = vmatprep.mubr.bf16.mxu0 %v13903_v5  ;;  %6779 = vmatprep.mubr.bf16.mxu1 %v13725_v61  ;;  %v12489_v61 = vld [vmem:[#allocation9 + $0x964] ss:$16 sps:$4 sm:$0xff]  }
 0x227   :  { %5556 = vmatpush1.bf16.msra.mxu0 %v12469_v40  ;;  %6907 = vmatpush1.bf16.msra.mxu1 %v12472_v15  ;;  %v12487_v40 = vld [vmem:[#allocation9 + $0x960] ss:$16 sps:$4 sm:$0xff]   ;;  %v12490_v15 = vld [vmem:[#allocation9 + $0x768] ss:$16 sps:$4 sm:$0xff]  }
 0x228   :  { %5557 = vmatprep.subr.bf16.mxu0 %v12477_v53  ;;  %6908 = vmatprep.subr.bf16.mxu1 %v12480_v7  ;;  %v12495_v53 = vld [vmem:[#allocation9 + $0x984] ss:$16 sps:$4 sm:$0xff]   ;;  %v12498_v7 = vld [vmem:[#allocation9 + $0x78c] ss:$16 sps:$4 sm:$0xff]  }
 0x22b   :  { %5558 = vmatpush1.bf16.msra.mxu0 %v12475_v38  ;;  %6909 = vmatpush1.bf16.msra.mxu1 %v12478_v4  ;;  %v13917_v38 = vcombine.low %v236_v48, %v244_v36  ;;  %v13919_v4 = vcombine.high %v252_v29, %v260_v14  ;;  %v268_v48 = vld [vmem:[#allocation6 + $0x418] sm:$0xff] }
 0x22c   :  { %5559 = vmatprep.subr.bf16.mxu0 %v12483_v9  ;;  %6910 = vmatprep.subr.bf16.mxu1 %v12486_v30  ;;  %v12496_v9 = vld [vmem:[#allocation9 + $0x788] ss:$16 sps:$4 sm:$0xff]   ;;  %v12504_v30 = vld [vmem:[#allocation9 + $0x7ac] ss:$16 sps:$4 sm:$0xff]  }
 0x22d   :  { %5429 = vmatmul.mubr.bf16.gmra.mrb[20].mxu0 %v13909_v43  ;;  %6780 = vmatmul.mubr.bf16.gmra.mrb[52].mxu1 %v13737_v55  ;;  %v12493_v55 = vld [vmem:[#allocation9 + $0x980] ss:$16 sps:$4 sm:$0xff]   ;;  %v276_v36 = vld [vmem:[#allocation6 + $0x458] sm:$0xff] }
 0x22e   :  { %5438 = vmatprep.mubr.bf16.mxu0 %v13911_v12  ;;  %6789 = vmatprep.mubr.bf16.mxu1 %v13741_v37  ;;  %v12501_v37 = vld [vmem:[#allocation9 + $0x9a4] ss:$16 sps:$4 sm:$0xff]  }
 0x22f   :  { %5560 = vmatpush1.bf16.msra.mxu0 %v12481_v57  ;;  %6911 = vmatpush1.bf16.msra.mxu1 %v12484_v10  ;;  %v12499_v57 = vld [vmem:[#allocation9 + $0x9a0] ss:$16 sps:$4 sm:$0xff]   ;;  %v12502_v10 = vld [vmem:[#allocation9 + $0x7a8] ss:$16 sps:$4 sm:$0xff]  }
 0x230   :  { %5561 = vmatprep.subr.bf16.mxu0 %v12489_v61  ;;  %6912 = vmatprep.subr.bf16.mxu1 %v12492_v32  ;;  %v12507_v61 = vld [vmem:[#allocation9 + $0x9c4] ss:$16 sps:$4 sm:$0xff]   ;;  %v12510_v32 = vld [vmem:[#allocation9 + $0x7cc] ss:$16 sps:$4 sm:$0xff]  }
 0x233   :  { %5562 = vmatpush1.bf16.msra.mxu0 %v12487_v40  ;;  %6913 = vmatpush1.bf16.msra.mxu1 %v12490_v15  ;;  %v13925_v40 = vcombine.low %v252_v29, %v260_v14  ;;  %v13927_v15 = vcombine.high %v268_v48, %v276_v36  ;;  %v284_v29 = vld [vmem:[#allocation6 + $0x498] sm:$0xff] }
 0x234   :  { %5563 = vmatprep.subr.bf16.mxu0 %v12495_v53  ;;  %6914 = vmatprep.subr.bf16.mxu1 %v12498_v7  ;;  %v12508_v53 = vld [vmem:[#allocation9 + $0x7c8] ss:$16 sps:$4 sm:$0xff]   ;;  %v12516_v7 = vld [vmem:[#allocation9 + $0x7ec] ss:$16 sps:$4 sm:$0xff]  }
 0x235   :  { %5439 = vmatmul.mubr.bf16.gmra.mrb[24].mxu0 %v13917_v38  ;;  %6790 = vmatmul.mubr.bf16.gmra.mrb[56].mxu1 %v13753_v44  ;;  %v12505_v44 = vld [vmem:[#allocation9 + $0x9c0] ss:$16 sps:$4 sm:$0xff]   ;;  %v292_v14 = vld [vmem:[#allocation6 + $0x4d8] sm:$0xff] }
 0x236   :  { %5448 = vmatprep.mubr.bf16.mxu0 %v13919_v4  ;;  %6799 = vmatprep.mubr.bf16.mxu1 %v13757_v8  ;;  %v12513_v8 = vld [vmem:[#allocation9 + $0x9e4] ss:$16 sps:$4 sm:$0xff]  }
 0x237   :  { %5564 = vmatpush1.bf16.msra.mxu0 %v12493_v55  ;;  %6915 = vmatpush1.bf16.msra.mxu1 %v12496_v9  ;;  %v12511_v55 = vld [vmem:[#allocation9 + $0x9e0] ss:$16 sps:$4 sm:$0xff]   ;;  %v12514_v9 = vld [vmem:[#allocation9 + $0x7e8] ss:$16 sps:$4 sm:$0xff]  }
 0x238   :  { %5565 = vmatprep.subr.bf16.mxu0 %v12501_v37  ;;  %6916 = vmatprep.subr.bf16.mxu1 %v12504_v30  ;;  %v12519_v37 = vld [vmem:[#allocation9 + $0xa04] ss:$16 sps:$4 sm:$0xff]   ;;  %v12522_v30 = vld [vmem:[#allocation9 + $0x80c] ss:$16 sps:$4 sm:$0xff]  }
 0x23b   :  { %5566 = vmatpush1.bf16.msra.mxu0 %v12499_v57  ;;  %6917 = vmatpush1.bf16.msra.mxu1 %v12502_v10  ;;  %v13933_v57 = vcombine.low %v268_v48, %v276_v36  ;;  %v13935_v10 = vcombine.high %v284_v29, %v292_v14  ;;  %v316_v36 = vld [vmem:[#allocation6 + $0x598] sm:$0xff] }
 0x23c   :  { %5567 = vmatprep.subr.bf16.mxu0 %v12507_v61  ;;  %6918 = vmatprep.subr.bf16.mxu1 %v12510_v32  ;;  %v13941_v61 = vcombine.low %v284_v29, %v292_v14 }
 0x23d   :  { %5449 = vmatmul.mubr.bf16.gmra.mrb[28].mxu0 %v13925_v40  ;;  %6800 = vmatmul.mubr.bf16.gmra.mrb[60].mxu1 %v13769_v11  ;;  %v308_v11 = vld [vmem:[#allocation6 + $0x558] sm:$0xff] }
 0x23e   :  { %5458 = vmatprep.mubr.bf16.mxu0 %v13927_v15  ;;  %6809 = vmatprep.mubr.bf16.mxu1 %v13773_v58  ;;  %v300_v58 = vld [vmem:[#allocation6 + $0x518] sm:$0xff] }
 0x23f   :  { %5568 = vmatpush1.bf16.msra.mxu0 %v12505_v44  ;;  %6919 = vmatpush1.bf16.msra.mxu1 %v12508_v53  ;;  %v13943_v48 = vcombine.high %v300_v58, %v308_v11  ;;  %v13949_v32 = vcombine.low %v300_v58, %v308_v11 }
 0x240   :  { %5569 = vmatprep.subr.bf16.mxu0 %v12513_v8  ;;  %6920 = vmatprep.subr.bf16.mxu1 %v12516_v7 }
 0x243   :  { %5570 = vmatpush1.bf16.msra.mxu0 %v12511_v55  ;;  %6921 = vmatpush1.bf16.msra.mxu1 %v12514_v9 }
 0x244   :  { %5732 = vmatprep.subr.bf16.mxu0 %v12519_v37  ;;  %7083 = vmatprep.subr.bf16.mxu1 %v12522_v30 }
 0x245   :  { %5459 = vmatmul.mubr.bf16.gmra.mrb[32].mxu0 %v13933_v57  ;;  %6810 = vmatmul.mubr.bf16.gmra.mrb[64].mxu1 %v13785_v41  ;;  %v324_v41 = vld [vmem:[#allocation6 + $0x5d8] sm:$0xff] }
 0x246   :  { %5468 = vmatprep.mubr.bf16.mxu0 %v13935_v10  ;;  %6819 = vmatprep.mubr.bf16.mxu1 %v13789_v46  ;;  %v13951_v44 = vcombine.high %v316_v36, %v324_v41  ;;  %v332_v46 = vld [vmem:[#allocation6 + $0x618] sm:$0xff]  ;;  %v13957_v53 = vcombine.low %v316_v36, %v324_v41  ;;  %v12517_v36 = vld [vmem:[#allocation9 + $0xa00] ss:$16 sps:$4 sm:$0xff]  }
 0x24d   :  { %5469 = vmatmul.mubr.bf16.gmra.mrb[36].mxu0 %v13941_v61  ;;  %6820 = vmatmul.mubr.bf16.gmra.mrb[68].mxu1 %v13801_v45  ;;  %v340_v45 = vld [vmem:[#allocation6 + $0x658] sm:$0xff] }
 0x24e   :  { %5478 = vmatprep.mubr.bf16.mxu0 %v13943_v48  ;;  %6829 = vmatprep.mubr.bf16.mxu1 %v13805_v51  ;;  %v13959_v8 = vcombine.high %v332_v46, %v340_v45  ;;  %v348_v51 = vld [vmem:[#allocation6 + $0x698] sm:$0xff]  ;;  %v13965_v7 = vcombine.low %v332_v46, %v340_v45  ;;  %v12525_v46 = vld [vmem:[#allocation9 + $0xa24] ss:$16 sps:$4 sm:$0xff]  }
 0x24f   :  { %v12528_v45 = vld [vmem:[#allocation9 + $0x82c] ss:$16 sps:$4 sm:$0xff]  }
 0x255   :  { %5479 = vmatmul.mubr.bf16.gmra.mrb[40].mxu0 %v13949_v32  ;;  %6830 = vmatmul.mubr.bf16.gmra.mrb[72].mxu1 %v13817_v39  ;;  %v356_v39 = vld [vmem:[#allocation6 + $0x6d8] sm:$0xff] }
 0x256   :  { %5488 = vmatprep.mubr.bf16.mxu0 %v13951_v44  ;;  %6839 = vmatprep.mubr.bf16.mxu1 %v13821_v24  ;;  %v13967_v29 = vcombine.high %v348_v51, %v356_v39  ;;  %v364_v24 = vld [vmem:[#allocation6 + $0x718] sm:$0xff]  ;;  %v13973_v14 = vcombine.low %v348_v51, %v356_v39  ;;  %v173_v39 = vld [vmem:[#allocation6 + $0x120] sm:$0xff] }
 0x257   :  { %v12526_v51 = vld [vmem:[#allocation9 + $0x828] ss:$16 sps:$4 sm:$0xff]  }
 0x25d   :  { %5489 = vmatmul.mubr.bf16.gmra.mrb[44].mxu0 %v13957_v53  ;;  %6840 = vmatmul.mubr.bf16.gmra.mrb[76].mxu1 %v13829_v0  ;;  %v372_v0 = vld [vmem:[#allocation6 + $0x758] sm:$0xff] }
 0x25e   :  { %5498 = vmatprep.mubr.bf16.mxu0 %v13959_v8  ;;  %6849 = vmatprep.mubr.bf16.mxu1 %v13831_v13  ;;  %v13975_v55 = vcombine.high %v364_v24, %v372_v0  ;;  %v380_v13 = vld [vmem:[#allocation6 + $0x798] sm:$0xff]  ;;  %v13981_v9 = vcombine.low %v364_v24, %v372_v0  ;;  %v12531_v24 = vld [vmem:[#allocation9 + $0xa44] ss:$16 sps:$4 sm:$0xff]  }
 0x25f   :  { %v12534_v0 = vld [vmem:[#allocation9 + $0x84c] ss:$16 sps:$4 sm:$0xff]  }
 0x265   :  { %5499 = vmatmul.mubr.bf16.gmra.mrb[48].mxu0 %v13965_v7  ;;  %6850 = vmatmul.mubr.bf16.gmra.mrb[80].mxu1 %v13837_v56  ;;  %v388_v56 = vld [vmem:[#allocation6 + $0x7d8] sm:$0xff] }
 0x266   :  { %5508 = vmatprep.mubr.bf16.mxu0 %v13967_v29  ;;  %6859 = vmatprep.mubr.bf16.mxu1 %v13839_v34  ;;  %v13983_v37 = vcombine.high %v380_v13, %v388_v56  ;;  %v141_v34 = vld [vmem:[#allocation6 + $0x20] sm:$0xff]  ;;  %v13989_v30 = vcombine.low %v380_v13, %v388_v56 }
 0x26d   :  { %5509 = vmatmul.mubr.bf16.gmra.mrb[52].mxu0 %v13973_v14  ;;  %6860 = vmatmul.mubr.bf16.gmra.mrb[84].mxu1 %v13845_v59  ;;  %v149_v59 = vld [vmem:[#allocation6 + $0x60] sm:$0xff] }
 0x26e   :  { %5518 = vmatprep.mubr.bf16.mxu0 %v13975_v55  ;;  %6869 = vmatprep.mubr.bf16.mxu1 %v13847_v60  ;;  %v13991_v58 = vcombine.high %v141_v34, %v149_v59  ;;  %v157_v60 = vld [vmem:[#allocation6 + $0xa0] sm:$0xff]  ;;  %v13997_v11 = vcombine.low %v141_v34, %v149_v59  ;;  %v12532_v34 = vld [vmem:[#allocation9 + $0x848] ss:$16 sps:$4 sm:$0xff]  }
 0x26f   :  { %v12537_v59 = vld [vmem:[#allocation9 + $0xa64] ss:$16 sps:$4 sm:$0xff]  }
 0x275   :  { %5519 = vmatmul.mubr.bf16.gmra.mrb[56].mxu0 %v13981_v9  ;;  %6870 = vmatmul.mubr.bf16.gmra.mrb[88].mxu1 %v13853_v47  ;;  %v165_v47 = vld [vmem:[#allocation6 + $0xe0] sm:$0xff] }
 0x276   :  { %5528 = vmatprep.mubr.bf16.mxu0 %v13983_v37  ;;  %6879 = vmatprep.mubr.bf16.mxu1 %v13855_v3  ;;  %v12520_v3 = vld [vmem:[#allocation9 + $0x808] ss:$16 sps:$4 sm:$0xff]   ;;  %v13999_v41 = vcombine.high %v157_v60, %v165_v47  ;;  %v14005_v13 = vcombine.low %v157_v60, %v165_v47  ;;  %v197_v60 = vld [vmem:[#allocation6 + $0x1e0] sm:$0xff] }
 0x277   :  { %v12535_v47 = vld [vmem:[#allocation9 + $0xa60] ss:$16 sps:$4 sm:$0xff]  }
 0x27d   :  { %5529 = vmatmul.mubr.bf16.gmra.mrb[60].mxu0 %v13989_v30  ;;  %6880 = vmatmul.mubr.bf16.gmra.mrb[92].mxu1 %v13861_v33  ;;  %v12523_v33 = vld [vmem:[#allocation9 + $0xa20] ss:$16 sps:$4 sm:$0xff]  }
 0x27e   :  { %5571 = vmatprep.mubr.bf16.mxu0 %v13991_v58  ;;  %6922 = vmatprep.mubr.bf16.mxu1 %v13863_v1  ;;  %v181_v1 = vld [vmem:[#allocation6 + $0x160] sm:$0xff] }
 0x27f   :  { %v14007_v56 = vcombine.high %v173_v39, %v181_v1 }
 0x285   :  { %5572 = vmatmul.mubr.bf16.vlgmr.msra.gmra.mrb[0].mxu0 %v13997_v11  ;;  %6923 = vmatmul.mubr.bf16.vlgmr.msra.gmra.mrb[32].mxu1 %v13869_v2  ;;  %v12529_v2 = vld [vmem:[#allocation9 + $0xa40] ss:$16 sps:$4 sm:$0xff]  }
 0x286   :  { %5733 = vmatpush1.bf16.msra.mxu0 %v12517_v36  ;;  %7084 = vmatpush1.bf16.msra.mxu1 %v12520_v3  ;;  %v12540_v36 = vld [vmem:[#allocation9 + $0x86c] ss:$16 sps:$4 sm:$0xff]   ;;  %v12538_v3 = vld [vmem:[#allocation9 + $0x868] ss:$16 sps:$4 sm:$0xff]  }
 0x287   :  { %5581 = vmatprep.mubr.bf16.mxu0 %v13999_v41  ;;  %6932 = vmatprep.mubr.bf16.mxu1 %v13871_v49  ;;  %v189_v49 = vld [vmem:[#allocation6 + $0x1a0] sm:$0xff] }
 0x288   :  { %5734 = vmatprep.subr.bf16.mxu0 %v12525_v46  ;;  %7085 = vmatprep.subr.bf16.mxu1 %v12528_v45  ;;  %v12543_v46 = vld [vmem:[#allocation9 + $0xa84] ss:$16 sps:$4 sm:$0xff]   ;;  %v12546_v45 = vld [vmem:[#allocation9 + $0x88c] ss:$16 sps:$4 sm:$0xff]  }
 0x28a   :  { %5735 = vmatpush1.bf16.msra.mxu0 %v12523_v33  ;;  %7086 = vmatpush1.bf16.msra.mxu1 %v12526_v51  ;;  %v14013_v33 = vcombine.low %v173_v39, %v181_v1  ;;  %v14015_v51 = vcombine.high %v189_v49, %v197_v60  ;;  %v205_v39 = vld [vmem:[#allocation6 + $0x220] sm:$0xff] }
 0x28b   :  { %5736 = vmatprep.subr.bf16.mxu0 %v12531_v24  ;;  %7087 = vmatprep.subr.bf16.mxu1 %v12534_v0  ;;  %v12544_v24 = vld [vmem:[#allocation9 + $0x888] ss:$16 sps:$4 sm:$0xff]   ;;  %v12552_v0 = vld [vmem:[#allocation9 + $0x8ac] ss:$16 sps:$4 sm:$0xff]   ;;  %v213_v1 = vld [vmem:[#allocation6 + $0x260] sm:$0xff] }
 0x28d   :  { %5582 = vmatmul.mubr.bf16.gmra.mrb[4].mxu0 %v14005_v13  ;;  %6933 = vmatmul.mubr.bf16.gmra.mrb[36].mxu1 %v13877_v42  ;;  %v12541_v42 = vld [vmem:[#allocation9 + $0xa80] ss:$16 sps:$4 sm:$0xff]  }
 0x28e   :  { %5591 = vmatprep.mubr.bf16.mxu0 %v14007_v56  ;;  %6942 = vmatprep.mubr.bf16.mxu1 %v13879_v35  ;;  %v12549_v35 = vld [vmem:[#allocation9 + $0xaa4] ss:$16 sps:$4 sm:$0xff]  }
 0x28f   :  { %5737 = vmatpush1.bf16.msra.mxu0 %v12529_v2  ;;  %7088 = vmatpush1.bf16.msra.mxu1 %v12532_v34  ;;  %v12547_v2 = vld [vmem:[#allocation9 + $0xaa0] ss:$16 sps:$4 sm:$0xff]   ;;  %v12550_v34 = vld [vmem:[#allocation9 + $0x8a8] ss:$16 sps:$4 sm:$0xff]  }
 0x290   :  { %5738 = vmatprep.subr.bf16.mxu0 %v12537_v59  ;;  %7089 = vmatprep.subr.bf16.mxu1 %v12540_v36  ;;  %v12555_v59 = vld [vmem:[#allocation9 + $0xac4] ss:$16 sps:$4 sm:$0xff]   ;;  %v12558_v36 = vld [vmem:[#allocation9 + $0x8cc] ss:$16 sps:$4 sm:$0xff]  }
 0x293   :  { %5739 = vmatpush1.bf16.msra.mxu0 %v12535_v47  ;;  %7090 = vmatpush1.bf16.msra.mxu1 %v12538_v3  ;;  %v14021_v47 = vcombine.low %v189_v49, %v197_v60  ;;  %v14023_v3 = vcombine.high %v205_v39, %v213_v1  ;;  %v221_v49 = vld [vmem:[#allocation6 + $0x2a0] sm:$0xff] }
 0x294   :  { %5740 = vmatprep.subr.bf16.mxu0 %v12543_v46  ;;  %7091 = vmatprep.subr.bf16.mxu1 %v12546_v45  ;;  %v12556_v46 = vld [vmem:[#allocation9 + $0x8c8] ss:$16 sps:$4 sm:$0xff]   ;;  %v12564_v45 = vld [vmem:[#allocation9 + $0x8ec] ss:$16 sps:$4 sm:$0xff]   ;;  %v229_v60 = vld [vmem:[#allocation6 + $0x2e0] sm:$0xff] }
 0x295   :  { %5592 = vmatmul.mubr.bf16.gmra.mrb[8].mxu0 %v14013_v33  ;;  %6943 = vmatmul.mubr.bf16.gmra.mrb[40].mxu1 %v13885_v25  ;;  %v12553_v25 = vld [vmem:[#allocation9 + $0xac0] ss:$16 sps:$4 sm:$0xff]  }
 0x296   :  { %5601 = vmatprep.mubr.bf16.mxu0 %v14015_v51  ;;  %6952 = vmatprep.mubr.bf16.mxu1 %v13887_v19  ;;  %v12561_v19 = vld [vmem:[#allocation9 + $0xae4] ss:$16 sps:$4 sm:$0xff]  }
 0x297   :  { %5741 = vmatpush1.bf16.msra.mxu0 %v12541_v42  ;;  %7092 = vmatpush1.bf16.msra.mxu1 %v12544_v24  ;;  %v12559_v42 = vld [vmem:[#allocation9 + $0xae0] ss:$16 sps:$4 sm:$0xff]   ;;  %v12562_v24 = vld [vmem:[#allocation9 + $0x8e8] ss:$16 sps:$4 sm:$0xff]  }
 0x298   :  { %5742 = vmatprep.subr.bf16.mxu0 %v12549_v35  ;;  %7093 = vmatprep.subr.bf16.mxu1 %v12552_v0  ;;  %v12567_v35 = vld [vmem:[#allocation9 + $0xb04] ss:$16 sps:$4 sm:$0xff]   ;;  %v12570_v0 = vld [vmem:[#allocation9 + $0x90c] ss:$16 sps:$4 sm:$0xff]  }
 0x29b   :  { %5743 = vmatpush1.bf16.msra.mxu0 %v12547_v2  ;;  %7094 = vmatpush1.bf16.msra.mxu1 %v12550_v34  ;;  %v14029_v2 = vcombine.low %v205_v39, %v213_v1  ;;  %v14031_v34 = vcombine.high %v221_v49, %v229_v60  ;;  %v237_v39 = vld [vmem:[#allocation6 + $0x320] sm:$0xff] }
 0x29c   :  { %5744 = vmatprep.subr.bf16.mxu0 %v12555_v59  ;;  %7095 = vmatprep.subr.bf16.mxu1 %v12558_v36  ;;  %v12568_v59 = vld [vmem:[#allocation9 + $0x908] ss:$16 sps:$4 sm:$0xff]   ;;  %v12576_v36 = vld [vmem:[#allocation9 + $0x92c] ss:$16 sps:$4 sm:$0xff]   ;;  %v245_v1 = vld [vmem:[#allocation6 + $0x360] sm:$0xff] }
 0x29d   :  { %5602 = vmatmul.mubr.bf16.gmra.mrb[12].mxu0 %v14021_v47  ;;  %6953 = vmatmul.mubr.bf16.gmra.mrb[44].mxu1 %v13893_v21  ;;  %v12565_v21 = vld [vmem:[#allocation9 + $0xb00] ss:$16 sps:$4 sm:$0xff]  }
 0x29e   :  { %5611 = vmatprep.mubr.bf16.mxu0 %v14023_v3  ;;  %6962 = vmatprep.mubr.bf16.mxu1 %v13895_v6  ;;  %v12573_v6 = vld [vmem:[#allocation9 + $0xb24] ss:$16 sps:$4 sm:$0xff]  }
 0x29f   :  { %5745 = vmatpush1.bf16.msra.mxu0 %v12553_v25  ;;  %7096 = vmatpush1.bf16.msra.mxu1 %v12556_v46  ;;  %v12571_v25 = vld [vmem:[#allocation9 + $0xb20] ss:$16 sps:$4 sm:$0xff]   ;;  %v12574_v46 = vld [vmem:[#allocation9 + $0x928] ss:$16 sps:$4 sm:$0xff]  }
 0x2a0   :  { %5746 = vmatprep.subr.bf16.mxu0 %v12561_v19  ;;  %7097 = vmatprep.subr.bf16.mxu1 %v12564_v45  ;;  %v12579_v19 = vld [vmem:[#allocation9 + $0xb44] ss:$16 sps:$4 sm:$0xff]   ;;  %v12582_v45 = vld [vmem:[#allocation9 + $0x94c] ss:$16 sps:$4 sm:$0xff]  }
 0x2a3   :  { %5747 = vmatpush1.bf16.msra.mxu0 %v12559_v42  ;;  %7098 = vmatpush1.bf16.msra.mxu1 %v12562_v24  ;;  %v14037_v42 = vcombine.low %v221_v49, %v229_v60  ;;  %v14039_v24 = vcombine.high %v237_v39, %v245_v1  ;;  %v253_v49 = vld [vmem:[#allocation6 + $0x3a0] sm:$0xff] }
 0x2a4   :  { %5748 = vmatprep.subr.bf16.mxu0 %v12567_v35  ;;  %7099 = vmatprep.subr.bf16.mxu1 %v12570_v0  ;;  %v12580_v35 = vld [vmem:[#allocation9 + $0x948] ss:$16 sps:$4 sm:$0xff]   ;;  %v12588_v0 = vld [vmem:[#allocation9 + $0x96c] ss:$16 sps:$4 sm:$0xff]   ;;  %v261_v60 = vld [vmem:[#allocation6 + $0x3e0] sm:$0xff] }
 0x2a5   :  { %5612 = vmatmul.mubr.bf16.gmra.mrb[16].mxu0 %v14029_v2  ;;  %6963 = vmatmul.mubr.bf16.gmra.mrb[48].mxu1 %v13901_v16  ;;  %v12577_v16 = vld [vmem:[#allocation9 + $0xb40] ss:$16 sps:$4 sm:$0xff]  }
 0x2a6   :  { %5621 = vmatprep.mubr.bf16.mxu0 %v14031_v34  ;;  %6972 = vmatprep.mubr.bf16.mxu1 %v13903_v5  ;;  %v12585_v5 = vld [vmem:[#allocation9 + $0xb64] ss:$16 sps:$4 sm:$0xff]  }
 0x2a7   :  { %5749 = vmatpush1.bf16.msra.mxu0 %v12565_v21  ;;  %7100 = vmatpush1.bf16.msra.mxu1 %v12568_v59  ;;  %v12583_v21 = vld [vmem:[#allocation9 + $0xb60] ss:$16 sps:$4 sm:$0xff]   ;;  %v12586_v59 = vld [vmem:[#allocation9 + $0x968] ss:$16 sps:$4 sm:$0xff]  }
 0x2a8   :  { %5750 = vmatprep.subr.bf16.mxu0 %v12573_v6  ;;  %7101 = vmatprep.subr.bf16.mxu1 %v12576_v36  ;;  %v12591_v6 = vld [vmem:[#allocation9 + $0xb84] ss:$16 sps:$4 sm:$0xff]   ;;  %v12594_v36 = vld [vmem:[#allocation9 + $0x98c] ss:$16 sps:$4 sm:$0xff]  }
 0x2ab   :  { %5751 = vmatpush1.bf16.msra.mxu0 %v12571_v25  ;;  %7102 = vmatpush1.bf16.msra.mxu1 %v12574_v46  ;;  %v14045_v25 = vcombine.low %v237_v39, %v245_v1  ;;  %v14047_v46 = vcombine.high %v253_v49, %v261_v60  ;;  %v269_v39 = vld [vmem:[#allocation6 + $0x420] sm:$0xff] }
 0x2ac   :  { %5752 = vmatprep.subr.bf16.mxu0 %v12579_v19  ;;  %7103 = vmatprep.subr.bf16.mxu1 %v12582_v45  ;;  %v12592_v19 = vld [vmem:[#allocation9 + $0x988] ss:$16 sps:$4 sm:$0xff]   ;;  %v12600_v45 = vld [vmem:[#allocation9 + $0x9ac] ss:$16 sps:$4 sm:$0xff]   ;;  %v277_v1 = vld [vmem:[#allocation6 + $0x460] sm:$0xff] }
 0x2ad   :  { %5622 = vmatmul.mubr.bf16.gmra.mrb[20].mxu0 %v14037_v42  ;;  %6973 = vmatmul.mubr.bf16.gmra.mrb[52].mxu1 %v13909_v43  ;;  %v12589_v43 = vld [vmem:[#allocation9 + $0xb80] ss:$16 sps:$4 sm:$0xff]  }
 0x2ae   :  { %5631 = vmatprep.mubr.bf16.mxu0 %v14039_v24  ;;  %6982 = vmatprep.mubr.bf16.mxu1 %v13911_v12  ;;  %v12597_v12 = vld [vmem:[#allocation9 + $0xba4] ss:$16 sps:$4 sm:$0xff]  }
 0x2af   :  { %5753 = vmatpush1.bf16.msra.mxu0 %v12577_v16  ;;  %7104 = vmatpush1.bf16.msra.mxu1 %v12580_v35  ;;  %v12595_v16 = vld [vmem:[#allocation9 + $0xba0] ss:$16 sps:$4 sm:$0xff]   ;;  %v12598_v35 = vld [vmem:[#allocation9 + $0x9a8] ss:$16 sps:$4 sm:$0xff]  }
 0x2b0   :  { %5754 = vmatprep.subr.bf16.mxu0 %v12585_v5  ;;  %7105 = vmatprep.subr.bf16.mxu1 %v12588_v0  ;;  %v12603_v5 = vld [vmem:[#allocation9 + $0xbc4] ss:$16 sps:$4 sm:$0xff]   ;;  %v12606_v0 = vld [vmem:[#allocation9 + $0x9cc] ss:$16 sps:$4 sm:$0xff]  }
 0x2b3   :  { %5755 = vmatpush1.bf16.msra.mxu0 %v12583_v21  ;;  %7106 = vmatpush1.bf16.msra.mxu1 %v12586_v59  ;;  %v14053_v21 = vcombine.low %v253_v49, %v261_v60  ;;  %v14055_v59 = vcombine.high %v269_v39, %v277_v1  ;;  %v285_v49 = vld [vmem:[#allocation6 + $0x4a0] sm:$0xff] }
 0x2b4   :  { %5756 = vmatprep.subr.bf16.mxu0 %v12591_v6  ;;  %7107 = vmatprep.subr.bf16.mxu1 %v12594_v36  ;;  %v12604_v6 = vld [vmem:[#allocation9 + $0x9c8] ss:$16 sps:$4 sm:$0xff]   ;;  %v12612_v36 = vld [vmem:[#allocation9 + $0x9ec] ss:$16 sps:$4 sm:$0xff]   ;;  %v293_v60 = vld [vmem:[#allocation6 + $0x4e0] sm:$0xff] }
 0x2b5   :  { %5632 = vmatmul.mubr.bf16.gmra.mrb[24].mxu0 %v14045_v25  ;;  %6983 = vmatmul.mubr.bf16.gmra.mrb[56].mxu1 %v13917_v38  ;;  %v12601_v38 = vld [vmem:[#allocation9 + $0xbc0] ss:$16 sps:$4 sm:$0xff]  }
 0x2b6   :  { %5641 = vmatprep.mubr.bf16.mxu0 %v14047_v46  ;;  %6992 = vmatprep.mubr.bf16.mxu1 %v13919_v4  ;;  %v12609_v4 = vld [vmem:[#allocation9 + $0xbe4] ss:$16 sps:$4 sm:$0xff]  }
 0x2b7   :  { %5757 = vmatpush1.bf16.msra.mxu0 %v12589_v43  ;;  %7108 = vmatpush1.bf16.msra.mxu1 %v12592_v19  ;;  %v12607_v43 = vld [vmem:[#allocation9 + $0xbe0] ss:$16 sps:$4 sm:$0xff]   ;;  %v12610_v19 = vld [vmem:[#allocation9 + $0x9e8] ss:$16 sps:$4 sm:$0xff]  }
 0x2b8   :  { %5758 = vmatprep.subr.bf16.mxu0 %v12597_v12  ;;  %7109 = vmatprep.subr.bf16.mxu1 %v12600_v45  ;;  %v12615_v12 = vld [vmem:[#allocation9 + $0xc04] ss:$16 sps:$4 sm:$0xff]   ;;  %v12618_v45 = vld [vmem:[#allocation9 + $0xa0c] ss:$16 sps:$4 sm:$0xff]  }
 0x2bb   :  { %5759 = vmatpush1.bf16.msra.mxu0 %v12595_v16  ;;  %7110 = vmatpush1.bf16.msra.mxu1 %v12598_v35  ;;  %v14061_v16 = vcombine.low %v269_v39, %v277_v1  ;;  %v14063_v35 = vcombine.high %v285_v49, %v293_v60  ;;  %v317_v1 = vld [vmem:[#allocation6 + $0x5a0] sm:$0xff] }
 0x2bc   :  { %5760 = vmatprep.subr.bf16.mxu0 %v12603_v5  ;;  %7111 = vmatprep.subr.bf16.mxu1 %v12606_v0  ;;  %v14069_v5 = vcombine.low %v285_v49, %v293_v60 }
 0x2bd   :  { %5642 = vmatmul.mubr.bf16.gmra.mrb[28].mxu0 %v14053_v21  ;;  %6993 = vmatmul.mubr.bf16.gmra.mrb[60].mxu1 %v13925_v40  ;;  %v301_v40 = vld [vmem:[#allocation6 + $0x520] sm:$0xff] }
 0x2be   :  { %5651 = vmatprep.mubr.bf16.mxu0 %v14055_v59  ;;  %7002 = vmatprep.mubr.bf16.mxu1 %v13927_v15  ;;  %v309_v15 = vld [vmem:[#allocation6 + $0x560] sm:$0xff] }
 0x2bf   :  { %5761 = vmatpush1.bf16.msra.mxu0 %v12601_v38  ;;  %7112 = vmatpush1.bf16.msra.mxu1 %v12604_v6  ;;  %v14071_v39 = vcombine.high %v301_v40, %v309_v15  ;;  %v14077_v0 = vcombine.low %v301_v40, %v309_v15 }
 0x2c0   :  { %5762 = vmatprep.subr.bf16.mxu0 %v12609_v4  ;;  %7113 = vmatprep.subr.bf16.mxu1 %v12612_v36 }
 0x2c3   :  { %5763 = vmatpush1.bf16.msra.mxu0 %v12607_v43  ;;  %7114 = vmatpush1.bf16.msra.mxu1 %v12610_v19 }
 0x2c4   :  { %5925 = vmatprep.subr.bf16.mxu0 %v12615_v12  ;;  %7276 = vmatprep.subr.bf16.mxu1 %v12618_v45 }
 0x2c5   :  { %5652 = vmatmul.mubr.bf16.gmra.mrb[32].mxu0 %v14061_v16  ;;  %7003 = vmatmul.mubr.bf16.gmra.mrb[64].mxu1 %v13933_v57  ;;  %v325_v57 = vld [vmem:[#allocation6 + $0x5e0] sm:$0xff] }
 0x2c6   :  { %5661 = vmatprep.mubr.bf16.mxu0 %v14063_v35  ;;  %7012 = vmatprep.mubr.bf16.mxu1 %v13935_v10  ;;  %v14079_v38 = vcombine.high %v317_v1, %v325_v57  ;;  %v333_v10 = vld [vmem:[#allocation6 + $0x620] sm:$0xff]  ;;  %v14085_v6 = vcombine.low %v317_v1, %v325_v57 }
 0x2c7   :  { %v12613_v1 = vld [vmem:[#allocation9 + $0xc00] ss:$16 sps:$4 sm:$0xff]  }
 0x2cd   :  { %5662 = vmatmul.mubr.bf16.gmra.mrb[36].mxu0 %v14069_v5  ;;  %7013 = vmatmul.mubr.bf16.gmra.mrb[68].mxu1 %v13941_v61  ;;  %v341_v61 = vld [vmem:[#allocation6 + $0x660] sm:$0xff] }
 0x2ce   :  { %5671 = vmatprep.mubr.bf16.mxu0 %v14071_v39  ;;  %7022 = vmatprep.mubr.bf16.mxu1 %v13943_v48  ;;  %v14087_v4 = vcombine.high %v333_v10, %v341_v61  ;;  %v349_v48 = vld [vmem:[#allocation6 + $0x6a0] sm:$0xff]  ;;  %v14093_v36 = vcombine.low %v333_v10, %v341_v61  ;;  %v12624_v61 = vld [vmem:[#allocation9 + $0xa2c] ss:$16 sps:$4 sm:$0xff]  }
 0x2cf   :  { %v12621_v10 = vld [vmem:[#allocation9 + $0xc24] ss:$16 sps:$4 sm:$0xff]  }
 0x2d5   :  { %5672 = vmatmul.mubr.bf16.gmra.mrb[40].mxu0 %v14077_v0  ;;  %7023 = vmatmul.mubr.bf16.gmra.mrb[72].mxu1 %v13949_v32  ;;  %v357_v32 = vld [vmem:[#allocation6 + $0x6e0] sm:$0xff] }
 0x2d6   :  { %5681 = vmatprep.mubr.bf16.mxu0 %v14079_v38  ;;  %7032 = vmatprep.mubr.bf16.mxu1 %v13951_v44  ;;  %v14095_v49 = vcombine.high %v349_v48, %v357_v32  ;;  %v365_v44 = vld [vmem:[#allocation6 + $0x720] sm:$0xff]  ;;  %v14101_v60 = vcombine.low %v349_v48, %v357_v32  ;;  %v12622_v48 = vld [vmem:[#allocation9 + $0xa28] ss:$16 sps:$4 sm:$0xff]  }
 0x2d7   :  { %v174_v32 = vld [vmem:[#allocation6 + $0x128] sm:$0xff] }
 0x2dd   :  { %5682 = vmatmul.mubr.bf16.gmra.mrb[44].mxu0 %v14085_v6  ;;  %7033 = vmatmul.mubr.bf16.gmra.mrb[76].mxu1 %v13957_v53  ;;  %v373_v53 = vld [vmem:[#allocation6 + $0x760] sm:$0xff] }
 0x2de   :  { %5691 = vmatprep.mubr.bf16.mxu0 %v14087_v4  ;;  %7042 = vmatprep.mubr.bf16.mxu1 %v13959_v8  ;;  %v14103_v43 = vcombine.high %v365_v44, %v373_v53  ;;  %v381_v8 = vld [vmem:[#allocation6 + $0x7a0] sm:$0xff]  ;;  %v14109_v19 = vcombine.low %v365_v44, %v373_v53  ;;  %v12630_v53 = vld [vmem:[#allocation9 + $0xa4c] ss:$16 sps:$4 sm:$0xff]  }
 0x2df   :  { %v12627_v44 = vld [vmem:[#allocation9 + $0xc44] ss:$16 sps:$4 sm:$0xff]  }
 0x2e5   :  { %5692 = vmatmul.mubr.bf16.gmra.mrb[48].mxu0 %v14093_v36  ;;  %7043 = vmatmul.mubr.bf16.gmra.mrb[80].mxu1 %v13965_v7  ;;  %v389_v7 = vld [vmem:[#allocation6 + $0x7e0] sm:$0xff] }
 0x2e6   :  { %5701 = vmatprep.mubr.bf16.mxu0 %v14095_v49  ;;  %7052 = vmatprep.mubr.bf16.mxu1 %v13967_v29  ;;  %v14111_v12 = vcombine.high %v381_v8, %v389_v7  ;;  %v142_v29 = vld [vmem:[#allocation6 + $0x28] sm:$0xff]  ;;  %v14117_v45 = vcombine.low %v381_v8, %v389_v7 }
 0x2ed   :  { %5702 = vmatmul.mubr.bf16.gmra.mrb[52].mxu0 %v14101_v60  ;;  %7053 = vmatmul.mubr.bf16.gmra.mrb[84].mxu1 %v13973_v14  ;;  %v150_v14 = vld [vmem:[#allocation6 + $0x68] sm:$0xff] }
 0x2ee   :  { %5711 = vmatprep.mubr.bf16.mxu0 %v14103_v43  ;;  %7062 = vmatprep.mubr.bf16.mxu1 %v13975_v55  ;;  %v14119_v40 = vcombine.high %v142_v29, %v150_v14  ;;  %v158_v55 = vld [vmem:[#allocation6 + $0xa8] sm:$0xff]  ;;  %v14125_v15 = vcombine.low %v142_v29, %v150_v14  ;;  %v12633_v14 = vld [vmem:[#allocation9 + $0xc64] ss:$16 sps:$4 sm:$0xff]  }
 0x2ef   :  { %v12628_v29 = vld [vmem:[#allocation9 + $0xa48] ss:$16 sps:$4 sm:$0xff]  }
 0x2f5   :  { %5712 = vmatmul.mubr.bf16.gmra.mrb[56].mxu0 %v14109_v19  ;;  %7063 = vmatmul.mubr.bf16.gmra.mrb[88].mxu1 %v13981_v9  ;;  %v166_v9 = vld [vmem:[#allocation6 + $0xe8] sm:$0xff] }
 0x2f6   :  { %5721 = vmatprep.mubr.bf16.mxu0 %v14111_v12  ;;  %7072 = vmatprep.mubr.bf16.mxu1 %v13983_v37  ;;  %v12616_v37 = vld [vmem:[#allocation9 + $0xa08] ss:$16 sps:$4 sm:$0xff]   ;;  %v14127_v57 = vcombine.high %v158_v55, %v166_v9  ;;  %v14133_v8 = vcombine.low %v158_v55, %v166_v9  ;;  %v12631_v9 = vld [vmem:[#allocation9 + $0xc60] ss:$16 sps:$4 sm:$0xff]  }
 0x2f7   :  { %v198_v55 = vld [vmem:[#allocation6 + $0x1e8] sm:$0xff] }
 0x2fd   :  { %5722 = vmatmul.mubr.bf16.gmra.mrb[60].mxu0 %v14117_v45  ;;  %7073 = vmatmul.mubr.bf16.gmra.mrb[92].mxu1 %v13989_v30  ;;  %v12619_v30 = vld [vmem:[#allocation9 + $0xc20] ss:$16 sps:$4 sm:$0xff]  }
 0x2fe   :  { %5764 = vmatprep.mubr.bf16.mxu0 %v14119_v40  ;;  %7115 = vmatprep.mubr.bf16.mxu1 %v13991_v58  ;;  %v182_v58 = vld [vmem:[#allocation6 + $0x168] sm:$0xff] }
 0x2ff   :  { %v14135_v7 = vcombine.high %v174_v32, %v182_v58 }
 0x305   :  { %5765 = vmatmul.mubr.bf16.vlgmr.msra.gmra.mrb[0].mxu0 %v14125_v15  ;;  %7116 = vmatmul.mubr.bf16.vlgmr.msra.gmra.mrb[32].mxu1 %v13997_v11  ;;  %v12625_v11 = vld [vmem:[#allocation9 + $0xc40] ss:$16 sps:$4 sm:$0xff]  }
 0x306   :  { %5926 = vmatpush1.bf16.msra.mxu0 %v12613_v1  ;;  %7277 = vmatpush1.bf16.msra.mxu1 %v12616_v37  ;;  %v12636_v1 = vld [vmem:[#allocation9 + $0xa6c] ss:$16 sps:$4 sm:$0xff]   ;;  %v12634_v37 = vld [vmem:[#allocation9 + $0xa68] ss:$16 sps:$4 sm:$0xff]  }
 0x307   :  { %5774 = vmatprep.mubr.bf16.mxu0 %v14127_v57  ;;  %7125 = vmatprep.mubr.bf16.mxu1 %v13999_v41  ;;  %v190_v41 = vld [vmem:[#allocation6 + $0x1a8] sm:$0xff] }
 0x308   :  { %5927 = vmatprep.subr.bf16.mxu0 %v12621_v10  ;;  %7278 = vmatprep.subr.bf16.mxu1 %v12624_v61  ;;  %v12639_v10 = vld [vmem:[#allocation9 + $0xc84] ss:$16 sps:$4 sm:$0xff]   ;;  %v12642_v61 = vld [vmem:[#allocation9 + $0xa8c] ss:$16 sps:$4 sm:$0xff]  }
 0x30a   :  { %5928 = vmatpush1.bf16.msra.mxu0 %v12619_v30  ;;  %7279 = vmatpush1.bf16.msra.mxu1 %v12622_v48  ;;  %v14141_v30 = vcombine.low %v174_v32, %v182_v58  ;;  %v14143_v48 = vcombine.high %v190_v41, %v198_v55  ;;  %v206_v32 = vld [vmem:[#allocation6 + $0x228] sm:$0xff] }
 0x30b   :  { %5929 = vmatprep.subr.bf16.mxu0 %v12627_v44  ;;  %7280 = vmatprep.subr.bf16.mxu1 %v12630_v53  ;;  %v12640_v44 = vld [vmem:[#allocation9 + $0xa88] ss:$16 sps:$4 sm:$0xff]   ;;  %v12648_v53 = vld [vmem:[#allocation9 + $0xaac] ss:$16 sps:$4 sm:$0xff]  }
 0x30c   :  { %v214_v58 = vld [vmem:[#allocation6 + $0x268] sm:$0xff] }
 0x30d   :  { %5775 = vmatmul.mubr.bf16.gmra.mrb[4].mxu0 %v14133_v8  ;;  %7126 = vmatmul.mubr.bf16.gmra.mrb[36].mxu1 %v14005_v13  ;;  %v12637_v13 = vld [vmem:[#allocation9 + $0xc80] ss:$16 sps:$4 sm:$0xff]  }
 0x30e   :  { %5784 = vmatprep.mubr.bf16.mxu0 %v14135_v7  ;;  %7135 = vmatprep.mubr.bf16.mxu1 %v14007_v56  ;;  %v12645_v56 = vld [vmem:[#allocation9 + $0xca4] ss:$16 sps:$4 sm:$0xff]  }
 0x30f   :  { %5930 = vmatpush1.bf16.msra.mxu0 %v12625_v11  ;;  %7281 = vmatpush1.bf16.msra.mxu1 %v12628_v29  ;;  %v12643_v11 = vld [vmem:[#allocation9 + $0xca0] ss:$16 sps:$4 sm:$0xff]   ;;  %v12646_v29 = vld [vmem:[#allocation9 + $0xaa8] ss:$16 sps:$4 sm:$0xff]  }
 0x310   :  { %5931 = vmatprep.subr.bf16.mxu0 %v12633_v14  ;;  %7282 = vmatprep.subr.bf16.mxu1 %v12636_v1  ;;  %v12651_v14 = vld [vmem:[#allocation9 + $0xcc4] ss:$16 sps:$4 sm:$0xff]   ;;  %v12654_v1 = vld [vmem:[#allocation9 + $0xacc] ss:$16 sps:$4 sm:$0xff]  }
 0x313   :  { %5932 = vmatpush1.bf16.msra.mxu0 %v12631_v9  ;;  %7283 = vmatpush1.bf16.msra.mxu1 %v12634_v37  ;;  %v14149_v9 = vcombine.low %v190_v41, %v198_v55  ;;  %v14151_v37 = vcombine.high %v206_v32, %v214_v58  ;;  %v222_v41 = vld [vmem:[#allocation6 + $0x2a8] sm:$0xff] }
 0x314   :  { %5933 = vmatprep.subr.bf16.mxu0 %v12639_v10  ;;  %7284 = vmatprep.subr.bf16.mxu1 %v12642_v61  ;;  %v12652_v10 = vld [vmem:[#allocation9 + $0xac8] ss:$16 sps:$4 sm:$0xff]   ;;  %v12660_v61 = vld [vmem:[#allocation9 + $0xaec] ss:$16 sps:$4 sm:$0xff]  }
 0x315   :  { %5785 = vmatmul.mubr.bf16.gmra.mrb[8].mxu0 %v14141_v30  ;;  %7136 = vmatmul.mubr.bf16.gmra.mrb[40].mxu1 %v14013_v33  ;;  %v12649_v33 = vld [vmem:[#allocation9 + $0xcc0] ss:$16 sps:$4 sm:$0xff]   ;;  %v230_v55 = vld [vmem:[#allocation6 + $0x2e8] sm:$0xff] }
 0x316   :  { %5794 = vmatprep.mubr.bf16.mxu0 %v14143_v48  ;;  %7145 = vmatprep.mubr.bf16.mxu1 %v14015_v51  ;;  %v12657_v51 = vld [vmem:[#allocation9 + $0xce4] ss:$16 sps:$4 sm:$0xff]  }
 0x317   :  { %5934 = vmatpush1.bf16.msra.mxu0 %v12637_v13  ;;  %7285 = vmatpush1.bf16.msra.mxu1 %v12640_v44  ;;  %v12655_v13 = vld [vmem:[#allocation9 + $0xce0] ss:$16 sps:$4 sm:$0xff]   ;;  %v12658_v44 = vld [vmem:[#allocation9 + $0xae8] ss:$16 sps:$4 sm:$0xff]  }
 0x318   :  { %5935 = vmatprep.subr.bf16.mxu0 %v12645_v56  ;;  %7286 = vmatprep.subr.bf16.mxu1 %v12648_v53  ;;  %v12663_v56 = vld [vmem:[#allocation9 + $0xd04] ss:$16 sps:$4 sm:$0xff]   ;;  %v12666_v53 = vld [vmem:[#allocation9 + $0xb0c] ss:$16 sps:$4 sm:$0xff]  }
 0x31b   :  { %5936 = vmatpush1.bf16.msra.mxu0 %v12643_v11  ;;  %7287 = vmatpush1.bf16.msra.mxu1 %v12646_v29  ;;  %v14157_v11 = vcombine.low %v206_v32, %v214_v58  ;;  %v14159_v29 = vcombine.high %v222_v41, %v230_v55  ;;  %v238_v32 = vld [vmem:[#allocation6 + $0x328] sm:$0xff] }
 0x31c   :  { %5937 = vmatprep.subr.bf16.mxu0 %v12651_v14  ;;  %7288 = vmatprep.subr.bf16.mxu1 %v12654_v1  ;;  %v12664_v14 = vld [vmem:[#allocation9 + $0xb08] ss:$16 sps:$4 sm:$0xff]   ;;  %v12672_v1 = vld [vmem:[#allocation9 + $0xb2c] ss:$16 sps:$4 sm:$0xff]  }
 0x31d   :  { %5795 = vmatmul.mubr.bf16.gmra.mrb[12].mxu0 %v14149_v9  ;;  %7146 = vmatmul.mubr.bf16.gmra.mrb[44].mxu1 %v14021_v47  ;;  %v12661_v47 = vld [vmem:[#allocation9 + $0xd00] ss:$16 sps:$4 sm:$0xff]   ;;  %v246_v58 = vld [vmem:[#allocation6 + $0x368] sm:$0xff] }
 0x31e   :  { %5804 = vmatprep.mubr.bf16.mxu0 %v14151_v37  ;;  %7155 = vmatprep.mubr.bf16.mxu1 %v14023_v3  ;;  %v12669_v3 = vld [vmem:[#allocation9 + $0xd24] ss:$16 sps:$4 sm:$0xff]  }
 0x31f   :  { %5938 = vmatpush1.bf16.msra.mxu0 %v12649_v33  ;;  %7289 = vmatpush1.bf16.msra.mxu1 %v12652_v10  ;;  %v12667_v33 = vld [vmem:[#allocation9 + $0xd20] ss:$16 sps:$4 sm:$0xff]   ;;  %v12670_v10 = vld [vmem:[#allocation9 + $0xb28] ss:$16 sps:$4 sm:$0xff]  }
 0x320   :  { %5939 = vmatprep.subr.bf16.mxu0 %v12657_v51  ;;  %7290 = vmatprep.subr.bf16.mxu1 %v12660_v61  ;;  %v12675_v51 = vld [vmem:[#allocation9 + $0xd44] ss:$16 sps:$4 sm:$0xff]   ;;  %v12678_v61 = vld [vmem:[#allocation9 + $0xb4c] ss:$16 sps:$4 sm:$0xff]  }
 0x323   :  { %5940 = vmatpush1.bf16.msra.mxu0 %v12655_v13  ;;  %7291 = vmatpush1.bf16.msra.mxu1 %v12658_v44  ;;  %v14165_v13 = vcombine.low %v222_v41, %v230_v55  ;;  %v14167_v44 = vcombine.high %v238_v32, %v246_v58  ;;  %v254_v41 = vld [vmem:[#allocation6 + $0x3a8] sm:$0xff] }
 0x324   :  { %5941 = vmatprep.subr.bf16.mxu0 %v12663_v56  ;;  %7292 = vmatprep.subr.bf16.mxu1 %v12666_v53  ;;  %v12676_v56 = vld [vmem:[#allocation9 + $0xb48] ss:$16 sps:$4 sm:$0xff]   ;;  %v12684_v53 = vld [vmem:[#allocation9 + $0xb6c] ss:$16 sps:$4 sm:$0xff]  }
 0x325   :  { %5805 = vmatmul.mubr.bf16.gmra.mrb[16].mxu0 %v14157_v11  ;;  %7156 = vmatmul.mubr.bf16.gmra.mrb[48].mxu1 %v14029_v2  ;;  %v12673_v2 = vld [vmem:[#allocation9 + $0xd40] ss:$16 sps:$4 sm:$0xff]   ;;  %v262_v55 = vld [vmem:[#allocation6 + $0x3e8] sm:$0xff] }
 0x326   :  { %5814 = vmatprep.mubr.bf16.mxu0 %v14159_v29  ;;  %7165 = vmatprep.mubr.bf16.mxu1 %v14031_v34  ;;  %v12681_v34 = vld [vmem:[#allocation9 + $0xd64] ss:$16 sps:$4 sm:$0xff]  }
 0x327   :  { %5942 = vmatpush1.bf16.msra.mxu0 %v12661_v47  ;;  %7293 = vmatpush1.bf16.msra.mxu1 %v12664_v14  ;;  %v12679_v47 = vld [vmem:[#allocation9 + $0xd60] ss:$16 sps:$4 sm:$0xff]   ;;  %v12682_v14 = vld [vmem:[#allocation9 + $0xb68] ss:$16 sps:$4 sm:$0xff]  }
 0x328   :  { %5943 = vmatprep.subr.bf16.mxu0 %v12669_v3  ;;  %7294 = vmatprep.subr.bf16.mxu1 %v12672_v1  ;;  %v12687_v3 = vld [vmem:[#allocation9 + $0xd84] ss:$16 sps:$4 sm:$0xff]   ;;  %v12690_v1 = vld [vmem:[#allocation9 + $0xb8c] ss:$16 sps:$4 sm:$0xff]  }
 0x32b   :  { %5944 = vmatpush1.bf16.msra.mxu0 %v12667_v33  ;;  %7295 = vmatpush1.bf16.msra.mxu1 %v12670_v10  ;;  %v14173_v33 = vcombine.low %v238_v32, %v246_v58  ;;  %v14175_v10 = vcombine.high %v254_v41, %v262_v55  ;;  %v270_v32 = vld [vmem:[#allocation6 + $0x428] sm:$0xff] }
 0x32c   :  { %5945 = vmatprep.subr.bf16.mxu0 %v12675_v51  ;;  %7296 = vmatprep.subr.bf16.mxu1 %v12678_v61  ;;  %v12688_v51 = vld [vmem:[#allocation9 + $0xb88] ss:$16 sps:$4 sm:$0xff]   ;;  %v12696_v61 = vld [vmem:[#allocation9 + $0xbac] ss:$16 sps:$4 sm:$0xff]  }
 0x32d   :  { %5815 = vmatmul.mubr.bf16.gmra.mrb[20].mxu0 %v14165_v13  ;;  %7166 = vmatmul.mubr.bf16.gmra.mrb[52].mxu1 %v14037_v42  ;;  %v12685_v42 = vld [vmem:[#allocation9 + $0xd80] ss:$16 sps:$4 sm:$0xff]   ;;  %v278_v58 = vld [vmem:[#allocation6 + $0x468] sm:$0xff] }
 0x32e   :  { %5824 = vmatprep.mubr.bf16.mxu0 %v14167_v44  ;;  %7175 = vmatprep.mubr.bf16.mxu1 %v14039_v24  ;;  %v12693_v24 = vld [vmem:[#allocation9 + $0xda4] ss:$16 sps:$4 sm:$0xff]  }
 0x32f   :  { %5946 = vmatpush1.bf16.msra.mxu0 %v12673_v2  ;;  %7297 = vmatpush1.bf16.msra.mxu1 %v12676_v56  ;;  %v12691_v2 = vld [vmem:[#allocation9 + $0xda0] ss:$16 sps:$4 sm:$0xff]   ;;  %v12694_v56 = vld [vmem:[#allocation9 + $0xba8] ss:$16 sps:$4 sm:$0xff]  }
 0x330   :  { %5947 = vmatprep.subr.bf16.mxu0 %v12681_v34  ;;  %7298 = vmatprep.subr.bf16.mxu1 %v12684_v53  ;;  %v12699_v34 = vld [vmem:[#allocation9 + $0xdc4] ss:$16 sps:$4 sm:$0xff]   ;;  %v12702_v53 = vld [vmem:[#allocation9 + $0xbcc] ss:$16 sps:$4 sm:$0xff]  }
 0x333   :  { %5948 = vmatpush1.bf16.msra.mxu0 %v12679_v47  ;;  %7299 = vmatpush1.bf16.msra.mxu1 %v12682_v14  ;;  %v14181_v47 = vcombine.low %v254_v41, %v262_v55  ;;  %v14183_v14 = vcombine.high %v270_v32, %v278_v58  ;;  %v286_v41 = vld [vmem:[#allocation6 + $0x4a8] sm:$0xff] }
 0x334   :  { %5949 = vmatprep.subr.bf16.mxu0 %v12687_v3  ;;  %7300 = vmatprep.subr.bf16.mxu1 %v12690_v1  ;;  %v12700_v3 = vld [vmem:[#allocation9 + $0xbc8] ss:$16 sps:$4 sm:$0xff]   ;;  %v12708_v1 = vld [vmem:[#allocation9 + $0xbec] ss:$16 sps:$4 sm:$0xff]  }
 0x335   :  { %5825 = vmatmul.mubr.bf16.gmra.mrb[24].mxu0 %v14173_v33  ;;  %7176 = vmatmul.mubr.bf16.gmra.mrb[56].mxu1 %v14045_v25  ;;  %v12697_v25 = vld [vmem:[#allocation9 + $0xdc0] ss:$16 sps:$4 sm:$0xff]   ;;  %v294_v55 = vld [vmem:[#allocation6 + $0x4e8] sm:$0xff] }
 0x336   :  { %5834 = vmatprep.mubr.bf16.mxu0 %v14175_v10  ;;  %7185 = vmatprep.mubr.bf16.mxu1 %v14047_v46  ;;  %v12705_v46 = vld [vmem:[#allocation9 + $0xde4] ss:$16 sps:$4 sm:$0xff]  }
 0x337   :  { %5950 = vmatpush1.bf16.msra.mxu0 %v12685_v42  ;;  %7301 = vmatpush1.bf16.msra.mxu1 %v12688_v51  ;;  %v12703_v42 = vld [vmem:[#allocation9 + $0xde0] ss:$16 sps:$4 sm:$0xff]   ;;  %v12706_v51 = vld [vmem:[#allocation9 + $0xbe8] ss:$16 sps:$4 sm:$0xff]  }
 0x338   :  { %5951 = vmatprep.subr.bf16.mxu0 %v12693_v24  ;;  %7302 = vmatprep.subr.bf16.mxu1 %v12696_v61  ;;  %v12711_v24 = vld [vmem:[#allocation9 + $0xe04] ss:$16 sps:$4 sm:$0xff]   ;;  %v12714_v61 = vld [vmem:[#allocation9 + $0xc0c] ss:$16 sps:$4 sm:$0xff]  }
 0x33b   :  { %5952 = vmatpush1.bf16.msra.mxu0 %v12691_v2  ;;  %7303 = vmatpush1.bf16.msra.mxu1 %v12694_v56  ;;  %v14189_v2 = vcombine.low %v270_v32, %v278_v58  ;;  %v14191_v56 = vcombine.high %v286_v41, %v294_v55  ;;  %v318_v58 = vld [vmem:[#allocation6 + $0x5a8] sm:$0xff] }
 0x33c   :  { %5953 = vmatprep.subr.bf16.mxu0 %v12699_v34  ;;  %7304 = vmatprep.subr.bf16.mxu1 %v12702_v53  ;;  %v14197_v34 = vcombine.low %v286_v41, %v294_v55 }
 0x33d   :  { %5835 = vmatmul.mubr.bf16.gmra.mrb[28].mxu0 %v14181_v47  ;;  %7186 = vmatmul.mubr.bf16.gmra.mrb[60].mxu1 %v14053_v21  ;;  %v302_v21 = vld [vmem:[#allocation6 + $0x528] sm:$0xff] }
 0x33e   :  { %5844 = vmatprep.mubr.bf16.mxu0 %v14183_v14  ;;  %7195 = vmatprep.mubr.bf16.mxu1 %v14055_v59  ;;  %v310_v59 = vld [vmem:[#allocation6 + $0x568] sm:$0xff] }
 0x33f   :  { %5954 = vmatpush1.bf16.msra.mxu0 %v12697_v25  ;;  %7305 = vmatpush1.bf16.msra.mxu1 %v12700_v3  ;;  %v14199_v32 = vcombine.high %v302_v21, %v310_v59  ;;  %v14205_v53 = vcombine.low %v302_v21, %v310_v59 }
 0x340   :  { %5955 = vmatprep.subr.bf16.mxu0 %v12705_v46  ;;  %7306 = vmatprep.subr.bf16.mxu1 %v12708_v1 }
 0x343   :  { %5956 = vmatpush1.bf16.msra.mxu0 %v12703_v42  ;;  %7307 = vmatpush1.bf16.msra.mxu1 %v12706_v51 }
 0x344   :  { %6118 = vmatprep.subr.bf16.mxu0 %v12711_v24  ;;  %7469 = vmatprep.subr.bf16.mxu1 %v12714_v61 }
 0x345   :  { %5845 = vmatmul.mubr.bf16.gmra.mrb[32].mxu0 %v14189_v2  ;;  %7196 = vmatmul.mubr.bf16.gmra.mrb[64].mxu1 %v14061_v16  ;;  %v326_v16 = vld [vmem:[#allocation6 + $0x5e8] sm:$0xff] }
 0x346   :  { %5854 = vmatprep.mubr.bf16.mxu0 %v14191_v56  ;;  %7205 = vmatprep.mubr.bf16.mxu1 %v14063_v35  ;;  %v14207_v25 = vcombine.high %v318_v58, %v326_v16  ;;  %v334_v35 = vld [vmem:[#allocation6 + $0x628] sm:$0xff]  ;;  %v14213_v3 = vcombine.low %v318_v58, %v326_v16  ;;  %v12709_v58 = vld [vmem:[#allocation9 + $0xe00] ss:$16 sps:$4 sm:$0xff]  }
 0x34d   :  { %5855 = vmatmul.mubr.bf16.gmra.mrb[36].mxu0 %v14197_v34  ;;  %7206 = vmatmul.mubr.bf16.gmra.mrb[68].mxu1 %v14069_v5  ;;  %v342_v5 = vld [vmem:[#allocation6 + $0x668] sm:$0xff] }
 0x34e   :  { %5864 = vmatprep.mubr.bf16.mxu0 %v14199_v32  ;;  %7215 = vmatprep.mubr.bf16.mxu1 %v14071_v39  ;;  %v14215_v46 = vcombine.high %v334_v35, %v342_v5  ;;  %v350_v39 = vld [vmem:[#allocation6 + $0x6a8] sm:$0xff]  ;;  %v14221_v1 = vcombine.low %v334_v35, %v342_v5  ;;  %v12717_v35 = vld [vmem:[#allocation9 + $0xe24] ss:$16 sps:$4 sm:$0xff]  }
 0x34f   :  { %v12720_v5 = vld [vmem:[#allocation9 + $0xc2c] ss:$16 sps:$4 sm:$0xff]  }
 0x355   :  { %5865 = vmatmul.mubr.bf16.gmra.mrb[40].mxu0 %v14205_v53  ;;  %7216 = vmatmul.mubr.bf16.gmra.mrb[72].mxu1 %v14077_v0  ;;  %v358_v0 = vld [vmem:[#allocation6 + $0x6e8] sm:$0xff] }
 0x356   :  { %5874 = vmatprep.mubr.bf16.mxu0 %v14207_v25  ;;  %7225 = vmatprep.mubr.bf16.mxu1 %v14079_v38  ;;  %v14223_v41 = vcombine.high %v350_v39, %v358_v0  ;;  %v366_v38 = vld [vmem:[#allocation6 + $0x728] sm:$0xff]  ;;  %v14229_v55 = vcombine.low %v350_v39, %v358_v0  ;;  %v175_v0 = vld [vmem:[#allocation6 + $0x130] sm:$0xff] }
 0x357   :  { %v12718_v39 = vld [vmem:[#allocation9 + $0xc28] ss:$16 sps:$4 sm:$0xff]  }
 0x35d   :  { %5875 = vmatmul.mubr.bf16.gmra.mrb[44].mxu0 %v14213_v3  ;;  %7226 = vmatmul.mubr.bf16.gmra.mrb[76].mxu1 %v14085_v6  ;;  %v374_v6 = vld [vmem:[#allocation6 + $0x768] sm:$0xff] }
 0x35e   :  { %5884 = vmatprep.mubr.bf16.mxu0 %v14215_v46  ;;  %7235 = vmatprep.mubr.bf16.mxu1 %v14087_v4  ;;  %v14231_v42 = vcombine.high %v366_v38, %v374_v6  ;;  %v382_v4 = vld [vmem:[#allocation6 + $0x7a8] sm:$0xff]  ;;  %v14237_v51 = vcombine.low %v366_v38, %v374_v6  ;;  %v12723_v38 = vld [vmem:[#allocation9 + $0xe44] ss:$16 sps:$4 sm:$0xff]  }
 0x35f   :  { %v12726_v6 = vld [vmem:[#allocation9 + $0xc4c] ss:$16 sps:$4 sm:$0xff]  }
 0x365   :  { %5885 = vmatmul.mubr.bf16.gmra.mrb[48].mxu0 %v14221_v1  ;;  %7236 = vmatmul.mubr.bf16.gmra.mrb[80].mxu1 %v14093_v36  ;;  %v390_v36 = vld [vmem:[#allocation6 + $0x7e8] sm:$0xff] }
 0x366   :  { %5894 = vmatprep.mubr.bf16.mxu0 %v14223_v41  ;;  %7245 = vmatprep.mubr.bf16.mxu1 %v14095_v49  ;;  %v14239_v24 = vcombine.high %v382_v4, %v390_v36  ;;  %v143_v49 = vld [vmem:[#allocation6 + $0x30] sm:$0xff]  ;;  %v14245_v61 = vcombine.low %v382_v4, %v390_v36 }
 0x36d   :  { %5895 = vmatmul.mubr.bf16.gmra.mrb[52].mxu0 %v14229_v55  ;;  %7246 = vmatmul.mubr.bf16.gmra.mrb[84].mxu1 %v14101_v60  ;;  %v151_v60 = vld [vmem:[#allocation6 + $0x70] sm:$0xff] }
 0x36e   :  { %5904 = vmatprep.mubr.bf16.mxu0 %v14231_v42  ;;  %7255 = vmatprep.mubr.bf16.mxu1 %v14103_v43  ;;  %v14247_v21 = vcombine.high %v143_v49, %v151_v60  ;;  %v159_v43 = vld [vmem:[#allocation6 + $0xb0] sm:$0xff]  ;;  %v14253_v59 = vcombine.low %v143_v49, %v151_v60  ;;  %v12724_v49 = vld [vmem:[#allocation9 + $0xc48] ss:$16 sps:$4 sm:$0xff]  }
 0x36f   :  { %v12729_v60 = vld [vmem:[#allocation9 + $0xe64] ss:$16 sps:$4 sm:$0xff]  }
 0x375   :  { %5905 = vmatmul.mubr.bf16.gmra.mrb[56].mxu0 %v14237_v51  ;;  %7256 = vmatmul.mubr.bf16.gmra.mrb[88].mxu1 %v14109_v19  ;;  %v167_v19 = vld [vmem:[#allocation6 + $0xf0] sm:$0xff] }
 0x376   :  { %5914 = vmatprep.mubr.bf16.mxu0 %v14239_v24  ;;  %7265 = vmatprep.mubr.bf16.mxu1 %v14111_v12  ;;  %v12712_v12 = vld [vmem:[#allocation9 + $0xc08] ss:$16 sps:$4 sm:$0xff]   ;;  %v14255_v16 = vcombine.high %v159_v43, %v167_v19  ;;  %v14261_v4 = vcombine.low %v159_v43, %v167_v19  ;;  %v199_v43 = vld [vmem:[#allocation6 + $0x1f0] sm:$0xff] }
 0x377   :  { %v12727_v19 = vld [vmem:[#allocation9 + $0xe60] ss:$16 sps:$4 sm:$0xff]  }
 0x37d   :  { %5915 = vmatmul.mubr.bf16.gmra.mrb[60].mxu0 %v14245_v61  ;;  %7266 = vmatmul.mubr.bf16.gmra.mrb[92].mxu1 %v14117_v45  ;;  %v12715_v45 = vld [vmem:[#allocation9 + $0xe20] ss:$16 sps:$4 sm:$0xff]  }
 0x37e   :  { %5957 = vmatprep.mubr.bf16.mxu0 %v14247_v21  ;;  %7308 = vmatprep.mubr.bf16.mxu1 %v14119_v40  ;;  %v183_v40 = vld [vmem:[#allocation6 + $0x170] sm:$0xff] }
 0x37f   :  { %v14263_v36 = vcombine.high %v175_v0, %v183_v40 }
 0x385   :  { %5958 = vmatmul.mubr.bf16.vlgmr.msra.gmra.mrb[0].mxu0 %v14253_v59  ;;  %7309 = vmatmul.mubr.bf16.vlgmr.msra.gmra.mrb[32].mxu1 %v14125_v15  ;;  %v12721_v15 = vld [vmem:[#allocation9 + $0xe40] ss:$16 sps:$4 sm:$0xff]  }
 0x386   :  { %6119 = vmatpush1.bf16.msra.mxu0 %v12709_v58  ;;  %7470 = vmatpush1.bf16.msra.mxu1 %v12712_v12  ;;  %v12732_v58 = vld [vmem:[#allocation9 + $0xc6c] ss:$16 sps:$4 sm:$0xff]   ;;  %v12730_v12 = vld [vmem:[#allocation9 + $0xc68] ss:$16 sps:$4 sm:$0xff]  }
 0x387   :  { %5967 = vmatprep.mubr.bf16.mxu0 %v14255_v16  ;;  %7318 = vmatprep.mubr.bf16.mxu1 %v14127_v57  ;;  %v191_v57 = vld [vmem:[#allocation6 + $0x1b0] sm:$0xff] }
 0x388   :  { %6120 = vmatprep.subr.bf16.mxu0 %v12717_v35  ;;  %7471 = vmatprep.subr.bf16.mxu1 %v12720_v5  ;;  %v12735_v35 = vld [vmem:[#allocation9 + $0xe84] ss:$16 sps:$4 sm:$0xff]   ;;  %v12738_v5 = vld [vmem:[#allocation9 + $0xc8c] ss:$16 sps:$4 sm:$0xff]  }
 0x38a   :  { %6121 = vmatpush1.bf16.msra.mxu0 %v12715_v45  ;;  %7472 = vmatpush1.bf16.msra.mxu1 %v12718_v39  ;;  %v14269_v45 = vcombine.low %v175_v0, %v183_v40  ;;  %v14271_v39 = vcombine.high %v191_v57, %v199_v43  ;;  %v207_v0 = vld [vmem:[#allocation6 + $0x230] sm:$0xff] }
 0x38b   :  { %6122 = vmatprep.subr.bf16.mxu0 %v12723_v38  ;;  %7473 = vmatprep.subr.bf16.mxu1 %v12726_v6  ;;  %v12736_v38 = vld [vmem:[#allocation9 + $0xc88] ss:$16 sps:$4 sm:$0xff]   ;;  %v12744_v6 = vld [vmem:[#allocation9 + $0xcac] ss:$16 sps:$4 sm:$0xff]   ;;  %v215_v40 = vld [vmem:[#allocation6 + $0x270] sm:$0xff] }
 0x38d   :  { %5968 = vmatmul.mubr.bf16.gmra.mrb[4].mxu0 %v14261_v4  ;;  %7319 = vmatmul.mubr.bf16.gmra.mrb[36].mxu1 %v14133_v8  ;;  %v12733_v8 = vld [vmem:[#allocation9 + $0xe80] ss:$16 sps:$4 sm:$0xff]  }
 0x38e   :  { %5977 = vmatprep.mubr.bf16.mxu0 %v14263_v36  ;;  %7328 = vmatprep.mubr.bf16.mxu1 %v14135_v7  ;;  %v12741_v7 = vld [vmem:[#allocation9 + $0xea4] ss:$16 sps:$4 sm:$0xff]  }
 0x38f   :  { %6123 = vmatpush1.bf16.msra.mxu0 %v12721_v15  ;;  %7474 = vmatpush1.bf16.msra.mxu1 %v12724_v49  ;;  %v12739_v15 = vld [vmem:[#allocation9 + $0xea0] ss:$16 sps:$4 sm:$0xff]   ;;  %v12742_v49 = vld [vmem:[#allocation9 + $0xca8] ss:$16 sps:$4 sm:$0xff]  }
 0x390   :  { %6124 = vmatprep.subr.bf16.mxu0 %v12729_v60  ;;  %7475 = vmatprep.subr.bf16.mxu1 %v12732_v58  ;;  %v12747_v60 = vld [vmem:[#allocation9 + $0xec4] ss:$16 sps:$4 sm:$0xff]   ;;  %v12750_v58 = vld [vmem:[#allocation9 + $0xccc] ss:$16 sps:$4 sm:$0xff]  }
 0x393   :  { %6125 = vmatpush1.bf16.msra.mxu0 %v12727_v19  ;;  %7476 = vmatpush1.bf16.msra.mxu1 %v12730_v12  ;;  %v14277_v19 = vcombine.low %v191_v57, %v199_v43  ;;  %v14279_v12 = vcombine.high %v207_v0, %v215_v40  ;;  %v223_v57 = vld [vmem:[#allocation6 + $0x2b0] sm:$0xff] }
 0x394   :  { %6126 = vmatprep.subr.bf16.mxu0 %v12735_v35  ;;  %7477 = vmatprep.subr.bf16.mxu1 %v12738_v5  ;;  %v12748_v35 = vld [vmem:[#allocation9 + $0xcc8] ss:$16 sps:$4 sm:$0xff]   ;;  %v12756_v5 = vld [vmem:[#allocation9 + $0xcec] ss:$16 sps:$4 sm:$0xff]   ;;  %v231_v43 = vld [vmem:[#allocation6 + $0x2f0] sm:$0xff] }
 0x395   :  { %5978 = vmatmul.mubr.bf16.gmra.mrb[8].mxu0 %v14269_v45  ;;  %7329 = vmatmul.mubr.bf16.gmra.mrb[40].mxu1 %v14141_v30  ;;  %v12745_v30 = vld [vmem:[#allocation9 + $0xec0] ss:$16 sps:$4 sm:$0xff]  }
 0x396   :  { %5987 = vmatprep.mubr.bf16.mxu0 %v14271_v39  ;;  %7338 = vmatprep.mubr.bf16.mxu1 %v14143_v48  ;;  %v12753_v48 = vld [vmem:[#allocation9 + $0xee4] ss:$16 sps:$4 sm:$0xff]  }
 0x397   :  { %6127 = vmatpush1.bf16.msra.mxu0 %v12733_v8  ;;  %7478 = vmatpush1.bf16.msra.mxu1 %v12736_v38  ;;  %v12751_v8 = vld [vmem:[#allocation9 + $0xee0] ss:$16 sps:$4 sm:$0xff]   ;;  %v12754_v38 = vld [vmem:[#allocation9 + $0xce8] ss:$16 sps:$4 sm:$0xff]  }
 0x398   :  { %6128 = vmatprep.subr.bf16.mxu0 %v12741_v7  ;;  %7479 = vmatprep.subr.bf16.mxu1 %v12744_v6  ;;  %v12759_v7 = vld [vmem:[#allocation9 + $0xf04] ss:$16 sps:$4 sm:$0xff]   ;;  %v12762_v6 = vld [vmem:[#allocation9 + $0xd0c] ss:$16 sps:$4 sm:$0xff]  }
 0x39b   :  { %6129 = vmatpush1.bf16.msra.mxu0 %v12739_v15  ;;  %7480 = vmatpush1.bf16.msra.mxu1 %v12742_v49  ;;  %v14285_v15 = vcombine.low %v207_v0, %v215_v40  ;;  %v14287_v49 = vcombine.high %v223_v57, %v231_v43  ;;  %v239_v0 = vld [vmem:[#allocation6 + $0x330] sm:$0xff] }
 0x39c   :  { %6130 = vmatprep.subr.bf16.mxu0 %v12747_v60  ;;  %7481 = vmatprep.subr.bf16.mxu1 %v12750_v58  ;;  %v12760_v60 = vld [vmem:[#allocation9 + $0xd08] ss:$16 sps:$4 sm:$0xff]   ;;  %v12768_v58 = vld [vmem:[#allocation9 + $0xd2c] ss:$16 sps:$4 sm:$0xff]   ;;  %v247_v40 = vld [vmem:[#allocation6 + $0x370] sm:$0xff] }
 0x39d   :  { %5988 = vmatmul.mubr.bf16.gmra.mrb[12].mxu0 %v14277_v19  ;;  %7339 = vmatmul.mubr.bf16.gmra.mrb[44].mxu1 %v14149_v9  ;;  %v12757_v9 = vld [vmem:[#allocation9 + $0xf00] ss:$16 sps:$4 sm:$0xff]  }
 0x39e   :  { %5997 = vmatprep.mubr.bf16.mxu0 %v14279_v12  ;;  %7348 = vmatprep.mubr.bf16.mxu1 %v14151_v37  ;;  %v12765_v37 = vld [vmem:[#allocation9 + $0xf24] ss:$16 sps:$4 sm:$0xff]  }
 0x39f   :  { %6131 = vmatpush1.bf16.msra.mxu0 %v12745_v30  ;;  %7482 = vmatpush1.bf16.msra.mxu1 %v12748_v35  ;;  %v12763_v30 = vld [vmem:[#allocation9 + $0xf20] ss:$16 sps:$4 sm:$0xff]   ;;  %v12766_v35 = vld [vmem:[#allocation9 + $0xd28] ss:$16 sps:$4 sm:$0xff]  }
 0x3a0   :  { %6132 = vmatprep.subr.bf16.mxu0 %v12753_v48  ;;  %7483 = vmatprep.subr.bf16.mxu1 %v12756_v5  ;;  %v12771_v48 = vld [vmem:[#allocation9 + $0xf44] ss:$16 sps:$4 sm:$0xff]   ;;  %v12774_v5 = vld [vmem:[#allocation9 + $0xd4c] ss:$16 sps:$4 sm:$0xff]  }
 0x3a3   :  { %6133 = vmatpush1.bf16.msra.mxu0 %v12751_v8  ;;  %7484 = vmatpush1.bf16.msra.mxu1 %v12754_v38  ;;  %v14293_v8 = vcombine.low %v223_v57, %v231_v43  ;;  %v14295_v38 = vcombine.high %v239_v0, %v247_v40  ;;  %v255_v57 = vld [vmem:[#allocation6 + $0x3b0] sm:$0xff] }
 0x3a4   :  { %6134 = vmatprep.subr.bf16.mxu0 %v12759_v7  ;;  %7485 = vmatprep.subr.bf16.mxu1 %v12762_v6  ;;  %v12772_v7 = vld [vmem:[#allocation9 + $0xd48] ss:$16 sps:$4 sm:$0xff]   ;;  %v12780_v6 = vld [vmem:[#allocation9 + $0xd6c] ss:$16 sps:$4 sm:$0xff]   ;;  %v263_v43 = vld [vmem:[#allocation6 + $0x3f0] sm:$0xff] }
 0x3a5   :  { %5998 = vmatmul.mubr.bf16.gmra.mrb[16].mxu0 %v14285_v15  ;;  %7349 = vmatmul.mubr.bf16.gmra.mrb[48].mxu1 %v14157_v11  ;;  %v12769_v11 = vld [vmem:[#allocation9 + $0xf40] ss:$16 sps:$4 sm:$0xff]  }
 0x3a6   :  { %6007 = vmatprep.mubr.bf16.mxu0 %v14287_v49  ;;  %7358 = vmatprep.mubr.bf16.mxu1 %v14159_v29  ;;  %v12777_v29 = vld [vmem:[#allocation9 + $0xf64] ss:$16 sps:$4 sm:$0xff]  }
 0x3a7   :  { %6135 = vmatpush1.bf16.msra.mxu0 %v12757_v9  ;;  %7486 = vmatpush1.bf16.msra.mxu1 %v12760_v60  ;;  %v12775_v9 = vld [vmem:[#allocation9 + $0xf60] ss:$16 sps:$4 sm:$0xff]   ;;  %v12778_v60 = vld [vmem:[#allocation9 + $0xd68] ss:$16 sps:$4 sm:$0xff]  }
 0x3a8   :  { %6136 = vmatprep.subr.bf16.mxu0 %v12765_v37  ;;  %7487 = vmatprep.subr.bf16.mxu1 %v12768_v58  ;;  %v12783_v37 = vld [vmem:[#allocation9 + $0xf84] ss:$16 sps:$4 sm:$0xff]   ;;  %v12786_v58 = vld [vmem:[#allocation9 + $0xd8c] ss:$16 sps:$4 sm:$0xff]  }
 0x3ab   :  { %6137 = vmatpush1.bf16.msra.mxu0 %v12763_v30  ;;  %7488 = vmatpush1.bf16.msra.mxu1 %v12766_v35  ;;  %v14301_v30 = vcombine.low %v239_v0, %v247_v40  ;;  %v14303_v35 = vcombine.high %v255_v57, %v263_v43  ;;  %v271_v0 = vld [vmem:[#allocation6 + $0x430] sm:$0xff] }
 0x3ac   :  { %6138 = vmatprep.subr.bf16.mxu0 %v12771_v48  ;;  %7489 = vmatprep.subr.bf16.mxu1 %v12774_v5  ;;  %v12784_v48 = vld [vmem:[#allocation9 + $0xd88] ss:$16 sps:$4 sm:$0xff]   ;;  %v12792_v5 = vld [vmem:[#allocation9 + $0xdac] ss:$16 sps:$4 sm:$0xff]   ;;  %v279_v40 = vld [vmem:[#allocation6 + $0x470] sm:$0xff] }
 0x3ad   :  { %6008 = vmatmul.mubr.bf16.gmra.mrb[20].mxu0 %v14293_v8  ;;  %7359 = vmatmul.mubr.bf16.gmra.mrb[52].mxu1 %v14165_v13  ;;  %v12781_v13 = vld [vmem:[#allocation9 + $0xf80] ss:$16 sps:$4 sm:$0xff]  }
 0x3ae   :  { %6017 = vmatprep.mubr.bf16.mxu0 %v14295_v38  ;;  %7368 = vmatprep.mubr.bf16.mxu1 %v14167_v44  ;;  %v12789_v44 = vld [vmem:[#allocation9 + $0xfa4] ss:$16 sps:$4 sm:$0xff]  }
 0x3af   :  { %6139 = vmatpush1.bf16.msra.mxu0 %v12769_v11  ;;  %7490 = vmatpush1.bf16.msra.mxu1 %v12772_v7  ;;  %v12787_v11 = vld [vmem:[#allocation9 + $0xfa0] ss:$16 sps:$4 sm:$0xff]   ;;  %v12790_v7 = vld [vmem:[#allocation9 + $0xda8] ss:$16 sps:$4 sm:$0xff]  }
 0x3b0   :  { %6140 = vmatprep.subr.bf16.mxu0 %v12777_v29  ;;  %7491 = vmatprep.subr.bf16.mxu1 %v12780_v6  ;;  %v12795_v29 = vld [vmem:[#allocation9 + $0xfc4] ss:$16 sps:$4 sm:$0xff]   ;;  %v12798_v6 = vld [vmem:[#allocation9 + $0xdcc] ss:$16 sps:$4 sm:$0xff]  }
 0x3b3   :  { %6141 = vmatpush1.bf16.msra.mxu0 %v12775_v9  ;;  %7492 = vmatpush1.bf16.msra.mxu1 %v12778_v60  ;;  %v14309_v9 = vcombine.low %v255_v57, %v263_v43  ;;  %v14311_v60 = vcombine.high %v271_v0, %v279_v40  ;;  %v287_v57 = vld [vmem:[#allocation6 + $0x4b0] sm:$0xff] }
 0x3b4   :  { %6142 = vmatprep.subr.bf16.mxu0 %v12783_v37  ;;  %7493 = vmatprep.subr.bf16.mxu1 %v12786_v58  ;;  %v12796_v37 = vld [vmem:[#allocation9 + $0xdc8] ss:$16 sps:$4 sm:$0xff]   ;;  %v12804_v58 = vld [vmem:[#allocation9 + $0xdec] ss:$16 sps:$4 sm:$0xff]   ;;  %v295_v43 = vld [vmem:[#allocation6 + $0x4f0] sm:$0xff] }
 0x3b5   :  { %6018 = vmatmul.mubr.bf16.gmra.mrb[24].mxu0 %v14301_v30  ;;  %7369 = vmatmul.mubr.bf16.gmra.mrb[56].mxu1 %v14173_v33  ;;  %v12793_v33 = vld [vmem:[#allocation9 + $0xfc0] ss:$16 sps:$4 sm:$0xff]  }
 0x3b6   :  { %6027 = vmatprep.mubr.bf16.mxu0 %v14303_v35  ;;  %7378 = vmatprep.mubr.bf16.mxu1 %v14175_v10  ;;  %v12801_v10 = vld [vmem:[#allocation9 + $0xfe4] ss:$16 sps:$4 sm:$0xff]  }
 0x3b7   :  { %6143 = vmatpush1.bf16.msra.mxu0 %v12781_v13  ;;  %7494 = vmatpush1.bf16.msra.mxu1 %v12784_v48  ;;  %v12799_v13 = vld [vmem:[#allocation9 + $0xfe0] ss:$16 sps:$4 sm:$0xff]   ;;  %v12802_v48 = vld [vmem:[#allocation9 + $0xde8] ss:$16 sps:$4 sm:$0xff]  }
 0x3b8   :  { %6144 = vmatprep.subr.bf16.mxu0 %v12789_v44  ;;  %7495 = vmatprep.subr.bf16.mxu1 %v12792_v5  ;;  %v12807_v44 = vld [vmem:[#allocation9 + $0xe0c] ss:$16 sps:$4 sm:$0xff]   ;;  %v14317_v5 = vcombine.low %v271_v0, %v279_v40  ;;  %v319_v0 = vld [vmem:[#allocation6 + $0x5b0] sm:$0xff] }
 0x3bb   :  { %6145 = vmatpush1.bf16.msra.mxu0 %v12787_v11  ;;  %7496 = vmatpush1.bf16.msra.mxu1 %v12790_v7  ;;  %v14319_v11 = vcombine.high %v287_v57, %v295_v43  ;;  %v14325_v7 = vcombine.low %v287_v57, %v295_v43  ;;  %v375_v57 = vld [vmem:[#allocation6 + $0x770] sm:$0xff] }
 0x3bc   :  { %6146 = vmatprep.subr.bf16.mxu0 %v12795_v29  ;;  %7497 = vmatprep.subr.bf16.mxu1 %v12798_v6 }
 0x3bd   :  { %6028 = vmatmul.mubr.bf16.gmra.mrb[28].mxu0 %v14309_v9  ;;  %7379 = vmatmul.mubr.bf16.gmra.mrb[60].mxu1 %v14181_v47  ;;  %v303_v47 = vld [vmem:[#allocation6 + $0x530] sm:$0xff] }
 0x3be   :  { %6037 = vmatprep.mubr.bf16.mxu0 %v14311_v60  ;;  %7388 = vmatprep.mubr.bf16.mxu1 %v14183_v14  ;;  %v311_v14 = vld [vmem:[#allocation6 + $0x570] sm:$0xff] }
 0x3bf   :  { %6147 = vmatpush1.bf16.msra.mxu0 %v12793_v33  ;;  %7498 = vmatpush1.bf16.msra.mxu1 %v12796_v37  ;;  %v14327_v29 = vcombine.high %v303_v47, %v311_v14  ;;  %v14333_v40 = vcombine.low %v303_v47, %v311_v14 }
 0x3c0   :  { %6148 = vmatprep.subr.bf16.mxu0 %v12801_v10  ;;  %7499 = vmatprep.subr.bf16.mxu1 %v12804_v58  ;;  %v359_v10 = vld [vmem:[#allocation6 + $0x6f0] sm:$0xff] }
 0x3c3   :  { %6149 = vmatpush1.bf16.msra.mxu0 %v12799_v13  ;;  %7500 = vmatpush1.bf16.msra.mxu1 %v12802_v48  ;;  %v383_v13 = vld [vmem:[#allocation6 + $0x7b0] sm:$0xff] }
 0x3c4   :  { %7662 = vmatprep.subr.bf16.mxu1 %v12807_v44 }
 0x3c5   :  { %6038 = vmatmul.mubr.bf16.gmra.mrb[32].mxu0 %v14317_v5  ;;  %7389 = vmatmul.mubr.bf16.gmra.mrb[64].mxu1 %v14189_v2  ;;  %v327_v2 = vld [vmem:[#allocation6 + $0x5f0] sm:$0xff] }
 0x3c6   :  { %6047 = vmatprep.mubr.bf16.mxu0 %v14319_v11  ;;  %7398 = vmatprep.mubr.bf16.mxu1 %v14191_v56  ;;  %v14335_v6 = vcombine.high %v319_v0, %v327_v2  ;;  %v335_v56 = vld [vmem:[#allocation6 + $0x630] sm:$0xff]  ;;  %v14341_v33 = vcombine.low %v319_v0, %v327_v2  ;;  %v12805_v2 = vld [vmem:[#allocation9 + $0xe08] ss:$16 sps:$4 sm:$0xff]  }
 0x3cd   :  { %6048 = vmatmul.mubr.bf16.gmra.mrb[36].mxu0 %v14325_v7  ;;  %7399 = vmatmul.mubr.bf16.gmra.mrb[68].mxu1 %v14197_v34  ;;  %v343_v34 = vld [vmem:[#allocation6 + $0x670] sm:$0xff] }
 0x3ce   :  { %6057 = vmatprep.mubr.bf16.mxu0 %v14327_v29  ;;  %7408 = vmatprep.mubr.bf16.mxu1 %v14199_v32  ;;  %v14343_v37 = vcombine.high %v335_v56, %v343_v34  ;;  %v12843_v32 = vld [vmem:[#allocation12 + $0x4] ss:$8 sps:$4 sm:$0xff]   ;;  %v14349_v58 = vcombine.low %v335_v56, %v343_v34  ;;  %v12810_v56 = vld [vmem:[#allocation9 + $0xe2c] ss:$16 sps:$4 sm:$0xff]  }
 0x3cf   :  { %8443 = vmatprep.subr.bf16.mxu0 %v12843_v32  ;;  %v12841_v34 = vld [vmem:[#allocation12] ss:$8 sps:$4 sm:$0xff]   ;;  %v12849_v32 = vld [vmem:[#allocation12 + $0x14] ss:$8 sps:$4 sm:$0xff]  }
 0x3d5   :  { %6058 = vmatmul.mubr.bf16.gmra.mrb[40].mxu0 %v14333_v40  ;;  %7409 = vmatmul.mubr.bf16.gmra.mrb[72].mxu1 %v14205_v53  ;;  %v351_v53 = vld [vmem:[#allocation6 + $0x6b0] sm:$0xff] }
 0x3d6   :  { %6067 = vmatprep.mubr.bf16.mxu0 %v14335_v6  ;;  %7418 = vmatprep.mubr.bf16.mxu1 %v14207_v25  ;;  %v14351_v25 = vcombine.high %v351_v53, %v359_v10  ;;  %v14357_v43 = vcombine.low %v351_v53, %v359_v10  ;;  %v184_v53 = vld [vmem:[#allocation6 + $0x178] sm:$0xff] }
 0x3d7   :  { %v12813_v10 = vld [vmem:[#allocation9 + $0xe4c] ss:$16 sps:$4 sm:$0xff]  }
 0x3dd   :  { %6068 = vmatmul.mubr.bf16.gmra.mrb[44].mxu0 %v14341_v33  ;;  %7419 = vmatmul.mubr.bf16.gmra.mrb[76].mxu1 %v14213_v3  ;;  %v367_v3 = vld [vmem:[#allocation6 + $0x730] sm:$0xff] }
 0x3de   :  { %6077 = vmatprep.mubr.bf16.mxu0 %v14343_v37  ;;  %7428 = vmatprep.mubr.bf16.mxu1 %v14215_v46  ;;  %v14359_v46 = vcombine.high %v367_v3, %v375_v57  ;;  %v14365_v48 = vcombine.low %v367_v3, %v375_v57  ;;  %v12847_v3 = vld [vmem:[#allocation12 + $0x10] ss:$8 sps:$4 sm:$0xff]  }
 0x3e5   :  { %6078 = vmatmul.mubr.bf16.gmra.mrb[48].mxu0 %v14349_v58  ;;  %7429 = vmatmul.mubr.bf16.gmra.mrb[80].mxu1 %v14221_v1  ;;  %v391_v1 = vld [vmem:[#allocation6 + $0x7f0] sm:$0xff] }
 0x3e6   :  { %6087 = vmatprep.mubr.bf16.mxu0 %v14351_v25  ;;  %7438 = vmatprep.mubr.bf16.mxu1 %v14223_v41  ;;  %v14367_v44 = vcombine.high %v383_v13, %v391_v1  ;;  %v144_v41 = vld [vmem:[#allocation6 + $0x38] sm:$0xff]  ;;  %v14373_v47 = vcombine.low %v383_v13, %v391_v1  ;;  %v12855_v1 = vld [vmem:[#allocation12 + $0x24] ss:$8 sps:$4 sm:$0xff]  }
 0x3ed   :  { %6088 = vmatmul.mubr.bf16.gmra.mrb[52].mxu0 %v14357_v43  ;;  %7439 = vmatmul.mubr.bf16.gmra.mrb[84].mxu1 %v14229_v55  ;;  %v152_v55 = vld [vmem:[#allocation6 + $0x78] sm:$0xff] }
 0x3ee   :  { %6097 = vmatprep.mubr.bf16.mxu0 %v14359_v46  ;;  %7448 = vmatprep.mubr.bf16.mxu1 %v14231_v42  ;;  %v14375_v14 = vcombine.high %v144_v41, %v152_v55  ;;  %v160_v42 = vld [vmem:[#allocation6 + $0xb8] sm:$0xff]  ;;  %v14381_v0 = vcombine.low %v144_v41, %v152_v55  ;;  %v12853_v55 = vld [vmem:[#allocation12 + $0x20] ss:$8 sps:$4 sm:$0xff]  }
 0x3ef   :  { %v12816_v41 = vld [vmem:[#allocation9 + $0xe6c] ss:$16 sps:$4 sm:$0xff]  }
 0x3f5   :  { %6098 = vmatmul.mubr.bf16.gmra.mrb[56].mxu0 %v14365_v48  ;;  %7449 = vmatmul.mubr.bf16.gmra.mrb[88].mxu1 %v14237_v51  ;;  %v168_v51 = vld [vmem:[#allocation6 + $0xf8] sm:$0xff] }
 0x3f6   :  { %6107 = vmatprep.mubr.bf16.mxu0 %v14367_v44  ;;  %7458 = vmatprep.mubr.bf16.mxu1 %v14239_v24  ;;  %v14383_v24 = vcombine.high %v160_v42, %v168_v51  ;;  %v14389_v57 = vcombine.low %v160_v42, %v168_v51  ;;  %v192_v42 = vld [vmem:[#allocation6 + $0x1b8] sm:$0xff] }
 0x3f7   :  { %v200_v51 = vld [vmem:[#allocation6 + $0x1f8] sm:$0xff] }
 0x3fd   :  { %6108 = vmatmul.mubr.bf16.gmra.mrb[60].mxu0 %v14373_v47  ;;  %7459 = vmatmul.mubr.bf16.gmra.mrb[92].mxu1 %v14245_v61  ;;  %v12808_v61 = vld [vmem:[#allocation9 + $0xe28] ss:$16 sps:$4 sm:$0xff]  }
 0x3fe   :  { %6150 = vmatprep.mubr.bf16.mxu0 %v14375_v14  ;;  %7501 = vmatprep.mubr.bf16.mxu1 %v14247_v21  ;;  %v176_v21 = vld [vmem:[#allocation6 + $0x138] sm:$0xff] }
 0x3ff   :  { %v14391_v13 = vcombine.high %v176_v21, %v184_v53 }
 0x405   :  { %6151 = vmatmul.mubr.bf16.vlgmr.msra.gmra.mrb[0].mxu0 %v14381_v0  ;;  %7502 = vmatmul.mubr.bf16.vlgmr.msra.gmra.mrb[32].mxu1 %v14253_v59  ;;  %v12811_v59 = vld [vmem:[#allocation9 + $0xe48] ss:$16 sps:$4 sm:$0xff]  }
 0x406   :  { %7663 = vmatpush1.bf16.msra.mxu1 %v12805_v2  ;;  %6160 = vmatprep.mubr.bf16.mxu0 %v14383_v24  ;;  %v12814_v2 = vld [vmem:[#allocation9 + $0xe68] ss:$16 sps:$4 sm:$0xff]  }
 0x407   :  { %7511 = vmatprep.mubr.bf16.mxu1 %v14255_v16  ;;  %7664 = vmatprep.subr.bf16.mxu1 %v12810_v56  ;;  %v12861_v16 = vld [vmem:[#allocation12 + $0x34] ss:$8 sps:$4 sm:$0xff]   ;;  %v12819_v56 = vld [vmem:[#allocation9 + $0xe8c] ss:$16 sps:$4 sm:$0xff]  }
 0x408   :  { %8444 = vmatpush1.bf16.msra.mxu0 %v12841_v34  ;;  %v12859_v34 = vld [vmem:[#allocation12 + $0x30] ss:$8 sps:$4 sm:$0xff]  }
 0x409   :  { %8445 = vmatprep.subr.bf16.mxu0 %v12849_v32  ;;  %v14397_v32 = vcombine.low %v176_v21, %v184_v53  ;;  %v208_v21 = vld [vmem:[#allocation6 + $0x238] sm:$0xff] }
 0x40a   :  { %7665 = vmatpush1.bf16.msra.mxu1 %v12808_v61  ;;  %v14399_v61 = vcombine.high %v192_v42, %v200_v51  ;;  %v216_v53 = vld [vmem:[#allocation6 + $0x278] sm:$0xff] }
 0x40b   :  { %7666 = vmatprep.subr.bf16.mxu1 %v12813_v10  ;;  %v12867_v10 = vld [vmem:[#allocation12 + $0x44] ss:$8 sps:$4 sm:$0xff]  }
 0x40c   :  { %8446 = vmatpush1.bf16.msra.mxu0 %v12847_v3  ;;  %v12822_v3 = vld [vmem:[#allocation9 + $0xeac] ss:$16 sps:$4 sm:$0xff]  }
 0x40d   :  { %6161 = vmatmul.mubr.bf16.gmra.mrb[4].mxu0 %v14389_v57  ;;  %7512 = vmatmul.mubr.bf16.gmra.mrb[36].mxu1 %v14261_v4  ;;  %v12817_v4 = vld [vmem:[#allocation9 + $0xe88] ss:$16 sps:$4 sm:$0xff]  }
 0x40e   :  { %6170 = vmatprep.mubr.bf16.mxu0 %v14391_v13  ;;  %7521 = vmatprep.mubr.bf16.mxu1 %v14263_v36  ;;  %v12865_v36 = vld [vmem:[#allocation12 + $0x40] ss:$8 sps:$4 sm:$0xff]  }
 0x40f   :  { %7667 = vmatpush1.bf16.msra.mxu1 %v12811_v59  ;;  %8447 = vmatprep.subr.bf16.mxu0 %v12855_v1  ;;  %v12870_v59 = vld [vmem:[#allocation12 + $0x54] ss:$8 sps:$4 sm:$0xff]  }
 0x410   :  { %7668 = vmatprep.subr.bf16.mxu1 %v12816_v41  ;;  %8448 = vmatpush1.bf16.msra.mxu0 %v12853_v55  ;;  %v12820_v1 = vld [vmem:[#allocation9 + $0xea8] ss:$16 sps:$4 sm:$0xff]   ;;  %v12825_v41 = vld [vmem:[#allocation9 + $0xecc] ss:$16 sps:$4 sm:$0xff]  }
 0x411   :  { %8449 = vmatprep.subr.bf16.mxu0 %v12861_v16  ;;  %v12868_v55 = vld [vmem:[#allocation12 + $0x50] ss:$8 sps:$4 sm:$0xff]   ;;  %v14405_v16 = vcombine.low %v192_v42, %v200_v51 }
 0x412   :  { %v224_v42 = vld [vmem:[#allocation6 + $0x2b8] sm:$0xff] }
 0x413   :  { %7669 = vmatpush1.bf16.msra.mxu1 %v12814_v2  ;;  %v14407_v2 = vcombine.high %v208_v21, %v216_v53  ;;  %v232_v51 = vld [vmem:[#allocation6 + $0x2f8] sm:$0xff] }
 0x414   :  { %7670 = vmatprep.subr.bf16.mxu1 %v12819_v56  ;;  %8450 = vmatpush1.bf16.msra.mxu0 %v12859_v34  ;;  %v12873_v56 = vld [vmem:[#allocation12 + $0x64] ss:$8 sps:$4 sm:$0xff]   ;;  %v12828_v34 = vld [vmem:[#allocation9 + $0xeec] ss:$16 sps:$4 sm:$0xff]  }
 0x415   :  { %6171 = vmatmul.mubr.bf16.gmra.mrb[8].mxu0 %v14397_v32  ;;  %7522 = vmatmul.mubr.bf16.gmra.mrb[40].mxu1 %v14269_v45  ;;  %v12823_v45 = vld [vmem:[#allocation9 + $0xec8] ss:$16 sps:$4 sm:$0xff]  }
 0x416   :  { %6180 = vmatprep.mubr.bf16.mxu0 %v14399_v61  ;;  %7531 = vmatprep.mubr.bf16.mxu1 %v14271_v39  ;;  %v12871_v39 = vld [vmem:[#allocation12 + $0x60] ss:$8 sps:$4 sm:$0xff]  }
 0x417   :  { %7671 = vmatpush1.bf16.msra.mxu1 %v12817_v4  ;;  %8451 = vmatprep.subr.bf16.mxu0 %v12867_v10  ;;  %v12876_v4 = vld [vmem:[#allocation12 + $0x74] ss:$8 sps:$4 sm:$0xff]  }
 0x418   :  { %7672 = vmatprep.subr.bf16.mxu1 %v12822_v3  ;;  %8452 = vmatpush1.bf16.msra.mxu0 %v12865_v36  ;;  %v12826_v10 = vld [vmem:[#allocation9 + $0xee8] ss:$16 sps:$4 sm:$0xff]   ;;  %v12831_v3 = vld [vmem:[#allocation9 + $0xf0c] ss:$16 sps:$4 sm:$0xff]  }
 0x419   :  { %8453 = vmatprep.subr.bf16.mxu0 %v12870_v59  ;;  %v12874_v36 = vld [vmem:[#allocation12 + $0x70] ss:$8 sps:$4 sm:$0xff]   ;;  %v14413_v59 = vcombine.low %v208_v21, %v216_v53 }
 0x41a   :  { %v240_v21 = vld [vmem:[#allocation6 + $0x338] sm:$0xff] }
 0x41b   :  { %7673 = vmatpush1.bf16.msra.mxu1 %v12820_v1  ;;  %v14415_v1 = vcombine.high %v224_v42, %v232_v51  ;;  %v248_v53 = vld [vmem:[#allocation6 + $0x378] sm:$0xff] }
 0x41c   :  { %7674 = vmatprep.subr.bf16.mxu1 %v12825_v41  ;;  %8454 = vmatpush1.bf16.msra.mxu0 %v12868_v55  ;;  %v12879_v41 = vld [vmem:[#allocation12 + $0x84] ss:$8 sps:$4 sm:$0xff]   ;;  %v12834_v55 = vld [vmem:[#allocation9 + $0xf2c] ss:$16 sps:$4 sm:$0xff]  }
 0x41d   :  { %6181 = vmatmul.mubr.bf16.gmra.mrb[12].mxu0 %v14405_v16  ;;  %7532 = vmatmul.mubr.bf16.gmra.mrb[44].mxu1 %v14277_v19  ;;  %v12829_v19 = vld [vmem:[#allocation9 + $0xf08] ss:$16 sps:$4 sm:$0xff]  }
 0x41e   :  { %6190 = vmatprep.mubr.bf16.mxu0 %v14407_v2  ;;  %7541 = vmatprep.mubr.bf16.mxu1 %v14279_v12  ;;  %v12877_v12 = vld [vmem:[#allocation12 + $0x80] ss:$8 sps:$4 sm:$0xff]  }
 0x41f   :  { %7675 = vmatpush1.bf16.msra.mxu1 %v12823_v45  ;;  %8455 = vmatprep.subr.bf16.mxu0 %v12873_v56  ;;  %v12882_v45 = vld [vmem:[#allocation12 + $0x94] ss:$8 sps:$4 sm:$0xff]  }
 0x420   :  { %7676 = vmatprep.subr.bf16.mxu1 %v12828_v34  ;;  %8456 = vmatpush1.bf16.msra.mxu0 %v12871_v39  ;;  %v12832_v56 = vld [vmem:[#allocation9 + $0xf28] ss:$16 sps:$4 sm:$0xff]   ;;  %v12837_v34 = vld [vmem:[#allocation9 + $0xf4c] ss:$16 sps:$4 sm:$0xff]  }
 0x421   :  { %8457 = vmatprep.subr.bf16.mxu0 %v12876_v4  ;;  %v12880_v39 = vld [vmem:[#allocation12 + $0x90] ss:$8 sps:$4 sm:$0xff]   ;;  %v14421_v4 = vcombine.low %v224_v42, %v232_v51 }
 0x422   :  { %v256_v42 = vld [vmem:[#allocation6 + $0x3b8] sm:$0xff] }
 0x423   :  { %7677 = vmatpush1.bf16.msra.mxu1 %v12826_v10  ;;  %v14423_v10 = vcombine.high %v240_v21, %v248_v53  ;;  %v264_v51 = vld [vmem:[#allocation6 + $0x3f8] sm:$0xff] }
 0x424   :  { %7678 = vmatprep.subr.bf16.mxu1 %v12831_v3  ;;  %8458 = vmatpush1.bf16.msra.mxu0 %v12874_v36  ;;  %v12840_v3 = vld [vmem:[#allocation9 + $0xf6c] ss:$16 sps:$4 sm:$0xff]   ;;  %v12885_v36 = vld [vmem:[#allocation12 + $0xa4] ss:$8 sps:$4 sm:$0xff]  }
 0x425   :  { %6191 = vmatmul.mubr.bf16.gmra.mrb[16].mxu0 %v14413_v59  ;;  %7542 = vmatmul.mubr.bf16.gmra.mrb[48].mxu1 %v14285_v15  ;;  %v12835_v15 = vld [vmem:[#allocation9 + $0xf48] ss:$16 sps:$4 sm:$0xff]  }
 0x426   :  { %6200 = vmatprep.mubr.bf16.mxu0 %v14415_v1  ;;  %7551 = vmatprep.mubr.bf16.mxu1 %v14287_v49  ;;  %v12883_v49 = vld [vmem:[#allocation12 + $0xa0] ss:$8 sps:$4 sm:$0xff]  }
 0x427   :  { %7679 = vmatpush1.bf16.msra.mxu1 %v12829_v19  ;;  %8459 = vmatprep.subr.bf16.mxu0 %v12879_v41  ;;  %v12838_v19 = vld [vmem:[#allocation9 + $0xf68] ss:$16 sps:$4 sm:$0xff]   ;;  %v12846_v41 = vld [vmem:[#allocation9 + $0xf8c] ss:$16 sps:$4 sm:$0xff]  }
 0x428   :  { %7680 = vmatprep.subr.bf16.mxu1 %v12834_v55  ;;  %8460 = vmatpush1.bf16.msra.mxu0 %v12877_v12  ;;  %v14429_v55 = vcombine.low %v240_v21, %v248_v53  ;;  %v14431_v12 = vcombine.high %v256_v42, %v264_v51  ;;  %v12850_v21 = vld [vmem:[#allocation9 + $0xfa8] ss:$16 sps:$4 sm:$0xff]   ;;  %v12858_v53 = vld [vmem:[#allocation9 + $0xfcc] ss:$16 sps:$4 sm:$0xff]  }
 0x429   :  { %8461 = vmatprep.subr.bf16.mxu0 %v12882_v45  ;;  %v12852_v45 = vld [vmem:[#allocation9 + $0xfac] ss:$16 sps:$4 sm:$0xff]  }
 0x42b   :  { %7681 = vmatpush1.bf16.msra.mxu1 %v12832_v56  ;;  %v12888_v56 = vld [vmem:[#allocation12 + $0xb4] ss:$8 sps:$4 sm:$0xff]  }
 0x42c   :  { %7682 = vmatprep.subr.bf16.mxu1 %v12837_v34  ;;  %8462 = vmatpush1.bf16.msra.mxu0 %v12880_v39  ;;  %v272_v34 = vld [vmem:[#allocation6 + $0x438] sm:$0xff] }
 0x42d   :  { %6201 = vmatmul.mubr.bf16.gmra.mrb[20].mxu0 %v14421_v4  ;;  %7552 = vmatmul.mubr.bf16.gmra.mrb[52].mxu1 %v14293_v8  ;;  %v12844_v8 = vld [vmem:[#allocation9 + $0xf88] ss:$16 sps:$4 sm:$0xff]  }
 0x42e   :  { %6210 = vmatprep.mubr.bf16.mxu0 %v14423_v10  ;;  %7561 = vmatprep.mubr.bf16.mxu1 %v14295_v38  ;;  %v12886_v38 = vld [vmem:[#allocation12 + $0xb0] ss:$8 sps:$4 sm:$0xff]  }
 0x42f   :  { %7683 = vmatpush1.bf16.msra.mxu1 %v12835_v15  ;;  %8463 = vmatprep.subr.bf16.mxu0 %v12885_v36  ;;  %v280_v39 = vld [vmem:[#allocation6 + $0x478] sm:$0xff]  ;;  %v14437_v15 = vcombine.low %v256_v42, %v264_v51  ;;  %v12891_v36 = vld [vmem:[#allocation12 + $0xc4] ss:$8 sps:$4 sm:$0xff]  }
 0x430   :  { %7684 = vmatprep.subr.bf16.mxu1 %v12840_v3  ;;  %8464 = vmatpush1.bf16.msra.mxu0 %v12883_v49  ;;  %v14439_v3 = vcombine.high %v272_v34, %v280_v39  ;;  %v12864_v49 = vld [vmem:[#allocation9 + $0xfec] ss:$16 sps:$4 sm:$0xff]   ;;  %v12862_v42 = vld [vmem:[#allocation9 + $0xfe8] ss:$16 sps:$4 sm:$0xff]   ;;  %v14445_v51 = vcombine.low %v272_v34, %v280_v39 }
 0x431   :  { %8465 = vmatprep.subr.bf16.mxu0 %v12888_v56  ;;  %v12895_v39 = vld [vmem:[#allocation12 + $0xe0] ss:$8 sps:$4 sm:$0xff]  }
 0x433   :  { %7685 = vmatpush1.bf16.msra.mxu1 %v12838_v19  ;;  %v288_v19 = vld [vmem:[#allocation6 + $0x4b8] sm:$0xff] }
 0x434   :  { %7686 = vmatprep.subr.bf16.mxu1 %v12846_v41  ;;  %8466 = vmatpush1.bf16.msra.mxu0 %v12886_v38  ;;  %v296_v41 = vld [vmem:[#allocation6 + $0x4f8] sm:$0xff] }
 0x435   :  { %6211 = vmatmul.mubr.bf16.gmra.mrb[24].mxu0 %v14429_v55  ;;  %7562 = vmatmul.mubr.bf16.gmra.mrb[56].mxu1 %v14301_v30  ;;  %v12856_v30 = vld [vmem:[#allocation9 + $0xfc8] ss:$16 sps:$4 sm:$0xff]   ;;  %v14453_v56 = vcombine.low %v288_v19, %v296_v41 }
 0x436   :  { %6220 = vmatprep.mubr.bf16.mxu0 %v14431_v12  ;;  %7571 = vmatprep.mubr.bf16.mxu1 %v14303_v35  ;;  %v12889_v35 = vld [vmem:[#allocation12 + $0xc0] ss:$8 sps:$4 sm:$0xff]   ;;  %v312_v38 = vld [vmem:[#allocation6 + $0x578] sm:$0xff] }
 0x437   :  { %7687 = vmatpush1.bf16.msra.mxu1 %v12844_v8  ;;  %8467 = vmatprep.subr.bf16.mxu0 %v12891_v36  ;;  %v14447_v8 = vcombine.high %v288_v19, %v296_v41  ;;  %v12900_v36 = vld [vmem:[#allocation12 + $0xf4] ss:$8 sps:$4 sm:$0xff]  }
 0x438   :  { %7688 = vmatprep.subr.bf16.mxu1 %v12852_v45  ;;  %8468 = vmatpush1.bf16.msra.mxu0 %v12889_v35  ;;  %v12894_v45 = vld [vmem:[#allocation12 + $0xd4] ss:$8 sps:$4 sm:$0xff]  }
 0x439   :  { %8469 = vmatprep.subr.bf16.mxu0 %v12894_v45  ;;  %v352_v19 = vld [vmem:[#allocation6 + $0x6b8] sm:$0xff] }
 0x43a   :  { %v360_v41 = vld [vmem:[#allocation6 + $0x6f8] sm:$0xff] }
 0x43b   :  { %7689 = vmatpush1.bf16.msra.mxu1 %v12850_v21  ;;  %v320_v21 = vld [vmem:[#allocation6 + $0x5b8] sm:$0xff]  ;;  %v14485_v45 = vcombine.low %v352_v19, %v360_v41 }
 0x43c   :  { %7690 = vmatprep.subr.bf16.mxu1 %v12858_v53 }
 0x43d   :  { %6221 = vmatmul.mubr.bf16.gmra.mrb[28].mxu0 %v14437_v15  ;;  %7572 = vmatmul.mubr.bf16.gmra.mrb[60].mxu1 %v14309_v9  ;;  %v12892_v9 = vld [vmem:[#allocation12 + $0xd0] ss:$8 sps:$4 sm:$0xff]  }
 0x43e   :  { %6230 = vmatprep.mubr.bf16.mxu0 %v14439_v3  ;;  %7581 = vmatprep.mubr.bf16.mxu1 %v14311_v60  ;;  %v304_v60 = vld [vmem:[#allocation6 + $0x538] sm:$0xff] }
 0x43f   :  { %7691 = vmatpush1.bf16.msra.mxu1 %v12856_v30  ;;  %8470 = vmatpush1.bf16.msra.mxu0 %v12892_v9  ;;  %v14455_v34 = vcombine.high %v304_v60, %v312_v38  ;;  %v14461_v53 = vcombine.low %v304_v60, %v312_v38  ;;  %v376_v9 = vld [vmem:[#allocation6 + $0x778] sm:$0xff] }
 0x440   :  { %7692 = vmatprep.subr.bf16.mxu1 %v12864_v49  ;;  %v344_v49 = vld [vmem:[#allocation6 + $0x678] sm:$0xff] }
 0x441   :  { %v392_v38 = vld [vmem:[#allocation6 + $0x7f8] sm:$0xff] }
 0x443   :  { %7693 = vmatpush1.bf16.msra.mxu1 %v12862_v42  ;;  %v14479_v42 = vcombine.high %v352_v19, %v360_v41 }
 0x445   :  { %6231 = vmatmul.mubr.bf16.gmra.mrb[32].mxu0 %v14445_v51  ;;  %7582 = vmatmul.mubr.bf16.gmra.mrb[64].mxu1 %v14317_v5  ;;  %v12897_v5 = vld [vmem:[#allocation12 + $0xe4] ss:$8 sps:$4 sm:$0xff]  }
 0x446   :  { %6240 = vmatprep.mubr.bf16.mxu0 %v14447_v8  ;;  %7591 = vmatprep.mubr.bf16.mxu1 %v14319_v11  ;;  %v328_v11 = vld [vmem:[#allocation6 + $0x5f8] sm:$0xff] }
 0x447   :  { %8471 = vmatprep.subr.bf16.mxu0 %v12897_v5  ;;  %v14463_v30 = vcombine.high %v320_v21, %v328_v11  ;;  %v14469_v35 = vcombine.low %v320_v21, %v328_v11 }
 0x448   :  { %8472 = vmatpush1.bf16.msra.mxu0 %v12895_v39 }
 0x449   :  { %8473 = vmatprep.subr.bf16.mxu0 %v12900_v36  ;;  %v12909_v36 = vld [vmem:[#allocation12 + $0x124] ss:$8 sps:$4 sm:$0xff]  }
 0x44d   :  { %6241 = vmatmul.mubr.bf16.gmra.mrb[36].mxu0 %v14453_v56  ;;  %7592 = vmatmul.mubr.bf16.gmra.mrb[68].mxu1 %v14325_v7  ;;  %v336_v7 = vld [vmem:[#allocation6 + $0x638] sm:$0xff] }
 0x44e   :  { %6250 = vmatprep.mubr.bf16.mxu0 %v14455_v34  ;;  %7601 = vmatprep.mubr.bf16.mxu1 %v14327_v29  ;;  %v14471_v29 = vcombine.high %v336_v7, %v344_v49 }
 0x455   :  { %6251 = vmatmul.mubr.bf16.gmra.mrb[40].mxu0 %v14461_v53  ;;  %7602 = vmatmul.mubr.bf16.gmra.mrb[72].mxu1 %v14333_v40  ;;  %v12898_v40 = vld [vmem:[#allocation12 + $0xf0] ss:$8 sps:$4 sm:$0xff]  }
 0x456   :  { %6260 = vmatprep.mubr.bf16.mxu0 %v14463_v30  ;;  %7611 = vmatprep.mubr.bf16.mxu1 %v14335_v6  ;;  %v14477_v6 = vcombine.low %v336_v7, %v344_v49  ;;  %v12904_v49 = vld [vmem:[#allocation12 + $0x110] ss:$8 sps:$4 sm:$0xff]  }
 0x457   :  { %8474 = vmatpush1.bf16.msra.mxu0 %v12898_v40 }
 0x45d   :  { %6261 = vmatmul.mubr.bf16.gmra.mrb[44].mxu0 %v14469_v35  ;;  %7612 = vmatmul.mubr.bf16.gmra.mrb[76].mxu1 %v14341_v33  ;;  %v368_v33 = vld [vmem:[#allocation6 + $0x738] sm:$0xff] }
 0x45e   :  { %6270 = vmatprep.mubr.bf16.mxu0 %v14471_v29  ;;  %7621 = vmatprep.mubr.bf16.mxu1 %v14343_v37  ;;  %v12903_v37 = vld [vmem:[#allocation12 + $0x104] ss:$8 sps:$4 sm:$0xff]   ;;  %v14487_v60 = vcombine.high %v368_v33, %v376_v9  ;;  %v14493_v39 = vcombine.low %v368_v33, %v376_v9 }
 0x45f   :  { %8636 = vmatprep.subr.bf16.mxu0 %v12903_v37  ;;  %v12907_v37 = vld [vmem:[#allocation12 + $0x120] ss:$8 sps:$4 sm:$0xff]  }
 0x465   :  { %6271 = vmatmul.mubr.bf16.gmra.mrb[48].mxu0 %v14477_v6  ;;  %7622 = vmatmul.mubr.bf16.gmra.mrb[80].mxu1 %v14349_v58  ;;  %v384_v58 = vld [vmem:[#allocation6 + $0x7b8] sm:$0xff] }
 0x466   :  { %6280 = vmatprep.mubr.bf16.mxu0 %v14479_v42  ;;  %7631 = vmatprep.mubr.bf16.mxu1 %v14351_v25  ;;  %v14495_v25 = vcombine.high %v384_v58, %v392_v38  ;;  %v14501_v5 = vcombine.low %v384_v58, %v392_v38 }
 0x46d   :  { %6281 = vmatmul.mubr.bf16.gmra.mrb[52].mxu0 %v14485_v45  ;;  %7632 = vmatmul.mubr.bf16.gmra.mrb[84].mxu1 %v14357_v43  ;;  %v132_v43 = vlaneseq }
 0x46e   :  { %6290 = vmatprep.mubr.bf16.mxu0 %v14487_v60  ;;  %7641 = vmatprep.mubr.bf16.mxu1 %v14359_v46 }
 0x46f   :  { %v14527_v46 = vshrl.u32 %v132_v43, 7  ;;  %vm14888_vm3 = vcmp.lt.s32.totalorder %v132_v43, 256  ;;  %vm14898_vm4 = vcmp.lt.s32.totalorder %v132_v43, 512 }
 0x475   :  { %6291 = vmatmul.mubr.bf16.gmra.mrb[56].mxu0 %v14493_v39  ;;  %7642 = vmatmul.mubr.bf16.gmra.mrb[88].mxu1 %v14365_v48  ;;  %v14530_v48 = vsub.s32 0, %v14527_v46 }
 0x476   :  { %6300 = vmatprep.mubr.bf16.mxu0 %v14495_v25  ;;  %7651 = vmatprep.mubr.bf16.mxu1 %v14367_v44  ;;  %v14532_v44 = vld [vmem:[#allocation11] sm:$0xf] }
 0x47d   :  { %6301 = vmatmul.mubr.bf16.gmra.mrb[60].mxu0 %v14501_v5  ;;  %7652 = vmatmul.mubr.bf16.gmra.mrb[92].mxu1 %v14373_v47  ;;  %v14535_v47 = vsub.s32 1, %v14527_v46 }
 0x47e   :  { %7694 = vmatprep.mubr.bf16.mxu1 %v14375_v14  ;;  %v14541_v14 = vrot.slane %v14532_v44, %v14530_v48 }
 0x485   :  { %7695 = vmatmul.mubr.bf16.vlgmr.msra.gmra.mrb[32].mxu1 %v14381_v0  ;;  %v14545_v0 = vrot.slane %v14532_v44, %v14535_v47 }
 0x486   :  { %7704 = vmatprep.mubr.bf16.mxu1 %v14383_v24 }
 0x48d   :  { %7705 = vmatmul.mubr.bf16.gmra.mrb[36].mxu1 %v14389_v57 }
 0x48e   :  { %7714 = vmatprep.mubr.bf16.mxu1 %v14391_v13 }
 0x495   :  { %7715 = vmatmul.mubr.bf16.gmra.mrb[40].mxu1 %v14397_v32 }
 0x496   :  { %7724 = vmatprep.mubr.bf16.mxu1 %v14399_v61 }
 0x49d   :  { %7725 = vmatmul.mubr.bf16.gmra.mrb[44].mxu1 %v14405_v16 }
 0x49e   :  { %7734 = vmatprep.mubr.bf16.mxu1 %v14407_v2 }
 0x4a5   :  { %7735 = vmatmul.mubr.bf16.gmra.mrb[48].mxu1 %v14413_v59 }
 0x4a6   :  { %7744 = vmatprep.mubr.bf16.mxu1 %v14415_v1 }
 0x4ad   :  { %7745 = vmatmul.mubr.bf16.gmra.mrb[52].mxu1 %v14421_v4 }
 0x4ae   :  { %7754 = vmatprep.mubr.bf16.mxu1 %v14423_v10 }
 0x4b5   :  { %7755 = vmatmul.mubr.bf16.gmra.mrb[56].mxu1 %v14429_v55 }
 0x4b6   :  { %7764 = vmatprep.mubr.bf16.mxu1 %v14431_v12 }
 0x4bd   :  { %7765 = vmatmul.mubr.bf16.gmra.mrb[60].mxu1 %v14437_v15 }
 0x4be   :  { %7774 = vmatprep.mubr.bf16.mxu1 %v14439_v3 }
 0x4c5   :  { %7775 = vmatmul.mubr.bf16.gmra.mrb[64].mxu1 %v14445_v51  ;;  %v12901_v51 = vld [vmem:[#allocation12 + $0x100] ss:$8 sps:$4 sm:$0xff]  }
 0x4c6   :  { %7784 = vmatprep.mubr.bf16.mxu1 %v14447_v8 }
 0x4cd   :  { %7785 = vmatmul.mubr.bf16.gmra.mrb[68].mxu1 %v14453_v56 }
 0x4ce   :  { %7794 = vmatprep.mubr.bf16.mxu1 %v14455_v34  ;;  %v12906_v34 = vld [vmem:[#allocation12 + $0x114] ss:$8 sps:$4 sm:$0xff]  }
 0x4d5   :  { %7795 = vmatmul.mubr.bf16.gmra.mrb[72].mxu1 %v14461_v53 }
 0x4d6   :  { %7804 = vmatprep.mubr.bf16.mxu1 %v14463_v30 }
 0x4d8   :  { %v6152_v24 = vpop.f32.mrb[0].mxu0 }
 0x4d9   :  { %v10976_v57 = vadd.f32 %v6152_v24, %v14541_v14  ;;  %v6154_v13 = vpop.f32.mrb[1].mxu0  ;;  %v12912_v24 = vld [vmem:[#allocation12 + $0x134] ss:$8 sps:$4 sm:$0xff]  }
 0x4da   :  { %v10977_v32 = vadd.f32 %v6154_v13, %v14545_v0  ;;  %v6156_v61 = vpop.f32.mrb[2].mxu0 }
 0x4db   :  { %v10978_v16 = vadd.f32 %v6156_v61, %v14541_v14  ;;  %v6158_v2 = vpop.f32.mrb[3].mxu0  ;;  %v7855_v1 = vmax.f32 %v10976_v57, 0.0  ;;  %v12910_v61 = vld [vmem:[#allocation12 + $0x130] ss:$8 sps:$4 sm:$0xff]  }
 0x4dc   :  { %v10979_v59 = vadd.f32 %v6158_v2, %v14545_v0  ;;  %v7856_v10 = vmax.f32 %v10977_v32, 0.0 }
 0x4dd   :  { %v7859_v4 = vmax.f32 %v10978_v16, 0.0  ;;  %7805 = vmatmul.mubr.bf16.gmra.mrb[76].mxu1 %v14469_v35 }
 0x4de   :  { %v7860_v55 = vmax.f32 %v10979_v59, 0.0  ;;  %7814 = vmatprep.mubr.bf16.mxu1 %v14471_v29  ;;  %v12915_v59 = vld [vmem:[#allocation12 + $0x144] ss:$8 sps:$4 sm:$0xff]  }
 0x4df   :  { %v7983_v12 = vpack.c.bf16 %v7859_v4, %v7855_v1 }
 0x4e0   :  { %v7984_v15 = vpack.c.bf16 %v7860_v55, %v7856_v10  ;;  %v6162_v3 = vpop.f32.mrb[4].mxu0 }
 0x4e1   :  { %v10980_v8 = vadd.f32 %v6162_v3, %v14541_v14  ;;  %v6164_v56 = vpop.f32.mrb[5].mxu0 }
 0x4e2   :  { %v10981_v21 = vadd.f32 %v6164_v56, %v14545_v0  ;;  %v6166_v11 = vpop.f32.mrb[6].mxu0  ;;  %8475 = vmatprep.mubr.bf16.mxu0 %v7984_v15  ;;  %10753 = vmatprep.subr.bf16.mxu1 %v7984_v15  ;;  %v12913_v15 = vld [vmem:[#allocation12 + $0x140] ss:$8 sps:$4 sm:$0xff]  }
 0x4e3   :  { %v10982_v53 = vadd.f32 %v6166_v11, %v14541_v14  ;;  %v6168_v30 = vpop.f32.mrb[7].mxu0  ;;  %8476 = vmatmul.mubr.bf16.vlgmr.msra.gmra.mrb[64].mxu0 %v7983_v12  ;;  %10755 = vmatpush1.bf16.msra.mxu1 %v7983_v12  ;;  %v7863_v35 = vmax.f32 %v10980_v8, 0.0  ;;  %v12918_v8 = vld [vmem:[#allocation12 + $0x154] ss:$8 sps:$4 sm:$0xff]   ;;  %v12916_v11 = vld [vmem:[#allocation12 + $0x150] ss:$8 sps:$4 sm:$0xff]  }
 0x4e4   :  { %v10983_v7 = vadd.f32 %v6168_v30, %v14545_v0  ;;  %8637 = vmatpush1.bf16.msra.mxu0 %v12901_v51  ;;  %v7864_v40 = vmax.f32 %v10981_v21, 0.0 }
 0x4e5   :  { %v7867_v29 = vmax.f32 %v10982_v53, 0.0  ;;  %7815 = vmatmul.mubr.bf16.gmra.mrb[80].mxu1 %v14477_v6  ;;  %8638 = vmatprep.subr.bf16.mxu0 %v12906_v34 }
 0x4e6   :  { %v7868_v19 = vmax.f32 %v10983_v7, 0.0  ;;  %7824 = vmatprep.mubr.bf16.mxu1 %v14479_v42  ;;  %v12921_v7 = vld [vmem:[#allocation12 + $0x164] ss:$8 sps:$4 sm:$0xff]  }
 0x4e7   :  { %v7987_v41 = vpack.c.bf16 %v7867_v29, %v7863_v35 }
 0x4e8   :  { %v7988_v33 = vpack.c.bf16 %v7868_v19, %v7864_v40  ;;  %v6172_v9 = vpop.f32.mrb[8].mxu0  ;;  %8639 = vmatpush1.bf16.msra.mxu0 %v12904_v49  ;;  %v12919_v19 = vld [vmem:[#allocation12 + $0x160] ss:$8 sps:$4 sm:$0xff]  }
 0x4e9   :  { %v10984_v58 = vadd.f32 %v6172_v9, %v14541_v14  ;;  %v6174_v38 = vpop.f32.mrb[9].mxu0  ;;  %8640 = vmatprep.subr.bf16.mxu0 %v12909_v36  ;;  %v12924_v9 = vld [vmem:[#allocation12 + $0x174] ss:$8 sps:$4 sm:$0xff]  }
 0x4ea   :  { %v10985_v57 = vadd.f32 %v6174_v38, %v14545_v0  ;;  %v6176_v13 = vpop.f32.mrb[10].mxu0  ;;  %8485 = vmatprep.mubr.bf16.mxu0 %v7988_v33  ;;  %10757 = vmatprep.subr.bf16.mxu1 %v7988_v33 }
 0x4eb   :  { %v10986_v6 = vadd.f32 %v6176_v13, %v14541_v14  ;;  %v6178_v32 = vpop.f32.mrb[11].mxu0  ;;  %8486 = vmatmul.mubr.bf16.gmra.mrb[68].mxu0 %v7987_v41  ;;  %10759 = vmatpush1.bf16.msra.mxu1 %v7987_v41  ;;  %v7871_v16 = vmax.f32 %v10984_v58, 0.0 }
 0x4ec   :  { %v10987_v42 = vadd.f32 %v6178_v32, %v14545_v0  ;;  %8641 = vmatpush1.bf16.msra.mxu0 %v12907_v37  ;;  %v7872_v1 = vmax.f32 %v10985_v57, 0.0 }
 0x4ed   :  { %v7875_v2 = vmax.f32 %v10986_v6, 0.0  ;;  %7825 = vmatmul.mubr.bf16.gmra.mrb[84].mxu1 %v14485_v45  ;;  %8642 = vmatprep.subr.bf16.mxu0 %v12912_v24  ;;  %v12922_v24 = vld [vmem:[#allocation12 + $0x170] ss:$8 sps:$4 sm:$0xff]   ;;  %v12927_v6 = vld [vmem:[#allocation12 + $0x184] ss:$8 sps:$4 sm:$0xff]  }
 0x4ee   :  { %v7876_v4 = vmax.f32 %v10987_v42, 0.0  ;;  %7834 = vmatprep.mubr.bf16.mxu1 %v14487_v60 }
 0x4ef   :  { %v7991_v10 = vpack.c.bf16 %v7875_v2, %v7871_v16 }
 0x4f0   :  { %v7992_v55 = vpack.c.bf16 %v7876_v4, %v7872_v1  ;;  %v6182_v12 = vpop.f32.mrb[12].mxu0  ;;  %8643 = vmatpush1.bf16.msra.mxu0 %v12910_v61 }
 0x4f1   :  { %v10988_v3 = vadd.f32 %v6182_v12, %v14541_v14  ;;  %v6184_v51 = vpop.f32.mrb[13].mxu0  ;;  %8644 = vmatprep.subr.bf16.mxu0 %v12915_v59  ;;  %v12925_v59 = vld [vmem:[#allocation12 + $0x180] ss:$8 sps:$4 sm:$0xff]  }
 0x4f2   :  { %v10989_v56 = vadd.f32 %v6184_v51, %v14545_v0  ;;  %v6186_v34 = vpop.f32.mrb[14].mxu0  ;;  %8495 = vmatprep.mubr.bf16.mxu0 %v7992_v55  ;;  %10761 = vmatprep.subr.bf16.mxu1 %v7992_v55  ;;  %v12928_v51 = vld [vmem:[#allocation12 + $0x190] ss:$8 sps:$4 sm:$0xff]  }
 0x4f3   :  { %v10990_v45 = vadd.f32 %v6186_v34, %v14541_v14  ;;  %v6188_v21 = vpop.f32.mrb[15].mxu0  ;;  %8496 = vmatmul.mubr.bf16.gmra.mrb[72].mxu0 %v7991_v10  ;;  %10763 = vmatpush1.bf16.msra.mxu1 %v7991_v10  ;;  %v7879_v53 = vmax.f32 %v10988_v3, 0.0  ;;  %v12930_v10 = vld [vmem:[#allocation12 + $0x194] ss:$8 sps:$4 sm:$0xff]   ;;  %v12933_v34 = vld [vmem:[#allocation12 + $0x1a4] ss:$8 sps:$4 sm:$0xff]  }
 0x4f4   :  { %v10991_v60 = vadd.f32 %v6188_v21, %v14545_v0  ;;  %8645 = vmatpush1.bf16.msra.mxu0 %v12913_v15  ;;  %v7880_v49 = vmax.f32 %v10989_v56, 0.0 }
 0x4f5   :  { %v7883_v30 = vmax.f32 %v10990_v45, 0.0  ;;  %7835 = vmatmul.mubr.bf16.gmra.mrb[88].mxu1 %v14493_v39  ;;  %8646 = vmatprep.subr.bf16.mxu0 %v12918_v8 }
 0x4f6   :  { %v7884_v35 = vmax.f32 %v10991_v60, 0.0  ;;  %7844 = vmatprep.mubr.bf16.mxu1 %v14495_v25 }
 0x4f7   :  { %v7995_v29 = vpack.c.bf16 %v7883_v30, %v7879_v53  ;;  %v12931_v30 = vld [vmem:[#allocation12 + $0x1a0] ss:$8 sps:$4 sm:$0xff]  }
 0x4f8   :  { %v7996_v36 = vpack.c.bf16 %v7884_v35, %v7880_v49  ;;  %v6192_v40 = vpop.f32.mrb[16].mxu0  ;;  %8647 = vmatpush1.bf16.msra.mxu0 %v12916_v11  ;;  %v12936_v35 = vld [vmem:[#allocation12 + $0x1b4] ss:$8 sps:$4 sm:$0xff]  }
 0x4f9   :  { %v10992_v41 = vadd.f32 %v6192_v40, %v14541_v14  ;;  %v6194_v33 = vpop.f32.mrb[17].mxu0  ;;  %8648 = vmatprep.subr.bf16.mxu0 %v12921_v7 }
 0x4fa   :  { %v10993_v37 = vadd.f32 %v6194_v33, %v14545_v0  ;;  %v6196_v58 = vpop.f32.mrb[18].mxu0  ;;  %8505 = vmatprep.mubr.bf16.mxu0 %v7996_v36  ;;  %10765 = vmatprep.subr.bf16.mxu1 %v7996_v36  ;;  %v12934_v33 = vld [vmem:[#allocation12 + $0x1b0] ss:$8 sps:$4 sm:$0xff]  }
 0x4fb   :  { %v10994_v39 = vadd.f32 %v6196_v58, %v14541_v14  ;;  %v6198_v38 = vpop.f32.mrb[19].mxu0  ;;  %8506 = vmatmul.mubr.bf16.gmra.mrb[76].mxu0 %v7995_v29  ;;  %10767 = vmatpush1.bf16.msra.mxu1 %v7995_v29  ;;  %v7887_v57 = vmax.f32 %v10992_v41, 0.0  ;;  %v12939_v58 = vld [vmem:[#allocation12 + $0x1c4] ss:$8 sps:$4 sm:$0xff]  }
 0x4fc   :  { %v10995_v25 = vadd.f32 %v6198_v38, %v14545_v0  ;;  %8649 = vmatpush1.bf16.msra.mxu0 %v12919_v19  ;;  %v7888_v32 = vmax.f32 %v10993_v37, 0.0 }
 0x4fd   :  { %v7891_v13 = vmax.f32 %v10994_v39, 0.0  ;;  %7845 = vmatmul.mubr.bf16.gmra.mrb[92].mxu1 %v14501_v5  ;;  %8650 = vmatprep.subr.bf16.mxu0 %v12924_v9 }
 0x4fe   :  { %v7892_v42 = vmax.f32 %v10995_v25, 0.0 }
 0x4ff   :  { %v7999_v61 = vpack.c.bf16 %v7891_v13, %v7887_v57  ;;  %v12937_v13 = vld [vmem:[#allocation12 + $0x1c0] ss:$8 sps:$4 sm:$0xff]  }
 0x500   :  { %v8000_v16 = vpack.c.bf16 %v7892_v42, %v7888_v32  ;;  %v6202_v2 = vpop.f32.mrb[20].mxu0  ;;  %8651 = vmatpush1.bf16.msra.mxu0 %v12922_v24  ;;  %v12942_v42 = vld [vmem:[#allocation12 + $0x1d4] ss:$8 sps:$4 sm:$0xff]  }
 0x501   :  { %v10996_v1 = vadd.f32 %v6202_v2, %v14541_v14  ;;  %v6204_v4 = vpop.f32.mrb[21].mxu0  ;;  %8652 = vmatprep.subr.bf16.mxu0 %v12927_v6 }
 0x502   :  { %v10997_v55 = vadd.f32 %v6204_v4, %v14545_v0  ;;  %v6206_v12 = vpop.f32.mrb[22].mxu0  ;;  %8515 = vmatprep.mubr.bf16.mxu0 %v8000_v16  ;;  %10769 = vmatprep.subr.bf16.mxu1 %v8000_v16  ;;  %v12940_v4 = vld [vmem:[#allocation12 + $0x1d0] ss:$8 sps:$4 sm:$0xff]  }
 0x503   :  { %v10998_v5 = vadd.f32 %v6206_v12, %v14541_v14  ;;  %v6208_v15 = vpop.f32.mrb[23].mxu0  ;;  %8516 = vmatmul.mubr.bf16.gmra.mrb[80].mxu0 %v7999_v61  ;;  %10771 = vmatpush1.bf16.msra.mxu1 %v7999_v61  ;;  %v7895_v8 = vmax.f32 %v10996_v1, 0.0  ;;  %v12945_v12 = vld [vmem:[#allocation12 + $0x1e4] ss:$8 sps:$4 sm:$0xff]  }
 0x504   :  { %v10999_v3 = vadd.f32 %v6208_v15, %v14545_v0  ;;  %8653 = vmatpush1.bf16.msra.mxu0 %v12925_v59  ;;  %v7896_v45 = vmax.f32 %v10997_v55, 0.0 }
 0x505   :  { %v7899_v56 = vmax.f32 %v10998_v5, 0.0  ;;  %8654 = vmatprep.subr.bf16.mxu0 %v12930_v10 }
 0x506   :  { %v7900_v21 = vmax.f32 %v10999_v3, 0.0  ;;  %v4882_v3 = vadd.f32 %v13701_v26, %v14541_v14 }
 0x507   :  { %v8003_v60 = vpack.c.bf16 %v7899_v56, %v7895_v8  ;;  %v4884_v8 = vadd.f32 %v13703_v27, %v14545_v0 }
 0x508   :  { %v8004_v11 = vpack.c.bf16 %v7900_v21, %v7896_v45  ;;  %v6212_v53 = vpop.f32.mrb[24].mxu0  ;;  %8655 = vmatpush1.bf16.msra.mxu0 %v12928_v51  ;;  %v12943_v45 = vld [vmem:[#allocation12 + $0x1e0] ss:$8 sps:$4 sm:$0xff]   ;;  %v4886_v21 = vadd.f32 %v13707_v28, %v14541_v14 }
 0x509   :  { %v11000_v7 = vadd.f32 %v6212_v53, %v14541_v14  ;;  %v6214_v49 = vpop.f32.mrb[25].mxu0  ;;  %8656 = vmatprep.subr.bf16.mxu0 %v12933_v34  ;;  %v12948_v53 = vld [vmem:[#allocation12 + $0x1f4] ss:$8 sps:$4 sm:$0xff]  }
 0x50a   :  { %v11001_v29 = vadd.f32 %v6214_v49, %v14545_v0  ;;  %v6216_v36 = vpop.f32.mrb[26].mxu0  ;;  %8525 = vmatprep.mubr.bf16.mxu0 %v8004_v11  ;;  %10773 = vmatprep.subr.bf16.mxu1 %v8004_v11 }
 0x50b   :  { %v11002_v40 = vadd.f32 %v6216_v36, %v14541_v14  ;;  %v6218_v19 = vpop.f32.mrb[27].mxu0  ;;  %8526 = vmatmul.mubr.bf16.gmra.mrb[84].mxu0 %v8003_v60  ;;  %10775 = vmatpush1.bf16.msra.mxu1 %v8003_v60  ;;  %v7903_v9 = vmax.f32 %v11000_v7, 0.0 }
 0x50c   :  { %v11003_v41 = vadd.f32 %v6218_v19, %v14545_v0  ;;  %8657 = vmatpush1.bf16.msra.mxu0 %v12931_v30  ;;  %v7904_v39 = vmax.f32 %v11001_v29, 0.0  ;;  %v4888_v30 = vadd.f32 %v13711_v63, %v14545_v0  ;;  %v12946_v29 = vld [vmem:[#allocation12 + $0x1f0] ss:$8 sps:$4 sm:$0xff]  }
 0x50d   :  { %v7907_v37 = vmax.f32 %v11002_v40, 0.0  ;;  %8658 = vmatprep.subr.bf16.mxu0 %v12936_v35 }
 0x50e   :  { %v7908_v38 = vmax.f32 %v11003_v41, 0.0  ;;  %v4892_v41 = vadd.f32 %v13717_v20, %v14541_v14 }
 0x50f   :  { %v8007_v25 = vpack.c.bf16 %v7907_v37, %v7903_v9 }
 0x510   :  { %v8008_v24 = vpack.c.bf16 %v7908_v38, %v7904_v39  ;;  %v6222_v57 = vpop.f32.mrb[28].mxu0  ;;  %8659 = vmatpush1.bf16.msra.mxu0 %v12934_v33  ;;  %v4894_v33 = vadd.f32 %v13719_v18, %v14545_v0 }
 0x511   :  { %v11004_v6 = vadd.f32 %v6222_v57, %v14541_v14  ;;  %v6224_v32 = vpop.f32.mrb[29].mxu0  ;;  %8660 = vmatprep.subr.bf16.mxu0 %v12939_v58  ;;  %v4896_v58 = vadd.f32 %v13723_v52, %v14541_v14  ;;  %v4902_v52 = vadd.f32 %v13733_v17, %v14541_v14 }
 0x512   :  { %v11005_v61 = vadd.f32 %v6224_v32, %v14545_v0  ;;  %v6226_v16 = vpop.f32.mrb[30].mxu0  ;;  %8535 = vmatprep.mubr.bf16.mxu0 %v8008_v24  ;;  %10777 = vmatprep.subr.bf16.mxu1 %v8008_v24 }
 0x513   :  { %v11006_v2 = vadd.f32 %v6226_v16, %v14541_v14  ;;  %v6228_v59 = vpop.f32.mrb[31].mxu0  ;;  %8536 = vmatmul.mubr.bf16.gmra.mrb[88].mxu0 %v8007_v25  ;;  %10779 = vmatpush1.bf16.msra.mxu1 %v8007_v25  ;;  %v7911_v10 = vmax.f32 %v11004_v6, 0.0  ;;  %v4898_v25 = vadd.f32 %v13727_v22, %v14545_v0  ;;  %v4904_v22 = vadd.f32 %v13735_v31, %v14545_v0 }
 0x514   :  { %v11007_v1 = vadd.f32 %v6228_v59, %v14545_v0  ;;  %8661 = vmatpush1.bf16.msra.mxu0 %v12937_v13  ;;  %v7912_v5 = vmax.f32 %v11005_v61, 0.0 }
 0x515   :  { %v7915_v55 = vmax.f32 %v11006_v2, 0.0  ;;  %8662 = vmatprep.subr.bf16.mxu0 %v12942_v42 }
 0x516   :  { %v7916_v15 = vmax.f32 %v11007_v1, 0.0  ;;  %v15210_v1 = vld [vmem:[#allocation27_spill] sm:$0xff] }
 0x517   :  { %v8011_v51 = vpack.c.bf16 %v7915_v55, %v7911_v10 }
 0x518   :  { %v8012_v56 = vpack.c.bf16 %v7916_v15, %v7912_v5  ;;  %v6232_v34 = vpop.f32.mrb[32].mxu0  ;;  %8663 = vmatpush1.bf16.msra.mxu0 %v12940_v4  ;;  %v4906_v4 = vadd.f32 %v15210_v1, %v14541_v14 }
 0x519   :  { %v11009_v60 = vadd.f32 %v6232_v34, %v4882_v3  ;;  %v6234_v11 = vpop.f32.mrb[33].mxu0  ;;  %8664 = vmatprep.subr.bf16.mxu0 %v12945_v12  ;;  %v15211_v12 = vld [vmem:[#allocation28_spill] sm:$0xff] }
 0x51a   :  { %v11011_v7 = vadd.f32 %v6234_v11, %v4884_v8  ;;  %v6236_v26 = vpop.f32.mrb[34].mxu0  ;;  %8545 = vmatprep.mubr.bf16.mxu0 %v8012_v56  ;;  %10781 = vmatprep.subr.bf16.mxu1 %v8012_v56  ;;  %v4908_v5 = vadd.f32 %v15211_v12, %v14545_v0 }
 0x51b   :  { %v11013_v49 = vadd.f32 %v6236_v26, %v4886_v21  ;;  %v6238_v27 = vpop.f32.mrb[35].mxu0  ;;  %8546 = vmatmul.mubr.bf16.gmra.mrb[92].mxu0 %v8011_v51  ;;  %10783 = vmatpush1.bf16.msra.mxu1 %v8011_v51  ;;  %v7919_v36 = vmax.f32 %v11009_v60, 0.0  ;;  %v15212_v21 = vld [vmem:[#allocation29_spill] sm:$0xff] }
 0x51c   :  { %v11015_v35 = vadd.f32 %v6238_v27, %v4888_v30  ;;  %8665 = vmatpush1.bf16.msra.mxu0 %v12943_v45  ;;  %v7920_v40 = vmax.f32 %v11011_v7, 0.0  ;;  %v4912_v60 = vadd.f32 %v15212_v21, %v14541_v14 }
 0x51d   :  { %v7923_v28 = vmax.f32 %v11013_v49, 0.0  ;;  %8666 = vmatprep.subr.bf16.mxu0 %v12948_v53  ;;  %v15213_v53 = vld [vmem:[#allocation30_spill] sm:$0xff]  ;;  %v15214_v49 = vld [vmem:[#allocation31_spill] sm:$0xff] }
 0x51e   :  { %v7924_v19 = vmax.f32 %v11015_v35, 0.0  ;;  %v4914_v30 = vadd.f32 %v15213_v53, %v14545_v0  ;;  %v4916_v27 = vadd.f32 %v15214_v49, %v14541_v14 }
 0x51f   :  { %v8015_v63 = vpack.c.bf16 %v7923_v28, %v7919_v36  ;;  %v15215_v36 = vld [vmem:[#allocation32_spill] sm:$0xff] }
 0x520   :  { %v8016_v9 = vpack.c.bf16 %v7924_v19, %v7920_v40  ;;  %v6242_v37 = vpop.f32.mrb[36].mxu0  ;;  %8667 = vmatpush1.bf16.msra.mxu0 %v12946_v29  ;;  %v4918_v28 = vadd.f32 %v15215_v36, %v14545_v0 }
 0x521   :  { %v11017_v39 = vadd.f32 %v6242_v37, %v4892_v41  ;;  %v6244_v38 = vpop.f32.mrb[37].mxu0 }
 0x522   :  { %v11019_v24 = vadd.f32 %v6244_v38, %v4894_v33  ;;  %v6246_v57 = vpop.f32.mrb[38].mxu0  ;;  %8555 = vmatprep.mubr.bf16.mxu0 %v8016_v9  ;;  %10785 = vmatprep.subr.bf16.mxu1 %v8016_v9  ;;  %v4922_v38 = vadd.f32 %v13765_v54, %v14541_v14 }
 0x523   :  { %v11021_v20 = vadd.f32 %v6246_v57, %v4896_v58  ;;  %v6248_v13 = vpop.f32.mrb[39].mxu0  ;;  %8556 = vmatmul.mubr.bf16.gmra.mrb[96].mxu0 %v8015_v63  ;;  %10787 = vmatpush1.bf16.msra.mxu1 %v8015_v63  ;;  %v7927_v6 = vmax.f32 %v11017_v39, 0.0 }
 0x524   :  { %v11023_v18 = vadd.f32 %v6248_v13, %v4898_v25  ;;  %v7928_v42 = vmax.f32 %v11019_v24, 0.0  ;;  %v4924_v24 = vadd.f32 %v13767_v50, %v14545_v0  ;;  %v4926_v13 = vadd.f32 %v13771_v62, %v14541_v14  ;;  %v15216_v62 = vld [vmem:[#allocation33_spill] sm:$0xff] }
 0x525   :  { %v7931_v32 = vmax.f32 %v11021_v20, 0.0  ;;  %v4932_v1 = vadd.f32 %v15216_v62, %v14541_v14 }
 0x526   :  { %v7932_v61 = vmax.f32 %v11023_v18, 0.0 }
 0x527   :  { %v8019_v16 = vpack.c.bf16 %v7931_v32, %v7927_v6  ;;  %v4928_v32 = vadd.f32 %v13775_v23, %v14545_v0 }
 0x528   :  { %v8020_v2 = vpack.c.bf16 %v7932_v61, %v7928_v42  ;;  %v6252_v59 = vpop.f32.mrb[40].mxu0 }
 0x529   :  { %v11025_v10 = vadd.f32 %v6252_v59, %v4902_v52  ;;  %v6254_v55 = vpop.f32.mrb[41].mxu0 }
 0x52a   :  { %v11027_v15 = vadd.f32 %v6254_v55, %v4904_v22  ;;  %v6256_v3 = vpop.f32.mrb[42].mxu0  ;;  %8565 = vmatprep.mubr.bf16.mxu0 %v8020_v2  ;;  %10789 = vmatprep.subr.bf16.mxu1 %v8020_v2 }
 0x52b   :  { %v11029_v51 = vadd.f32 %v6256_v3, %v4906_v4  ;;  %v6258_v17 = vpop.f32.mrb[43].mxu0  ;;  %8566 = vmatmul.mubr.bf16.gmra.mrb[100].mxu0 %v8019_v16  ;;  %10791 = vmatpush1.bf16.msra.mxu1 %v8019_v16  ;;  %v7935_v31 = vmax.f32 %v11025_v10, 0.0  ;;  %v15217_v10 = vld [vmem:[#allocation34_spill] sm:$0xff] }
 0x52c   :  { %v11031_v8 = vadd.f32 %v6258_v17, %v4908_v5  ;;  %v7936_v34 = vmax.f32 %v11027_v15, 0.0  ;;  %v4934_v23 = vadd.f32 %v15217_v10, %v14545_v0  ;;  %v15218_v5 = vld [vmem:[#allocation35_spill] sm:$0xff]  ;;  %v15219_v17 = vld [vmem:[#allocation36_spill] sm:$0xff]  ;;  %v921_v10 = vsub.s32 3, %v14527_v46 }
 0x52d   :  { %v7939_v56 = vmax.f32 %v11029_v51, 0.0  ;;  %v4936_v15 = vadd.f32 %v15218_v5, %v14541_v14 }
 0x52e   :  { %v7940_v45 = vmax.f32 %v11031_v8, 0.0  ;;  %v4938_v8 = vadd.f32 %v15219_v17, %v14545_v0 }
 0x52f   :  { %v8023_v11 = vpack.c.bf16 %v7939_v56, %v7935_v31 }
 0x530   :  { %v8024_v7 = vpack.c.bf16 %v7940_v45, %v7936_v34  ;;  %v6262_v26 = vpop.f32.mrb[44].mxu0 }
 0x531   :  { %v11033_v35 = vadd.f32 %v6262_v26, %v4912_v60  ;;  %v6264_v29 = vpop.f32.mrb[45].mxu0 }
 0x532   :  { %v11035_v40 = vadd.f32 %v6264_v29, %v4914_v30  ;;  %v6266_v19 = vpop.f32.mrb[46].mxu0  ;;  %8575 = vmatprep.mubr.bf16.mxu0 %v8024_v7  ;;  %10793 = vmatprep.subr.bf16.mxu1 %v8024_v7  ;;  %v15220_v7 = vld [vmem:[#allocation37_spill] sm:$0xff] }
 0x533   :  { %v11037_v41 = vadd.f32 %v6266_v19, %v4916_v27  ;;  %v6268_v63 = vpop.f32.mrb[47].mxu0  ;;  %8576 = vmatmul.mubr.bf16.gmra.mrb[104].mxu0 %v8023_v11  ;;  %10795 = vmatpush1.bf16.msra.mxu1 %v8023_v11  ;;  %v7943_v9 = vmax.f32 %v11033_v35, 0.0  ;;  %v4942_v26 = vadd.f32 %v15220_v7, %v14541_v14  ;;  %v15221_v27 = vld [vmem:[#allocation38_spill] sm:$0xff] }
 0x534   :  { %v11039_v33 = vadd.f32 %v6268_v63, %v4918_v28  ;;  %v7944_v58 = vmax.f32 %v11035_v40, 0.0  ;;  %v4944_v35 = vadd.f32 %v15221_v27, %v14545_v0  ;;  %v15222_v28 = vld [vmem:[#allocation39_spill] sm:$0xff]  ;;  %v15223_v63 = vld [vmem:[#allocation40_spill] sm:$0xff] }
 0x535   :  { %v7947_v37 = vmax.f32 %v11037_v41, 0.0  ;;  %v4946_v40 = vadd.f32 %v15222_v28, %v14541_v14 }
 0x536   :  { %v7948_v39 = vmax.f32 %v11039_v33, 0.0  ;;  %v4948_v33 = vadd.f32 %v15223_v63, %v14545_v0 }
 0x537   :  { %v8027_v25 = vpack.c.bf16 %v7947_v37, %v7943_v9 }
 0x538   :  { %v8028_v57 = vpack.c.bf16 %v7948_v39, %v7944_v58  ;;  %v6272_v20 = vpop.f32.mrb[48].mxu0 }
 0x539   :  { %v11041_v18 = vadd.f32 %v6272_v20, %v4922_v38  ;;  %v6274_v6 = vpop.f32.mrb[49].mxu0 }
 0x53a   :  { %v11043_v42 = vadd.f32 %v6274_v6, %v4924_v24  ;;  %v6276_v61 = vpop.f32.mrb[50].mxu0  ;;  %8585 = vmatprep.mubr.bf16.mxu0 %v8028_v57  ;;  %10797 = vmatprep.subr.bf16.mxu1 %v8028_v57 }
 0x53b   :  { %v11045_v52 = vadd.f32 %v6276_v61, %v4926_v13  ;;  %v6278_v54 = vpop.f32.mrb[51].mxu0  ;;  %8586 = vmatmul.mubr.bf16.gmra.mrb[108].mxu0 %v8027_v25  ;;  %10799 = vmatpush1.bf16.msra.mxu1 %v8027_v25  ;;  %v7951_v50 = vmax.f32 %v11041_v18, 0.0  ;;  %v15224_v13 = vld [vmem:[#allocation41_spill] sm:$0xff] }
 0x53c   :  { %v11047_v16 = vadd.f32 %v6278_v54, %v4928_v32  ;;  %v7952_v2 = vmax.f32 %v11043_v42, 0.0  ;;  %v4952_v18 = vadd.f32 %v15224_v13, %v14541_v14  ;;  %v15225_v32 = vld [vmem:[#allocation42_spill] sm:$0xff]  ;;  %v15226_v54 = vld [vmem:[#allocation43_spill] sm:$0xff] }
 0x53d   :  { %v7955_v22 = vmax.f32 %v11045_v52, 0.0  ;;  %v4954_v42 = vadd.f32 %v15225_v32, %v14545_v0 }
 0x53e   :  { %v7956_v59 = vmax.f32 %v11047_v16, 0.0  ;;  %v4956_v16 = vadd.f32 %v15226_v54, %v14541_v14 }
 0x53f   :  { %v8031_v4 = vpack.c.bf16 %v7955_v22, %v7951_v50 }
 0x540   :  { %v8032_v55 = vpack.c.bf16 %v7956_v59, %v7952_v2  ;;  %v6282_v12 = vpop.f32.mrb[52].mxu0  ;;  %v917_v2 = vsub.s32 2, %v14527_v46  ;;  %v15227_v59 = vld [vmem:[#allocation44_spill] sm:$0xff] }
 0x541   :  { %v11049_v3 = vadd.f32 %v6282_v12, %v4932_v1  ;;  %v6284_v51 = vpop.f32.mrb[53].mxu0  ;;  %v4958_v62 = vadd.f32 %v15227_v59, %v14545_v0 }
 0x542   :  { %v11051_v31 = vadd.f32 %v6284_v51, %v4934_v23  ;;  %v6286_v56 = vpop.f32.mrb[54].mxu0  ;;  %8595 = vmatprep.mubr.bf16.mxu0 %v8032_v55  ;;  %10801 = vmatprep.subr.bf16.mxu1 %v8032_v55  ;;  %v14662_v51 = vrot.slane %v14532_v44, %v921_v10 }
 0x543   :  { %v11053_v34 = vadd.f32 %v6286_v56, %v4936_v15  ;;  %v6288_v45 = vpop.f32.mrb[55].mxu0  ;;  %8596 = vmatmul.mubr.bf16.gmra.mrb[112].mxu0 %v8031_v4  ;;  %10803 = vmatpush1.bf16.msra.mxu1 %v8031_v4  ;;  %v7959_v60 = vmax.f32 %v11049_v3, 0.0  ;;  %v14657_v15 = vrot.slane %v14532_v44, %v917_v2 }
 0x544   :  { %v11055_v21 = vadd.f32 %v6288_v45, %v4938_v8  ;;  %v7960_v53 = vmax.f32 %v11051_v31, 0.0 }
 0x545   :  { %v7963_v11 = vmax.f32 %v11053_v34, 0.0 }
 0x546   :  { %v7964_v30 = vmax.f32 %v11055_v21, 0.0 }
 0x547   :  { %v8035_v49 = vpack.c.bf16 %v7963_v11, %v7959_v60 }
 0x548   :  { %v8036_v29 = vpack.c.bf16 %v7964_v30, %v7960_v53  ;;  %v6292_v36 = vpop.f32.mrb[56].mxu0 }
 0x549   :  { %v11057_v19 = vadd.f32 %v6292_v36, %v4942_v26  ;;  %v6294_v41 = vpop.f32.mrb[57].mxu0 }
 0x54a   :  { %v11059_v9 = vadd.f32 %v6294_v41, %v4944_v35  ;;  %v6296_v37 = vpop.f32.mrb[58].mxu0  ;;  %8605 = vmatprep.mubr.bf16.mxu0 %v8036_v29  ;;  %10805 = vmatprep.subr.bf16.mxu1 %v8036_v29 }
 0x54b   :  { %v11061_v58 = vadd.f32 %v6296_v37, %v4946_v40  ;;  %v6298_v39 = vpop.f32.mrb[59].mxu0  ;;  %8606 = vmatmul.mubr.bf16.gmra.mrb[116].mxu0 %v8035_v49  ;;  %10807 = vmatpush1.bf16.msra.mxu1 %v8035_v49  ;;  %v7967_v25 = vmax.f32 %v11057_v19, 0.0 }
 0x54c   :  { %v11063_v38 = vadd.f32 %v6298_v39, %v4948_v33  ;;  %v7968_v57 = vmax.f32 %v11059_v9, 0.0 }
 0x54d   :  { %v7971_v24 = vmax.f32 %v11061_v58, 0.0 }
 0x54e   :  { %v7972_v20 = vmax.f32 %v11063_v38, 0.0 }
 0x54f   :  { %v8039_v6 = vpack.c.bf16 %v7971_v24, %v7967_v25 }
 0x550   :  { %v8040_v61 = vpack.c.bf16 %v7972_v20, %v7968_v57  ;;  %v6302_v52 = vpop.f32.mrb[60].mxu0 }
 0x551   :  { %v11065_v50 = vadd.f32 %v6302_v52, %v4952_v18  ;;  %v6304_v22 = vpop.f32.mrb[61].mxu0 }
 0x552   :  { %v11067_v1 = vadd.f32 %v6304_v22, %v4954_v42  ;;  %v6306_v4 = vpop.f32.mrb[62].mxu0  ;;  %8615 = vmatprep.mubr.bf16.mxu0 %v8040_v61  ;;  %10809 = vmatprep.subr.bf16.mxu1 %v8040_v61 }
 0x553   :  { %v11069_v23 = vadd.f32 %v6306_v4, %v4956_v16  ;;  %v6308_v55 = vpop.f32.mrb[63].mxu0  ;;  %8616 = vmatmul.mubr.bf16.gmra.mrb[120].mxu0 %v8039_v6  ;;  %10811 = vmatpush1.bf16.msra.mxu1 %v8039_v6  ;;  %v7975_v5 = vmax.f32 %v11065_v50, 0.0 }
 0x554   :  { %v11071_v12 = vadd.f32 %v6308_v55, %v4958_v62  ;;  %v7976_v3 = vmax.f32 %v11067_v1, 0.0 }
 0x555   :  { %v7979_v14 = vmax.f32 %v11069_v23, 0.0 }
 0x556   :  { %v7980_v0 = vmax.f32 %v11071_v12, 0.0 }
 0x557   :  { %v8043_v17 = vpack.c.bf16 %v7979_v14, %v7975_v5 }
 0x558   :  { %v8044_v8 = vpack.c.bf16 %v7980_v0, %v7976_v3  ;;  %v7696_v31 = vpop.f32.mrb[32].mxu1 }
 0x559   :  { %v11072_v56 = vadd.f32 %v7696_v31, %v14657_v15  ;;  %v7698_v34 = vpop.f32.mrb[33].mxu1 }
 0x55a   :  { %v11073_v45 = vadd.f32 %v7698_v34, %v14662_v51  ;;  %v7700_v21 = vpop.f32.mrb[34].mxu1  ;;  %8625 = vmatprep.mubr.bf16.mxu0 %v8044_v8  ;;  %10813 = vmatprep.subr.bf16.mxu1 %v8044_v8 }
 0x55b   :  { %v11074_v60 = vadd.f32 %v7700_v21, %v14657_v15  ;;  %v7702_v11 = vpop.f32.mrb[35].mxu1  ;;  %8626 = vmatmul.mubr.bf16.gmra.mrb[124].mxu0 %v8043_v17  ;;  %10815 = vmatpush1.bf16.msra.mxu1 %v8043_v17  ;;  %v7857_v44 = vmax.f32 %v11072_v56, 0.0 }
 0x55c   :  { %v11075_v53 = vadd.f32 %v7702_v11, %v14662_v51  ;;  %v7858_v7 = vmax.f32 %v11073_v45, 0.0 }
 0x55d   :  { %v7861_v30 = vmax.f32 %v11074_v60, 0.0 }
 0x55e   :  { %v7862_v26 = vmax.f32 %v11075_v53, 0.0 }
 0x55f   :  { %v14668_v49 = vpack.c.bf16 %v7861_v30, %v7857_v44 }
 0x560   :  { %v7986_v27 = vpack.c.bf16 %v7862_v26, %v7858_v7  ;;  %v7706_v35 = vpop.f32.mrb[36].mxu1 }
 0x561   :  { %v11076_v29 = vadd.f32 %v7706_v35, %v14657_v15  ;;  %v7708_v36 = vpop.f32.mrb[37].mxu1 }
 0x562   :  { %v11077_v28 = vadd.f32 %v7708_v36, %v14662_v51  ;;  %v7710_v40 = vpop.f32.mrb[38].mxu1  ;;  %8668 = vmatprep.mubr.bf16.mxu0 %v7986_v27  ;;  %10817 = vmatprep.subr.bf16.mxu1 %v7986_v27 }
 0x563   :  { %v11078_v19 = vadd.f32 %v7710_v40, %v14657_v15  ;;  %v7712_v41 = vpop.f32.mrb[39].mxu1  ;;  %8669 = vmatmul.mubr.bf16.vlgmr.msra.gmra.mrb[64].mxu0 %v14668_v49  ;;  %v7865_v33 = vmax.f32 %v11076_v29, 0.0 }
 0x564   :  { %v11079_v63 = vadd.f32 %v7712_v41, %v14662_v51  ;;  %v7866_v37 = vmax.f32 %v11077_v28, 0.0 }
 0x565   :  { %v7869_v9 = vmax.f32 %v11078_v19, 0.0 }
 0x566   :  { %v7870_v58 = vmax.f32 %v11079_v63, 0.0 }
 0x567   :  { %v14675_v39 = vpack.c.bf16 %v7869_v9, %v7865_v33 }
 0x568   :  { %v14677_v38 = vpack.c.bf16 %v7870_v58, %v7866_v37  ;;  %v7716_v25 = vpop.f32.mrb[40].mxu1 }
 0x569   :  { %v11080_v24 = vadd.f32 %v7716_v25, %v14657_v15  ;;  %v7718_v57 = vpop.f32.mrb[41].mxu1 }
 0x56a   :  { %v11081_v20 = vadd.f32 %v7718_v57, %v14662_v51  ;;  %v7720_v13 = vpop.f32.mrb[42].mxu1  ;;  %8678 = vmatprep.mubr.bf16.mxu0 %v14677_v38 }
 0x56b   :  { %v11082_v18 = vadd.f32 %v7720_v13, %v14657_v15  ;;  %v7722_v6 = vpop.f32.mrb[43].mxu1  ;;  %8679 = vmatmul.mubr.bf16.gmra.mrb[68].mxu0 %v14675_v39  ;;  %v7873_v42 = vmax.f32 %v11080_v24, 0.0 }
 0x56c   :  { %v11083_v32 = vadd.f32 %v7722_v6, %v14662_v51  ;;  %v7874_v52 = vmax.f32 %v11081_v20, 0.0 }
 0x56d   :  { %v7877_v61 = vmax.f32 %v11082_v18, 0.0 }
 0x56e   :  { %v7878_v54 = vmax.f32 %v11083_v32, 0.0 }
 0x56f   :  { %v14685_v16 = vpack.c.bf16 %v7877_v61, %v7873_v42 }
 0x570   :  { %v14687_v50 = vpack.c.bf16 %v7878_v54, %v7874_v52  ;;  %v7726_v22 = vpop.f32.mrb[44].mxu1 }
 0x571   :  { %v11084_v59 = vadd.f32 %v7726_v22, %v14657_v15  ;;  %v7728_v62 = vpop.f32.mrb[45].mxu1 }
 0x572   :  { %v11085_v1 = vadd.f32 %v7728_v62, %v14662_v51  ;;  %v7730_v4 = vpop.f32.mrb[46].mxu1  ;;  %8688 = vmatprep.mubr.bf16.mxu0 %v14687_v50 }
 0x573   :  { %v11086_v23 = vadd.f32 %v7730_v4, %v14657_v15  ;;  %v7732_v55 = vpop.f32.mrb[47].mxu1  ;;  %8689 = vmatmul.mubr.bf16.gmra.mrb[72].mxu0 %v14685_v16  ;;  %v7881_v5 = vmax.f32 %v11084_v59, 0.0 }
 0x574   :  { %v11087_v12 = vadd.f32 %v7732_v55, %v14662_v51  ;;  %v7882_v3 = vmax.f32 %v11085_v1, 0.0 }
 0x575   :  { %v7885_v14 = vmax.f32 %v11086_v23, 0.0 }
 0x576   :  { %v7886_v0 = vmax.f32 %v11087_v12, 0.0 }
 0x577   :  { %v14695_v17 = vpack.c.bf16 %v7885_v14, %v7881_v5 }
 0x578   :  { %v14697_v8 = vpack.c.bf16 %v7886_v0, %v7882_v3  ;;  %v7736_v31 = vpop.f32.mrb[48].mxu1 }
 0x579   :  { %v11088_v56 = vadd.f32 %v7736_v31, %v14657_v15  ;;  %v7738_v34 = vpop.f32.mrb[49].mxu1 }
 0x57a   :  { %v11089_v45 = vadd.f32 %v7738_v34, %v14662_v51  ;;  %v7740_v21 = vpop.f32.mrb[50].mxu1  ;;  %8698 = vmatprep.mubr.bf16.mxu0 %v14697_v8 }
 0x57b   :  { %v11090_v60 = vadd.f32 %v7740_v21, %v14657_v15  ;;  %v7742_v11 = vpop.f32.mrb[51].mxu1  ;;  %8699 = vmatmul.mubr.bf16.gmra.mrb[76].mxu0 %v14695_v17  ;;  %v7889_v44 = vmax.f32 %v11088_v56, 0.0 }
 0x57c   :  { %v11091_v53 = vadd.f32 %v7742_v11, %v14662_v51  ;;  %v7890_v7 = vmax.f32 %v11089_v45, 0.0 }
 0x57d   :  { %v7893_v30 = vmax.f32 %v11090_v60, 0.0 }
 0x57e   :  { %v7894_v26 = vmax.f32 %v11091_v53, 0.0 }
 0x57f   :  { %v14705_v27 = vpack.c.bf16 %v7893_v30, %v7889_v44 }
 0x580   :  { %v14707_v35 = vpack.c.bf16 %v7894_v26, %v7890_v7  ;;  %v7746_v29 = vpop.f32.mrb[52].mxu1 }
 0x581   :  { %v11092_v36 = vadd.f32 %v7746_v29, %v14657_v15  ;;  %v7748_v28 = vpop.f32.mrb[53].mxu1 }
 0x582   :  { %v11093_v40 = vadd.f32 %v7748_v28, %v14662_v51  ;;  %v7750_v19 = vpop.f32.mrb[54].mxu1  ;;  %8708 = vmatprep.mubr.bf16.mxu0 %v14707_v35 }
 0x583   :  { %v11094_v41 = vadd.f32 %v7750_v19, %v14657_v15  ;;  %v7752_v63 = vpop.f32.mrb[55].mxu1  ;;  %8709 = vmatmul.mubr.bf16.gmra.mrb[80].mxu0 %v14705_v27  ;;  %v7897_v9 = vmax.f32 %v11092_v36, 0.0 }
 0x584   :  { %v11095_v33 = vadd.f32 %v7752_v63, %v14662_v51  ;;  %v7898_v58 = vmax.f32 %v11093_v40, 0.0 }
 0x585   :  { %v7901_v37 = vmax.f32 %v11094_v41, 0.0 }
 0x586   :  { %v7902_v25 = vmax.f32 %v11095_v33, 0.0 }
 0x587   :  { %v14715_v24 = vpack.c.bf16 %v7901_v37, %v7897_v9 }
 0x588   :  { %v14717_v57 = vpack.c.bf16 %v7902_v25, %v7898_v58  ;;  %v7756_v20 = vpop.f32.mrb[56].mxu1 }
 0x589   :  { %v11096_v13 = vadd.f32 %v7756_v20, %v14657_v15  ;;  %v7758_v18 = vpop.f32.mrb[57].mxu1 }
 0x58a   :  { %v11097_v6 = vadd.f32 %v7758_v18, %v14662_v51  ;;  %v7760_v32 = vpop.f32.mrb[58].mxu1  ;;  %8718 = vmatprep.mubr.bf16.mxu0 %v14717_v57 }
 0x58b   :  { %v11098_v42 = vadd.f32 %v7760_v32, %v14657_v15  ;;  %v7762_v61 = vpop.f32.mrb[59].mxu1  ;;  %8719 = vmatmul.mubr.bf16.gmra.mrb[84].mxu0 %v14715_v24  ;;  %v7905_v54 = vmax.f32 %v11096_v13, 0.0 }
 0x58c   :  { %v11099_v52 = vadd.f32 %v7762_v61, %v14662_v51  ;;  %v7906_v59 = vmax.f32 %v11097_v6, 0.0 }
 0x58d   :  { %v7909_v22 = vmax.f32 %v11098_v42, 0.0 }
 0x58e   :  { %v7910_v62 = vmax.f32 %v11099_v52, 0.0 }
 0x58f   :  { %v14725_v1 = vpack.c.bf16 %v7909_v22, %v7905_v54 }
 0x590   :  { %v14727_v4 = vpack.c.bf16 %v7910_v62, %v7906_v59  ;;  %v7766_v23 = vpop.f32.mrb[60].mxu1 }
 0x591   :  { %v11100_v55 = vadd.f32 %v7766_v23, %v14657_v15  ;;  %v7768_v12 = vpop.f32.mrb[61].mxu1 }
 0x592   :  { %v11101_v5 = vadd.f32 %v7768_v12, %v14662_v51  ;;  %v7770_v14 = vpop.f32.mrb[62].mxu1  ;;  %8728 = vmatprep.mubr.bf16.mxu0 %v14727_v4 }
 0x593   :  { %v11102_v3 = vadd.f32 %v7770_v14, %v14657_v15  ;;  %v7772_v0 = vpop.f32.mrb[63].mxu1  ;;  %8729 = vmatmul.mubr.bf16.gmra.mrb[88].mxu0 %v14725_v1  ;;  %v7913_v56 = vmax.f32 %v11100_v55, 0.0 }
 0x594   :  { %v11103_v31 = vadd.f32 %v7772_v0, %v14662_v51  ;;  %v7914_v45 = vmax.f32 %v11101_v5, 0.0 }
 0x595   :  { %v7917_v34 = vmax.f32 %v11102_v3, 0.0 }
 0x596   :  { %v7918_v21 = vmax.f32 %v11103_v31, 0.0 }
 0x597   :  { %v14735_v60 = vpack.c.bf16 %v7917_v34, %v7913_v56 }
 0x598   :  { %v14737_v11 = vpack.c.bf16 %v7918_v21, %v7914_v45  ;;  %v7776_v53 = vpop.f32.mrb[64].mxu1 }
 0x599   :  { %v11104_v44 = vadd.f32 %v7776_v53, %v14657_v15  ;;  %v7778_v30 = vpop.f32.mrb[65].mxu1 }
 0x59a   :  { %v11105_v7 = vadd.f32 %v7778_v30, %v14662_v51  ;;  %v7780_v26 = vpop.f32.mrb[66].mxu1  ;;  %8738 = vmatprep.mubr.bf16.mxu0 %v14737_v11 }
 0x59b   :  { %v11106_v29 = vadd.f32 %v7780_v26, %v14657_v15  ;;  %v7782_v36 = vpop.f32.mrb[67].mxu1  ;;  %8739 = vmatmul.mubr.bf16.gmra.mrb[92].mxu0 %v14735_v60  ;;  %v7921_v40 = vmax.f32 %v11104_v44, 0.0 }
 0x59c   :  { %v11107_v28 = vadd.f32 %v7782_v36, %v14662_v51  ;;  %v7922_v41 = vmax.f32 %v11105_v7, 0.0 }
 0x59d   :  { %v7925_v19 = vmax.f32 %v11106_v29, 0.0 }
 0x59e   :  { %v7926_v63 = vmax.f32 %v11107_v28, 0.0 }
 0x59f   :  { %v14745_v33 = vpack.c.bf16 %v7925_v19, %v7921_v40 }
 0x5a0   :  { %v14747_v9 = vpack.c.bf16 %v7926_v63, %v7922_v41  ;;  %v7786_v37 = vpop.f32.mrb[68].mxu1 }
 0x5a1   :  { %v11108_v58 = vadd.f32 %v7786_v37, %v14657_v15  ;;  %v7788_v25 = vpop.f32.mrb[69].mxu1 }
 0x5a2   :  { %v11109_v20 = vadd.f32 %v7788_v25, %v14662_v51  ;;  %v7790_v13 = vpop.f32.mrb[70].mxu1  ;;  %8748 = vmatprep.mubr.bf16.mxu0 %v14747_v9 }
 0x5a3   :  { %v11110_v18 = vadd.f32 %v7790_v13, %v14657_v15  ;;  %v7792_v6 = vpop.f32.mrb[71].mxu1  ;;  %8749 = vmatmul.mubr.bf16.gmra.mrb[128].mxu0 %v14745_v33  ;;  %v7929_v42 = vmax.f32 %v11108_v58, 0.0 }
 0x5a4   :  { %v11111_v32 = vadd.f32 %v7792_v6, %v14662_v51  ;;  %v7930_v52 = vmax.f32 %v11109_v20, 0.0 }
 0x5a5   :  { %v7933_v61 = vmax.f32 %v11110_v18, 0.0 }
 0x5a6   :  { %v7934_v54 = vmax.f32 %v11111_v32, 0.0 }
 0x5a7   :  { %v14755_v22 = vpack.c.bf16 %v7933_v61, %v7929_v42 }
 0x5a8   :  { %v14757_v59 = vpack.c.bf16 %v7934_v54, %v7930_v52  ;;  %v7796_v62 = vpop.f32.mrb[72].mxu1 }
 0x5a9   :  { %v11112_v23 = vadd.f32 %v7796_v62, %v14657_v15  ;;  %v7798_v55 = vpop.f32.mrb[73].mxu1 }
 0x5aa   :  { %v11113_v12 = vadd.f32 %v7798_v55, %v14662_v51  ;;  %v7800_v5 = vpop.f32.mrb[74].mxu1  ;;  %8758 = vmatprep.mubr.bf16.mxu0 %v14757_v59 }
 0x5ab   :  { %v11114_v14 = vadd.f32 %v7800_v5, %v14657_v15  ;;  %v7802_v3 = vpop.f32.mrb[75].mxu1  ;;  %8759 = vmatmul.mubr.bf16.gmra.mrb[132].mxu0 %v14755_v22  ;;  %v7937_v31 = vmax.f32 %v11112_v23, 0.0 }
 0x5ac   :  { %v11115_v0 = vadd.f32 %v7802_v3, %v14662_v51  ;;  %v7938_v34 = vmax.f32 %v11113_v12, 0.0 }
 0x5ad   :  { %v7941_v56 = vmax.f32 %v11114_v14, 0.0 }
 0x5ae   :  { %v7942_v45 = vmax.f32 %v11115_v0, 0.0 }
 0x5af   :  { %v14765_v21 = vpack.c.bf16 %v7941_v56, %v7937_v31 }
 0x5b0   :  { %v14767_v53 = vpack.c.bf16 %v7942_v45, %v7938_v34  ;;  %v7806_v44 = vpop.f32.mrb[76].mxu1 }
 0x5b1   :  { %v11116_v30 = vadd.f32 %v7806_v44, %v14657_v15  ;;  %v7808_v7 = vpop.f32.mrb[77].mxu1 }
 0x5b2   :  { %v11117_v26 = vadd.f32 %v7808_v7, %v14662_v51  ;;  %v7810_v29 = vpop.f32.mrb[78].mxu1  ;;  %8768 = vmatprep.mubr.bf16.mxu0 %v14767_v53 }
 0x5b3   :  { %v11118_v36 = vadd.f32 %v7810_v29, %v14657_v15  ;;  %v7812_v28 = vpop.f32.mrb[79].mxu1  ;;  %8769 = vmatmul.mubr.bf16.gmra.mrb[136].mxu0 %v14765_v21  ;;  %v7945_v19 = vmax.f32 %v11116_v30, 0.0 }
 0x5b4   :  { %v11119_v40 = vadd.f32 %v7812_v28, %v14662_v51  ;;  %v7946_v63 = vmax.f32 %v11117_v26, 0.0 }
 0x5b5   :  { %v7949_v41 = vmax.f32 %v11118_v36, 0.0 }
 0x5b6   :  { %v7950_v37 = vmax.f32 %v11119_v40, 0.0 }
 0x5b7   :  { %v14775_v58 = vpack.c.bf16 %v7949_v41, %v7945_v19 }
 0x5b8   :  { %v14777_v25 = vpack.c.bf16 %v7950_v37, %v7946_v63  ;;  %v7816_v20 = vpop.f32.mrb[80].mxu1 }
 0x5b9   :  { %v11120_v13 = vadd.f32 %v7816_v20, %v14657_v15  ;;  %v7818_v18 = vpop.f32.mrb[81].mxu1 }
 0x5ba   :  { %v11121_v6 = vadd.f32 %v7818_v18, %v14662_v51  ;;  %v7820_v32 = vpop.f32.mrb[82].mxu1  ;;  %8778 = vmatprep.mubr.bf16.mxu0 %v14777_v25 }
 0x5bb   :  { %v11122_v42 = vadd.f32 %v7820_v32, %v14657_v15  ;;  %v7822_v61 = vpop.f32.mrb[83].mxu1  ;;  %8779 = vmatmul.mubr.bf16.gmra.mrb[140].mxu0 %v14775_v58  ;;  %v7953_v54 = vmax.f32 %v11120_v13, 0.0 }
 0x5bc   :  { %v11123_v52 = vadd.f32 %v7822_v61, %v14662_v51  ;;  %v7954_v23 = vmax.f32 %v11121_v6, 0.0 }
 0x5bd   :  { %v7957_v62 = vmax.f32 %v11122_v42, 0.0 }
 0x5be   :  { %v7958_v55 = vmax.f32 %v11123_v52, 0.0 }
 0x5bf   :  { %v14785_v12 = vpack.c.bf16 %v7957_v62, %v7953_v54 }
 0x5c0   :  { %v14787_v5 = vpack.c.bf16 %v7958_v55, %v7954_v23  ;;  %v7826_v14 = vpop.f32.mrb[84].mxu1 }
 0x5c1   :  { %v11124_v3 = vadd.f32 %v7826_v14, %v14657_v15  ;;  %v7828_v0 = vpop.f32.mrb[85].mxu1 }
 0x5c2   :  { %v11125_v31 = vadd.f32 %v7828_v0, %v14662_v51  ;;  %v7830_v56 = vpop.f32.mrb[86].mxu1  ;;  %8788 = vmatprep.mubr.bf16.mxu0 %v14787_v5 }
 0x5c3   :  { %v11126_v34 = vadd.f32 %v7830_v56, %v14657_v15  ;;  %v7832_v45 = vpop.f32.mrb[87].mxu1  ;;  %8789 = vmatmul.mubr.bf16.gmra.mrb[144].mxu0 %v14785_v12  ;;  %v7961_v30 = vmax.f32 %v11124_v3, 0.0 }
 0x5c4   :  { %v11127_v44 = vadd.f32 %v7832_v45, %v14662_v51  ;;  %v7962_v26 = vmax.f32 %v11125_v31, 0.0 }
 0x5c5   :  { %v7965_v7 = vmax.f32 %v11126_v34, 0.0 }
 0x5c6   :  { %v7966_v29 = vmax.f32 %v11127_v44, 0.0 }
 0x5c7   :  { %v14795_v36 = vpack.c.bf16 %v7965_v7, %v7961_v30 }
 0x5c8   :  { %v14797_v28 = vpack.c.bf16 %v7966_v29, %v7962_v26  ;;  %v7836_v40 = vpop.f32.mrb[88].mxu1 }
 0x5c9   :  { %v11128_v19 = vadd.f32 %v7836_v40, %v14657_v15  ;;  %v7838_v41 = vpop.f32.mrb[89].mxu1 }
 0x5ca   :  { %v11129_v63 = vadd.f32 %v7838_v41, %v14662_v51  ;;  %v7840_v37 = vpop.f32.mrb[90].mxu1  ;;  %8798 = vmatprep.mubr.bf16.mxu0 %v14797_v28 }
 0x5cb   :  { %v11130_v20 = vadd.f32 %v7840_v37, %v14657_v15  ;;  %v7842_v13 = vpop.f32.mrb[91].mxu1  ;;  %8799 = vmatmul.mubr.bf16.gmra.mrb[148].mxu0 %v14795_v36  ;;  %v7969_v6 = vmax.f32 %v11128_v19, 0.0 }
 0x5cc   :  { %v11131_v18 = vadd.f32 %v7842_v13, %v14662_v51  ;;  %v7970_v42 = vmax.f32 %v11129_v63, 0.0 }
 0x5cd   :  { %v7973_v32 = vmax.f32 %v11130_v20, 0.0 }
 0x5ce   :  { %v7974_v61 = vmax.f32 %v11131_v18, 0.0 }
 0x5cf   :  { %v14805_v52 = vpack.c.bf16 %v7973_v32, %v7969_v6 }
 0x5d0   :  { %v14807_v54 = vpack.c.bf16 %v7974_v61, %v7970_v42  ;;  %v7846_v62 = vpop.f32.mrb[92].mxu1 }
 0x5d1   :  { %v11132_v23 = vadd.f32 %v7846_v62, %v14657_v15  ;;  %v7848_v55 = vpop.f32.mrb[93].mxu1 }
 0x5d2   :  { %v11133_v14 = vadd.f32 %v7848_v55, %v14662_v51  ;;  %v7850_v3 = vpop.f32.mrb[94].mxu1  ;;  %8808 = vmatprep.mubr.bf16.mxu0 %v14807_v54 }
 0x5d3   :  { %v11134_v0 = vadd.f32 %v7850_v3, %v14657_v15  ;;  %v7852_v31 = vpop.f32.mrb[95].mxu1  ;;  %8809 = vmatmul.mubr.bf16.gmra.mrb[152].mxu0 %v14805_v52  ;;  %v7977_v34 = vmax.f32 %v11132_v23, 0.0 }
 0x5d4   :  { %v11135_v56 = vadd.f32 %v7852_v31, %v14662_v51  ;;  %v7978_v44 = vmax.f32 %v11133_v14, 0.0 }
 0x5d5   :  { %v7981_v45 = vmax.f32 %v11134_v0, 0.0 }
 0x5d6   :  { %v7982_v30 = vmax.f32 %v11135_v56, 0.0 }
 0x5d7   :  { %v14815_v7 = vpack.c.bf16 %v7981_v45, %v7977_v34 }
 0x5d8   :  { %v14817_v26 = vpack.c.bf16 %v7982_v30, %v7978_v44 }
 0x5da   :  { %8818 = vmatprep.mubr.bf16.mxu0 %v14817_v26 }
 0x5db   :  { %8819 = vmatmul.mubr.bf16.gmra.mrb[156].mxu0 %v14815_v7 }
 0x5f6   :  { %v8557_v29 = vpop.f32.mrb[96].mxu0 }
 0x5f7   :  { %v8559_v40 = vpop.f32.mrb[97].mxu0 }
 0x5f8   :  { %v8561_v15 = vpop.f32.mrb[98].mxu0 }
 0x5f9   :  { %v8563_v19 = vpop.f32.mrb[99].mxu0 }
 0x5fe   :  { %v8567_v41 = vpop.f32.mrb[100].mxu0 }
 0x5ff   :  { %v8569_v63 = vpop.f32.mrb[101].mxu0 }
 0x600   :  { %v8571_v37 = vpop.f32.mrb[102].mxu0  ;;  %v8111_v63 = vld [vmem:[#allocation14] sm:$0x3] }
 0x601   :  { %v8573_v51 = vpop.f32.mrb[103].mxu0  ;;  %v13278_v37 = vmov 0  }
 0x602   :  { %12083 = vset.pattern.permute.xlu0 %v13278_v37  ;;  %v14823_v51 = vrot.slane %v8111_v63, %v14535_v47 }
 0x606   :  { %v8577_v20 = vpop.f32.mrb[104].mxu0 }
 0x607   :  { %v8579_v13 = vpop.f32.mrb[105].mxu0 }
 0x608   :  { %v8581_v18 = vpop.f32.mrb[106].mxu0 }
 0x609   :  { %v8583_v6 = vpop.f32.mrb[107].mxu0 }
 0x60e   :  { %v8587_v32 = vpop.f32.mrb[108].mxu0 }
 0x60f   :  { %v8589_v42 = vpop.f32.mrb[109].mxu0 }
 0x610   :  { %v8591_v61 = vpop.f32.mrb[110].mxu0 }
 0x611   :  { %v8593_v62 = vpop.f32.mrb[111].mxu0 }
 0x616   :  { %v8597_v23 = vpop.f32.mrb[112].mxu0 }
 0x617   :  { %v8599_v55 = vpop.f32.mrb[113].mxu0 }
 0x618   :  { %v8601_v14 = vpop.f32.mrb[114].mxu0 }
 0x619   :  { %v8603_v3 = vpop.f32.mrb[115].mxu0  ;;  %v14828_v14 = vrot.slane %v8111_v63, %v14530_v48 }
 0x61e   :  { %v8607_v0 = vpop.f32.mrb[116].mxu0 }
 0x61f   :  { %v8609_v31 = vpop.f32.mrb[117].mxu0 }
 0x620   :  { %v8611_v56 = vpop.f32.mrb[118].mxu0 }
 0x621   :  { %v8613_v34 = vpop.f32.mrb[119].mxu0 }
 0x626   :  { %v8617_v45 = vpop.f32.mrb[120].mxu0 }
 0x627   :  { %v8619_v44 = vpop.f32.mrb[121].mxu0 }
 0x628   :  { %v8621_v30 = vpop.f32.mrb[122].mxu0 }
 0x629   :  { %v8623_v29 = vpop.f32.mrb[123].mxu0 }
 0x62e   :  { %v8627_v40 = vpop.f32.mrb[124].mxu0 }
 0x62f   :  { %v8629_v15 = vpop.f32.mrb[125].mxu0 }
 0x630   :  { %v8631_v19 = vpop.f32.mrb[126].mxu0 }
 0x631   :  { %v8633_v41 = vpop.f32.mrb[127].mxu0 }
 0x636   :  { %v8670_v20 = vpop.f32.mrb[64].mxu0 }
 0x637   :  { %v8672_v13 = vpop.f32.mrb[65].mxu0  ;;  %v11136_v45 = vadd.f32 %v8670_v20, %v14828_v14 }
 0x638   :  { %v11137_v18 = vadd.f32 %v8672_v13, %v14823_v51  ;;  %v8674_v6 = vpop.f32.mrb[66].mxu0 }
 0x639   :  { %v8676_v32 = vpop.f32.mrb[67].mxu0  ;;  %v11138_v29 = vadd.f32 %v8674_v6, %v14828_v14 }
 0x63a   :  { %v10649_v42 = vmul.f32 -1.442695, %v11137_v18  ;;  %v11139_v61 = vadd.f32 %v8676_v32, %v14823_v51 }
 0x63c   :  { %12949 = vpow2.f32 %v10649_v42  ;;  %v10650_v62 = vmul.f32 -1.442695, %v11139_v61 }
 0x63e   :  { %12951 = vpow2.f32 %v10650_v62  ;;  %v8680_v23 = vpop.f32.mrb[68].mxu0 }
 0x63f   :  { %v8682_v55 = vpop.f32.mrb[69].mxu0  ;;  %v11140_v61 = vadd.f32 %v8680_v23, %v14828_v14 }
 0x640   :  { %v11141_v3 = vadd.f32 %v8682_v55, %v14823_v51  ;;  %v8684_v0 = vpop.f32.mrb[70].mxu0 }
 0x641   :  { %v8686_v31 = vpop.f32.mrb[71].mxu0  ;;  %v11142_v55 = vadd.f32 %v8684_v0, %v14828_v14  ;;  %v14840_v0 = vld [vmem:[#allocation15] ss:$0 sm:$0xff] }
 0x642   :  { %v10651_v56 = vmul.f32 -1.442695, %v11141_v3  ;;  %v11143_v34 = vadd.f32 %v8686_v31, %v14823_v51 }
 0x644   :  { %12953 = vpow2.f32 %v10651_v56  ;;  %v10652_v44 = vmul.f32 -1.442695, %v11143_v34 }
 0x646   :  { %v12950_v30 = vpop.eup %12949  ;;  %12955 = vpow2.f32 %v10652_v44  ;;  %v8690_v40 = vpop.f32.mrb[72].mxu0 }
 0x647   :  { %v8957_v15 = vadd.f32 1.0, %v12950_v30  ;;  %v8692_v19 = vpop.f32.mrb[73].mxu0  ;;  %12957 = vtanh.f32 %v11136_v45 }
 0x648   :  { %v12952_v41 = vpop.eup %12951  ;;  %v11145_v63 = vadd.f32 %v8692_v19, %v14823_v51  ;;  %v8694_v13 = vpop.f32.mrb[74].mxu0 }
 0x649   :  { %12959 = vrcp.f32 %v8957_v15  ;;  %v8958_v18 = vadd.f32 1.0, %v12952_v41  ;;  %v8696_v32 = vpop.f32.mrb[75].mxu0 }
 0x64a   :  { %12961 = vtanh.f32 %v11138_v29  ;;  %v10653_v42 = vmul.f32 -1.442695, %v11145_v63  ;;  %v11147_v20 = vadd.f32 %v8696_v32, %v14823_v51 }
 0x64b   :  { %12963 = vrcp.f32 %v8958_v18  ;;  %v11144_v18 = vadd.f32 %v8690_v40, %v14828_v14 }
 0x64c   :  { %12965 = vpow2.f32 %v10653_v42  ;;  %v10654_v6 = vmul.f32 -1.442695, %v11147_v20 }
 0x64e   :  { %v12954_v62 = vpop.eup %12953  ;;  %12967 = vpow2.f32 %v10654_v6  ;;  %v8700_v3 = vpop.f32.mrb[76].mxu0  ;;  %v11146_v6 = vadd.f32 %v8694_v13, %v14828_v14 }
 0x64f   :  { %v8959_v31 = vadd.f32 1.0, %v12954_v62  ;;  %v8702_v56 = vpop.f32.mrb[77].mxu0  ;;  %12969 = vtanh.f32 %v11140_v61 }
 0x650   :  { %v12956_v34 = vpop.eup %12955  ;;  %v11149_v45 = vadd.f32 %v8702_v56, %v14823_v51  ;;  %v8704_v44 = vpop.f32.mrb[78].mxu0 }
 0x651   :  { %12971 = vrcp.f32 %v8959_v31  ;;  %v8960_v30 = vadd.f32 1.0, %v12956_v34  ;;  %v8706_v29 = vpop.f32.mrb[79].mxu0  ;;  %v12958_v15 = vpop.eup %12957 }
 0x652   :  { %12973 = vtanh.f32 %v11142_v55  ;;  %v10655_v23 = vmul.f32 -1.442695, %v11149_v45  ;;  %v11151_v19 = vadd.f32 %v8706_v29, %v14823_v51 }
 0x653   :  { %v12960_v41 = vpop.eup %12959  ;;  %12975 = vrcp.f32 %v8960_v30 }
 0x654   :  { %v12962_v63 = vpop.eup %12961  ;;  %12977 = vpow2.f32 %v10655_v23  ;;  %v10656_v32 = vmul.f32 -1.442695, %v11151_v19  ;;  %v9053_v42 = vmul.f32 %v12960_v41, %v12958_v15 }
 0x655   :  { %v12964_v20 = vpop.eup %12963 }
 0x656   :  { %v12966_v61 = vpop.eup %12965  ;;  %12979 = vpow2.f32 %v10656_v32  ;;  %v8710_v62 = vpop.f32.mrb[80].mxu0  ;;  %v9092_v55 = vmul.f32 %v14840_v0, %v9053_v42  ;;  %v9054_v31 = vmul.f32 %v12964_v20, %v12962_v63  ;;  %v11148_v42 = vadd.f32 %v8700_v3, %v14828_v14 }
 0x657   :  { %v8961_v56 = vadd.f32 1.0, %v12966_v61  ;;  %v8712_v34 = vpop.f32.mrb[81].mxu0  ;;  %12981 = vtanh.f32 %v11144_v18 }
 0x658   :  { %v12968_v45 = vpop.eup %12967  ;;  %v11153_v30 = vadd.f32 %v8712_v34, %v14823_v51  ;;  %v8714_v29 = vpop.f32.mrb[82].mxu0  ;;  %9124 = vadd.xlane.f32.xlu0 %v9092_v55  ;;  %v9093_v41 = vmul.f32 %v14840_v0, %v9054_v31 }
 0x659   :  { %12983 = vrcp.f32 %v8961_v56  ;;  %v8962_v40 = vadd.f32 1.0, %v12968_v45  ;;  %v8716_v15 = vpop.f32.mrb[83].mxu0  ;;  %v12970_v23 = vpop.eup %12969  ;;  %v11150_v56 = vadd.f32 %v8704_v44, %v14828_v14 }
 0x65a   :  { %12985 = vtanh.f32 %v11146_v6  ;;  %v10657_v19 = vmul.f32 -1.442695, %v11153_v30  ;;  %v11155_v13 = vadd.f32 %v8716_v15, %v14823_v51 }
 0x65b   :  { %v12972_v32 = vpop.eup %12971  ;;  %12987 = vrcp.f32 %v8962_v40 }
 0x65c   :  { %v12974_v63 = vpop.eup %12973  ;;  %12989 = vpow2.f32 %v10657_v19  ;;  %v10658_v18 = vmul.f32 -1.442695, %v11155_v13  ;;  %9126 = vadd.xlane.f32.xlu0 %v9093_v41  ;;  %v9055_v20 = vmul.f32 %v12972_v32, %v12970_v23 }
 0x65d   :  { %v12976_v61 = vpop.eup %12975 }
 0x65e   :  { %v12978_v55 = vpop.eup %12977  ;;  %12991 = vpow2.f32 %v10658_v18  ;;  %v8720_v6 = vpop.f32.mrb[84].mxu0  ;;  %v9094_v34 = vmul.f32 %v14840_v0, %v9055_v20  ;;  %v9056_v45 = vmul.f32 %v12976_v61, %v12974_v63  ;;  %v11152_v20 = vadd.f32 %v8710_v62, %v14828_v14 }
 0x65f   :  { %v8963_v30 = vadd.f32 1.0, %v12978_v55  ;;  %v8722_v31 = vpop.f32.mrb[85].mxu0  ;;  %12993 = vtanh.f32 %v11148_v42 }
 0x660   :  { %v12980_v15 = vpop.eup %12979  ;;  %v11157_v40 = vadd.f32 %v8722_v31, %v14823_v51  ;;  %v8724_v3 = vpop.f32.mrb[86].mxu0  ;;  %9128 = vadd.xlane.f32.xlu1 %v9094_v34  ;;  %v9095_v32 = vmul.f32 %v14840_v0, %v9056_v45 }
 0x661   :  { %12995 = vrcp.f32 %v8963_v30  ;;  %v8964_v19 = vadd.f32 1.0, %v12980_v15  ;;  %v8726_v23 = vpop.f32.mrb[87].mxu0  ;;  %v12982_v13 = vpop.eup %12981  ;;  %v11154_v30 = vadd.f32 %v8714_v29, %v14828_v14 }
 0x662   :  { %12997 = vtanh.f32 %v11150_v56  ;;  %v10659_v41 = vmul.f32 -1.442695, %v11157_v40  ;;  %v11159_v44 = vadd.f32 %v8726_v23, %v14823_v51 }
 0x663   :  { %v12984_v18 = vpop.eup %12983  ;;  %12999 = vrcp.f32 %v8964_v19 }
 0x664   :  { %v12986_v63 = vpop.eup %12985  ;;  %13001 = vpow2.f32 %v10659_v41  ;;  %v10660_v42 = vmul.f32 -1.442695, %v11159_v44  ;;  %9130 = vadd.xlane.f32.xlu1 %v9095_v32  ;;  %v9057_v61 = vmul.f32 %v12984_v18, %v12982_v13 }
 0x665   :  { %v12988_v55 = vpop.eup %12987 }
 0x666   :  { %v12990_v34 = vpop.eup %12989  ;;  %13003 = vpow2.f32 %v10660_v42  ;;  %v8730_v56 = vpop.f32.mrb[88].mxu0  ;;  %v9096_v31 = vmul.f32 %v14840_v0, %v9057_v61  ;;  %v9058_v15 = vmul.f32 %v12988_v55, %v12986_v63 }
 0x667   :  { %v8965_v40 = vadd.f32 1.0, %v12990_v34  ;;  %v8732_v45 = vpop.f32.mrb[89].mxu0  ;;  %13005 = vtanh.f32 %v11152_v20  ;;  %v11156_v20 = vadd.f32 %v8720_v6, %v14828_v14 }
 0x668   :  { %v12992_v23 = vpop.eup %12991  ;;  %v11161_v19 = vadd.f32 %v8732_v45, %v14823_v51  ;;  %v8734_v62 = vpop.f32.mrb[90].mxu0  ;;  %9132 = vadd.xlane.f32.xlu0 %v9096_v31  ;;  %v9097_v41 = vmul.f32 %v14840_v0, %v9058_v15  ;;  %v11158_v15 = vadd.f32 %v8724_v3, %v14828_v14 }
 0x669   :  { %13007 = vrcp.f32 %v8965_v40  ;;  %v8966_v13 = vadd.f32 1.0, %v12992_v23  ;;  %v8736_v44 = vpop.f32.mrb[91].mxu0  ;;  %v12994_v32 = vpop.eup %12993 }
 0x66a   :  { %13009 = vtanh.f32 %v11154_v30  ;;  %v10661_v29 = vmul.f32 -1.442695, %v11161_v19  ;;  %v11163_v18 = vadd.f32 %v8736_v44, %v14823_v51  ;;  %9134 = vadd.xlane.f32.xlu1 %v9097_v41 }
 0x66b   :  { %v12996_v63 = vpop.eup %12995  ;;  %13011 = vrcp.f32 %v8966_v13 }
 0x66c   :  { %v12998_v42 = vpop.eup %12997  ;;  %13013 = vpow2.f32 %v10661_v29  ;;  %v10662_v61 = vmul.f32 -1.442695, %v11163_v18  ;;  %v9059_v55 = vmul.f32 %v12996_v63, %v12994_v32 }
 0x66d   :  { %v13000_v34 = vpop.eup %12999 }
 0x66e   :  { %v13002_v31 = vpop.eup %13001  ;;  %13015 = vpow2.f32 %v10662_v61  ;;  %v8740_v40 = vpop.f32.mrb[92].mxu0  ;;  %v9098_v30 = vmul.f32 %v14840_v0, %v9059_v55  ;;  %v9060_v45 = vmul.f32 %v13000_v34, %v12998_v42 }
 0x66f   :  { %v8967_v23 = vadd.f32 1.0, %v13002_v31  ;;  %v8742_v19 = vpop.f32.mrb[93].mxu0  ;;  %13017 = vtanh.f32 %v11156_v20  ;;  %v11160_v20 = vadd.f32 %v8730_v56, %v14828_v14 }
 0x670   :  { %v13004_v41 = vpop.eup %13003  ;;  %v11165_v13 = vadd.f32 %v8742_v19, %v14823_v51  ;;  %v8744_v44 = vpop.f32.mrb[94].mxu0  ;;  %9136 = vadd.xlane.f32.xlu0 %v9098_v30  ;;  %v9099_v6 = vmul.f32 %v14840_v0, %v9060_v45  ;;  %v11162_v45 = vadd.f32 %v8734_v62, %v14828_v14 }
 0x671   :  { %13019 = vrcp.f32 %v8967_v23  ;;  %v8968_v32 = vadd.f32 1.0, %v13004_v41  ;;  %v8746_v29 = vpop.f32.mrb[95].mxu0  ;;  %v13006_v18 = vpop.eup %13005 }
 0x672   :  { %13021 = vtanh.f32 %v11158_v15  ;;  %v10663_v3 = vmul.f32 -1.442695, %v11165_v13  ;;  %v11167_v63 = vadd.f32 %v8746_v29, %v14823_v51  ;;  %9138 = vadd.xlane.f32.xlu1 %v9099_v6 }
 0x673   :  { %v13008_v42 = vpop.eup %13007  ;;  %13023 = vrcp.f32 %v8968_v32 }
 0x674   :  { %v13010_v61 = vpop.eup %13009  ;;  %13025 = vpow2.f32 %v10663_v3  ;;  %v10664_v55 = vmul.f32 -1.442695, %v11167_v63  ;;  %v9061_v34 = vmul.f32 %v13008_v42, %v13006_v18  ;;  %v11164_v63 = vadd.f32 %v8740_v40, %v14828_v14 }
 0x675   :  { %v13012_v31 = vpop.eup %13011 }
 0x676   :  { %v13014_v30 = vpop.eup %13013  ;;  %13027 = vpow2.f32 %v10664_v55  ;;  %v8750_v23 = vpop.f32.mrb[128].mxu0  ;;  %v9100_v15 = vmul.f32 %v14840_v0, %v9061_v34  ;;  %v9062_v19 = vmul.f32 %v13012_v31, %v13010_v61 }
 0x677   :  { %v8969_v41 = vadd.f32 1.0, %v13014_v30  ;;  %v8752_v51 = vpop.f32.mrb[129].mxu0  ;;  %13029 = vtanh.f32 %v11160_v20  ;;  %v11166_v20 = vadd.f32 %v8744_v44, %v14828_v14 }
 0x678   :  { %v13016_v13 = vpop.eup %13015  ;;  %v8754_v6 = vpop.f32.mrb[130].mxu0  ;;  %9140 = vadd.xlane.f32.xlu0 %v9100_v15  ;;  %v9101_v56 = vmul.f32 %v14840_v0, %v9062_v19 }
 0x679   :  { %13031 = vrcp.f32 %v8969_v41  ;;  %v8970_v32 = vadd.f32 1.0, %v13016_v13  ;;  %v8756_v29 = vpop.f32.mrb[131].mxu0  ;;  %v13018_v18 = vpop.eup %13017 }
 0x67a   :  { %13033 = vtanh.f32 %v11162_v45  ;;  %9142 = vadd.xlane.f32.xlu1 %v9101_v56 }
 0x67b   :  { %v13020_v62 = vpop.eup %13019  ;;  %13035 = vrcp.f32 %v8970_v32 }
 0x67c   :  { %v13022_v3 = vpop.eup %13021  ;;  %v9063_v42 = vmul.f32 %v13020_v62, %v13018_v18  ;;  %13037 = vtanh.f32 %v11164_v63 }
 0x67d   :  { %v13024_v61 = vpop.eup %13023 }
 0x67e   :  { %v13026_v55 = vpop.eup %13025  ;;  %v8760_v34 = vpop.f32.mrb[132].mxu0  ;;  %v9102_v31 = vmul.f32 %v14840_v0, %v9063_v42  ;;  %v9064_v30 = vmul.f32 %v13024_v61, %v13022_v3 }
 0x67f   :  { %v8971_v23 = vadd.f32 1.0, %v13026_v55  ;;  %v8762_v15 = vpop.f32.mrb[133].mxu0 }
 0x680   :  { %v13028_v19 = vpop.eup %13027  ;;  %v8764_v45 = vpop.f32.mrb[134].mxu0  ;;  %9144 = vadd.xlane.f32.xlu0 %v9102_v31  ;;  %v9103_v41 = vmul.f32 %v14840_v0, %v9064_v30 }
 0x681   :  { %13039 = vrcp.f32 %v8971_v23  ;;  %v8972_v51 = vadd.f32 1.0, %v13028_v19  ;;  %v8766_v40 = vpop.f32.mrb[135].mxu0  ;;  %v13030_v13 = vpop.eup %13029 }
 0x682   :  { %13041 = vtanh.f32 %v11166_v20  ;;  %9146 = vadd.xlane.f32.xlu1 %v9103_v41 }
 0x683   :  { %v13032_v6 = vpop.eup %13031  ;;  %13043 = vrcp.f32 %v8972_v51 }
 0x684   :  { %v13034_v14 = vpop.eup %13033  ;;  %v9065_v44 = vmul.f32 %v13032_v6, %v13030_v13 }
 0x685   :  { %v13036_v56 = vpop.eup %13035 }
 0x686   :  { %v8770_v32 = vpop.f32.mrb[136].mxu0  ;;  %v9104_v29 = vmul.f32 %v14840_v0, %v9065_v44  ;;  %v9066_v18 = vmul.f32 %v13036_v56, %v13034_v14  ;;  %v13038_v61 = vpop.eup %13037 }
 0x687   :  { %v8772_v62 = vpop.f32.mrb[137].mxu0 }
 0x688   :  { %v8774_v3 = vpop.f32.mrb[138].mxu0  ;;  %9148 = vadd.xlane.f32.xlu0 %v9104_v29  ;;  %v9105_v63 = vmul.f32 %v14840_v0, %v9066_v18  ;;  %v9252_v18 = vld [vmem:[#allocation5] sm:$0x1] }
 0x689   :  { %v8776_v42 = vpop.f32.mrb[139].mxu0 }
 0x68a   :  { %9150 = vadd.xlane.f32.xlu1 %v9105_v63  ;;  %v13279_v63 = vmov -inf  }
 0x68b   :  { %v13040_v55 = vpop.eup %13039  ;;  %130 = vst.msk [vmem:[#allocation2] sm:$0x1] %vm129_vm0, %v13279_v63 }
 0x68c   :  { %v13042_v20 = vpop.eup %13041  ;;  %v9067_v34 = vmul.f32 %v13040_v55, %v13038_v61 }
 0x68d   :  { %v13044_v31 = vpop.eup %13043 }
 0x68e   :  { %v8780_v30 = vpop.f32.mrb[140].mxu0  ;;  %v9106_v23 = vmul.f32 %v14840_v0, %v9067_v34  ;;  %v9068_v15 = vmul.f32 %v13044_v31, %v13042_v20 }
 0x68f   :  { %v8782_v19 = vpop.f32.mrb[141].mxu0 }
 0x690   :  { %v8784_v45 = vpop.f32.mrb[142].mxu0  ;;  %9152 = vadd.xlane.f32.xlu0 %v9106_v23  ;;  %v9107_v41 = vmul.f32 %v14840_v0, %v9068_v15 }
 0x691   :  { %v8786_v51 = vpop.f32.mrb[143].mxu0 }
 0x692   :  { %9154 = vadd.xlane.f32.xlu1 %v9107_v41 }
 0x696   :  { %v8790_v40 = vpop.f32.mrb[144].mxu0 }
 0x697   :  { %v8792_v13 = vpop.f32.mrb[145].mxu0 }
 0x698   :  { %v8794_v6 = vpop.f32.mrb[146].mxu0 }
 0x699   :  { %v8796_v14 = vpop.f32.mrb[147].mxu0 }
 0x69e   :  { %v8800_v44 = vpop.f32.mrb[148].mxu0 }
 0x69f   :  { %v8802_v56 = vpop.f32.mrb[149].mxu0 }
 0x6a0   :  { %v8804_v32 = vpop.f32.mrb[150].mxu0 }
 0x6a1   :  { %v8806_v29 = vpop.f32.mrb[151].mxu0 }
 0x6a6   :  { %v8810_v62 = vpop.f32.mrb[152].mxu0  ;;  %9255 = vperm.xlu0 %12083, %v9252_v18  }
 0x6a7   :  { %v8812_v3 = vpop.f32.mrb[153].mxu0  ;;  %v13280_v62 = vmov 1966171168  }
 0x6a8   :  { %v8814_v42 = vpop.f32.mrb[154].mxu0  ;;  %v9279_v3 = vunpack.c.l.s4 %v13280_v62 }
 0x6a9   :  { %v8816_v0 = vpop.f32.mrb[155].mxu0  ;;  %v9266_v42 = vand.u32 127, %v132_v43 }
 0x6ab   :  { %vm9271_vm1 = vcmp.lt.s32.totalorder %v9266_v42, 8 }
 0x6ae   :  { %v8820_v61 = vpop.f32.mrb[156].mxu0 }
 0x6af   :  { %v8822_v55 = vpop.f32.mrb[157].mxu0  ;;  %v9280_v61 = vunpack.c.0.s8 %v9279_v3 }
 0x6b0   :  { %v8824_v20 = vpop.f32.mrb[158].mxu0 }
 0x6b1   :  { %v8826_v34 = vpop.f32.mrb[159].mxu0 }
 0x6b2   :  { %v14883_v34 = vsub.s32 %v9280_v61, %v14527_v46 }
 0x6e5   :  { %v9125_v31 = vpop.xlane.xlu0 %9124 }
 0x6e6   :  { %9188 = vxpose.xlu1.b32.start [1/16] (narrow) %v9125_v31, 8 }
 0x6e9   :  { %v9127_v30 = vpop.xlane.xlu0 %9126 }
 0x6ea   :  { %9189 = vxpose.xlu1.b32.cont [2/16] (narrow) %v9127_v30, 8 }
 0x6ed   :  { %v9129_v23 = vpop.xlane.xlu1 %9128 }
 0x6ee   :  { %9190 = vxpose.xlu1.b32.cont [3/16] (narrow) %v9129_v23, 8 }
 0x6f1   :  { %v9131_v15 = vpop.xlane.xlu1 %9130 }
 0x6f2   :  { %9191 = vxpose.xlu1.b32.cont [4/16] (narrow) %v9131_v15, 8 }
 0x6f5   :  { %v9133_v19 = vpop.xlane.xlu0 %9132 }
 0x6f6   :  { %9192 = vxpose.xlu1.b32.cont [5/16] (narrow) %v9133_v19, 8 }
 0x6f7   :  { %v9135_v45 = vpop.xlane.xlu1 %9134 }
 0x6fa   :  { %9193 = vxpose.xlu1.b32.cont [6/16] (narrow) %v9135_v45, 8  ;;  %v13281_v45 = vmov 0.0  }
 0x6fb   :  { %131 = vst.msk [vmem:[#allocation3] sm:$0x1] %vm129_vm0, %v13281_v45 }
 0x6fc   :  { %136 = vst.msk [vmem:[#allocation4] sm:$0xf] %vm14898_vm4, %v13281_v45 }
 0x6fd   :  { %v9137_v41 = vpop.xlane.xlu0 %9136 }
 0x6fe   :  { %9194 = vxpose.xlu1.b32.cont [7/16] (narrow) %v9137_v41, 8  ;;  %v9301_v41 = vld [vmem:[#allocation2] sm:$0x1] }
 0x6ff   :  { %v9139_v51 = vpop.xlane.xlu1 %9138 }
 0x702   :  { %9195 = vxpose.xlu1.b32.cont [8/16] (narrow) %v9139_v51, 8 }
 0x705   :  { %v9141_v40 = vpop.xlane.xlu0 %9140 }
 0x706   :  { %9196 = vxpose.xlu1.b32.cont [9/16] (narrow) %v9141_v40, 8 }
 0x707   :  { %v9143_v13 = vpop.xlane.xlu1 %9142 }
 0x70a   :  { %9197 = vxpose.xlu1.b32.cont [10/16] (narrow) %v9143_v13, 8 }
 0x70d   :  { %v9145_v6 = vpop.xlane.xlu0 %9144 }
 0x70e   :  { %9198 = vxpose.xlu1.b32.cont [11/16] (narrow) %v9145_v6, 8  ;;  %v9606_v6 = vld [vmem:[%s15188_s7 + $0x190] sm:$0xff] }
 0x70f   :  { %v9147_v14 = vpop.xlane.xlu1 %9146 }
 0x712   :  { %9199 = vxpose.xlu1.b32.cont [12/16] (narrow) %v9147_v14, 8 }
 0x715   :  { %v9149_v44 = vpop.xlane.xlu0 %9148 }
 0x716   :  { %9200 = vxpose.xlu1.b32.cont [13/16] (narrow) %v9149_v44, 8 }
 0x717   :  { %v9151_v56 = vpop.xlane.xlu1 %9150 }
 0x71a   :  { %9201 = vxpose.xlu1.b32.cont [14/16] (narrow) %v9151_v56, 8 }
 0x71d   :  { %v9153_v32 = vpop.xlane.xlu0 %9152 }
 0x71e   :  { %9202 = vxpose.xlu1.b32.cont [15/16] (narrow) %v9153_v32, 8 }
 0x71f   :  { %v9155_v29 = vpop.xlane.xlu1 %9154 }
 0x722   :  { %9203 = vxpose.xlu1.b32.end [16/16] (narrow) %v9155_v29, 8 }
 0x725   :  { %v9256_v18 = vpop.permute.xlu0 %9255 }
 0x726   :  { %v9261_v0 = vrot.slane %v9256_v18, %v14530_v48 }
 0x740   :  { %12084 = vset.pattern.permute.xlu1 %v13278_v37 }
 0x766   :  { %v9204_v55 = vpop.trf.xlu1 }
 0x767   :  { %v9262_v20 = vadd.f32 %v9261_v0, %v9204_v55 }
 0x769   :  { %v9273_v31 = vsel %vm9271_vm1, %v9262_v20, -inf }
 0x76a   :  { %v9277_v30 = vcombine.low %v9273_v31, %v13279_v63  ;;  %v9303_v23 = vsel %vm9302_vm2, %v9273_v31, -inf }
 0x76b   :  { %9306 = vmax.xlane.f32.xlu0 %v9303_v23 }
 0x76c   :  { %v9284_v37 = vrot.slane %v9277_v30, %v14883_v34  ;;  %v9565_v30 = vld [vmem:[%s15188_s7 + $0x48] sm:$0xff] }
 0x76e   :  { %v9291_v19 = vrot.slane %v9284_v37, %v14883_v34  ;;  %v9582_v37 = vld [vmem:[%s15188_s7 + $0xd0] sm:$0xff] }
 0x770   :  { %9300 = vst.msk [vmem:[#allocation19] sm:$0x3] %vm14888_vm3, %v9291_v19  ;;  %v9583_v19 = vld [vmem:[%s15188_s7 + $0xd8] sm:$0xff] }
 0x771   :  { %v10900_v45 = vpack.c.bf16 %v9583_v19, %v9582_v37 }
 0x7f8   :  { %v9307_v63 = vpop.xlane.xlu0 %9306 }
 0x7f9   :  { %v9308_v51 = vmax.f32 %v9301_v41, %v9307_v63  ;;  %v9567_v63 = vld [vmem:[%s15188_s7 + $0x58] sm:$0xff] }
 0x7fb   :  { %v9309_v40 = vsub.f32 %v9301_v41, %v9308_v51  ;;  %9523 = vst.msk [vmem:[#allocation2] sm:$0x1] %vm129_vm0, %v9308_v51  ;;  %9314 = vperm.xlu0 %12083, %v9308_v51   ;;  %v9566_v41 = vld [vmem:[%s15188_s7 + $0x50] sm:$0xff] }
 0x7fc   :  { %v10902_v51 = vpack.c.bf16 %v9567_v63, %v9566_v41  ;;  %v9610_v41 = vld [vmem:[%s15188_s7 + $0x1b0] sm:$0xff]  ;;  %v9611_v63 = vld [vmem:[%s15188_s7 + $0x1b8] sm:$0xff] }
 0x7fd   :  { %v9310_v13 = vmul.f32 1.442695, %v9309_v40  ;;  %v9584_v40 = vld [vmem:[%s15188_s7 + $0xe0] sm:$0xff] }
 0x7ff   :  { %13045 = vpow2.f32 %v9310_v13  ;;  %v9585_v13 = vld [vmem:[%s15188_s7 + $0xe8] sm:$0xff] }
 0x802   :  { %v9530_v44 = vld [vmem:[#allocation2] sm:$0x1] }
 0x809   :  { %v14904_v14 = vpop.eup %13045 }
 0x80a   :  { %9340 = vperm.xlu1 %12084, %v14904_v14  }
 0x80e   :  { %9533 = vperm.xlu1 %12084, %v9530_v44   ;;  %v10904_v44 = vpack.c.bf16 %v9585_v13, %v9584_v40  ;;  %v10924_v40 = vpack.c.bf16 %v9611_v63, %v9610_v41  ;;  %v9594_v13 = vld [vmem:[%s15188_s7 + $0x130] sm:$0xff] }
 0x87a   :  { %v9315_v56 = vpop.permute.xlu0 %9314 }
 0x87b   :  { %v9320_v32 = vrot.slane %v9315_v56, %v14530_v48  ;;  %v9569_v56 = vld [vmem:[%s15188_s7 + $0x68] sm:$0xff] }
 0x87d   :  { %v9321_v29 = vsub.f32 %v9273_v31, %v9320_v32  ;;  %v9322_v18 = vsub.f32 -inf, %v9320_v32  ;;  %v9564_v31 = vld [vmem:[%s15188_s7 + $0x40] sm:$0xff] }
 0x87e   :  { %v10898_v23 = vpack.c.bf16 %v9565_v30, %v9564_v31  ;;  %v9590_v30 = vld [vmem:[%s15188_s7 + $0x110] sm:$0xff] }
 0x87f   :  { %v9323_v62 = vmul.f32 1.442695, %v9321_v29  ;;  %v9325_v3 = vmul.f32 1.442695, %v9322_v18  ;;  %v9586_v18 = vld [vmem:[%s15188_s7 + $0xf0] sm:$0xff] }
 0x881   :  { %13047 = vpow2.f32 %v9323_v62  ;;  %v9587_v62 = vld [vmem:[%s15188_s7 + $0xf8] sm:$0xff] }
 0x882   :  { %13049 = vpow2.f32 %v9325_v3  ;;  %v10908_v3 = vpack.c.bf16 %v9587_v62, %v9586_v18  ;;  %v9596_v18 = vld [vmem:[%s15188_s7 + $0x140] sm:$0xff]  ;;  %v9597_v62 = vld [vmem:[%s15188_s7 + $0x148] sm:$0xff] }
 0x88b   :  { %v13048_v43 = vpop.eup %13047 }
 0x88c   :  { %v13050_v42 = vpop.eup %13049  ;;  %v9329_v0 = vsel %vm9302_vm2, %v13048_v43, 0.0 }
 0x88d   :  { %9412 = vmatprep.mubr.f32.mxu1 %v13050_v42  ;;  %v9330_v61 = vsel %vm9302_vm2, %v13050_v42, 0.0 }
 0x88e   :  { %9413 = vmatmul.mubr.f32.vlgmr.msra.gmra.mrb[96].mxu1 %v13048_v43  ;;  %v9331_v55 = vadd.f32 %v9330_v61, %v9329_v0  ;;  %v9604_v61 = vld [vmem:[%s15188_s7 + $0x180] sm:$0xff] }
 0x88f   :  { %10819 = vmatpush1.bf16.msra.mxu1 %v14668_v49  ;;  %9483 = vmatprep.mubr.f32.mxu1 %v13050_v42  ;;  %v9572_v49 = vld [vmem:[%s15188_s7 + $0x80] sm:$0xff]  ;;  %v9571_v42 = vld [vmem:[%s15188_s7 + $0x78] sm:$0xff] }
 0x890   :  { %10821 = vmatprep.subr.bf16.mxu1 %v14677_v38  ;;  %9332 = vadd.xlane.f32.xlu0 %v9331_v55  ;;  %v9556_v38 = vld [vmem:[%s15188_s7] sm:$0xff]  ;;  %v9605_v55 = vld [vmem:[%s15188_s7 + $0x188] sm:$0xff] }
 0x893   :  { %10823 = vmatpush1.bf16.msra.mxu1 %v14675_v39  ;;  %v9573_v39 = vld [vmem:[%s15188_s7 + $0x88] sm:$0xff] }
 0x894   :  { %10825 = vmatprep.subr.bf16.mxu1 %v14687_v50  ;;  %v9557_v50 = vld [vmem:[%s15188_s7 + $0x8] sm:$0xff] }
 0x897   :  { %10827 = vmatpush1.bf16.msra.mxu1 %v14685_v16  ;;  %v10880_v16 = vpack.c.bf16 %v9573_v39, %v9572_v49  ;;  %v10912_v49 = vpack.c.bf16 %v9605_v55, %v9604_v61  ;;  %v9598_v61 = vld [vmem:[%s15188_s7 + $0x150] sm:$0xff]  ;;  %v9599_v55 = vld [vmem:[%s15188_s7 + $0x158] sm:$0xff] }
 0x898   :  { %10829 = vmatprep.subr.bf16.mxu1 %v14697_v8  ;;  %v9575_v8 = vld [vmem:[%s15188_s7 + $0x98] sm:$0xff] }
 0x89b   :  { %10831 = vmatpush1.bf16.msra.mxu1 %v14695_v17  ;;  %v9574_v17 = vld [vmem:[%s15188_s7 + $0x90] sm:$0xff] }
 0x89c   :  { %10833 = vmatprep.subr.bf16.mxu1 %v14707_v35  ;;  %v10884_v35 = vpack.c.bf16 %v9575_v8, %v9574_v17 }
 0x89f   :  { %10835 = vmatpush1.bf16.msra.mxu1 %v14705_v27  ;;  %v10882_v27 = vpack.c.bf16 %v9557_v50, %v9556_v38  ;;  %v9341_v50 = vpop.permute.xlu1 %9340 }
 0x8a0   :  { %10837 = vmatprep.subr.bf16.mxu1 %v14717_v57  ;;  %v9559_v57 = vld [vmem:[%s15188_s7 + $0x18] sm:$0xff] }
 0x8a3   :  { %10839 = vmatpush1.bf16.msra.mxu1 %v14715_v24  ;;  %v9558_v24 = vld [vmem:[%s15188_s7 + $0x10] sm:$0xff]  ;;  %v9534_v17 = vpop.permute.xlu1 %9533 }
 0x8a4   :  { %10841 = vmatprep.subr.bf16.mxu1 %v14727_v4  ;;  %v9327_v4 = vld [vmem:[#allocation3] sm:$0x1]  ;;  %v9539_v8 = vrot.slane %v9534_v17, %v14530_v48  ;;  %v9601_v17 = vld [vmem:[%s15188_s7 + $0x168] sm:$0xff] }
 0x8a7   :  { %10843 = vmatpush1.bf16.msra.mxu1 %v14725_v1  ;;  %v10886_v1 = vpack.c.bf16 %v9559_v57, %v9558_v24 }
 0x8a8   :  { %10845 = vmatprep.subr.bf16.mxu1 %v14737_v11 }
 0x8ab   :  { %10847 = vmatpush1.bf16.msra.mxu1 %v14735_v60  ;;  %v9328_v60 = vmul.f32 %v14904_v14, %v9327_v4  ;;  %v9568_v14 = vld [vmem:[%s15188_s7 + $0x60] sm:$0xff]  ;;  %v9346_v4 = vrot.slane %v9341_v50, %v14530_v48 }
 0x8ac   :  { %10849 = vmatprep.subr.bf16.mxu1 %v14747_v9  ;;  %v9576_v9 = vld [vmem:[%s15188_s7 + $0xa0] sm:$0xff]  ;;  %v10906_v32 = vpack.c.bf16 %v9569_v56, %v9568_v14  ;;  %v9595_v14 = vld [vmem:[%s15188_s7 + $0x138] sm:$0xff]  ;;  %v9613_v56 = vld [vmem:[%s15188_s7 + $0x1c8] sm:$0xff] }
 0x8ad   :  { %v9600_v50 = vld [vmem:[%s15188_s7 + $0x160] sm:$0xff] }
 0x8af   :  { %10851 = vmatpush1.bf16.msra.mxu1 %v14745_v33 }
 0x8b0   :  { %10853 = vmatprep.subr.bf16.mxu1 %v14757_v59 }
 0x8b3   :  { %10855 = vmatpush1.bf16.msra.mxu1 %v14755_v22  ;;  %v9577_v22 = vld [vmem:[%s15188_s7 + $0xa8] sm:$0xff] }
 0x8b4   :  { %10857 = vmatprep.subr.bf16.mxu1 %v14767_v53  ;;  %v10888_v59 = vpack.c.bf16 %v9577_v22, %v9576_v9  ;;  %v9561_v53 = vld [vmem:[%s15188_s7 + $0x28] sm:$0xff] }
 0x8b7   :  { %10859 = vmatpush1.bf16.msra.mxu1 %v14765_v21  ;;  %v9560_v21 = vld [vmem:[%s15188_s7 + $0x20] sm:$0xff] }
 0x8b8   :  { %10861 = vmatprep.subr.bf16.mxu1 %v14777_v25  ;;  %v9578_v25 = vld [vmem:[%s15188_s7 + $0xb0] sm:$0xff] }
 0x8bb   :  { %10863 = vmatpush1.bf16.msra.mxu1 %v14775_v58  ;;  %v10890_v58 = vpack.c.bf16 %v9561_v53, %v9560_v21 }
 0x8bc   :  { %10865 = vmatprep.subr.bf16.mxu1 %v14787_v5 }
 0x8bf   :  { %10867 = vmatpush1.bf16.msra.mxu1 %v14785_v12  ;;  %v9579_v12 = vld [vmem:[%s15188_s7 + $0xb8] sm:$0xff] }
 0x8c0   :  { %10869 = vmatprep.subr.bf16.mxu1 %v14797_v28  ;;  %v10892_v5 = vpack.c.bf16 %v9579_v12, %v9578_v25  ;;  %v9563_v28 = vld [vmem:[%s15188_s7 + $0x38] sm:$0xff] }
 0x8c3   :  { %10871 = vmatpush1.bf16.msra.mxu1 %v14795_v36  ;;  %v9562_v36 = vld [vmem:[%s15188_s7 + $0x30] sm:$0xff] }
 0x8c4   :  { %10873 = vmatprep.subr.bf16.mxu1 %v14807_v54 }
 0x8c7   :  { %10875 = vmatpush1.bf16.msra.mxu1 %v14805_v52  ;;  %v10894_v52 = vpack.c.bf16 %v9563_v28, %v9562_v36  ;;  %v9588_v36 = vld [vmem:[%s15188_s7 + $0x100] sm:$0xff]  ;;  %v9589_v28 = vld [vmem:[%s15188_s7 + $0x108] sm:$0xff] }
 0x8c8   :  { %10877 = vmatprep.subr.bf16.mxu1 %v14817_v26  ;;  %v9581_v26 = vld [vmem:[%s15188_s7 + $0xc8] sm:$0xff] }
 0x8cb   :  { %10879 = vmatpush1.bf16.msra.mxu1 %v14815_v7  ;;  %v9580_v7 = vld [vmem:[%s15188_s7 + $0xc0] sm:$0xff] }
 0x8cc   :  { %10881 = vmatprep.subr.bf16.mxu1 %v10880_v16  ;;  %v10896_v20 = vpack.c.bf16 %v9581_v26, %v9580_v7 }
 0x8ce   :  { %9484 = vmatmul.mubr.f32.vlgmr.msra.gmra.mrb[98].mxu1 %v13048_v43  ;;  %v9570_v43 = vld [vmem:[%s15188_s7 + $0x70] sm:$0xff] }
 0x8cf   :  { %10883 = vmatpush3.bf16.msra.mxu1 %v10882_v27  ;;  %v10910_v0 = vpack.c.bf16 %v9571_v42, %v9570_v43  ;;  %v9529_v27 = vld [vmem:[#allocation19] sm:$0x3]  ;;  %v9615_v43 = vld [vmem:[%s15188_s7 + $0x1d8] sm:$0xff]  ;;  %v10930_v42 = vpack.c.bf16 %v9597_v62, %v9596_v18 }
 0x8d0   :  { %10885 = vmatprep.subr.bf16.mxu1 %v10884_v35  ;;  %v9540_v24 = vsub.f32 %v9529_v27, %v9539_v8  ;;  %v9618_v8 = vld [vmem:[%s15188_s7 + $0x1f0] sm:$0xff]  ;;  %v9619_v27 = vld [vmem:[%s15188_s7 + $0x1f8] sm:$0xff] }
 0x8d2   :  { %v9541_v9 = vmul.f32 1.442695, %v9540_v24  ;;  %v10940_v24 = vpack.c.bf16 %v9619_v27, %v9618_v8 }
 0x8d3   :  { %10887 = vmatpush3.bf16.msra.mxu1 %v10886_v1 }
 0x8d4   :  { %10889 = vmatprep.subr.bf16.mxu1 %v10888_v59 }
 0x8d7   :  { %10891 = vmatpush3.bf16.msra.mxu1 %v10890_v58 }
 0x8d8   :  { %10893 = vmatprep.subr.bf16.mxu1 %v10892_v5 }
 0x8db   :  { %10895 = vmatpush3.bf16.msra.mxu1 %v10894_v52 }
 0x8dc   :  { %10897 = vmatprep.subr.bf16.mxu1 %v10896_v20  ;;  %v10914_v20 = vpack.c.bf16 %v9589_v28, %v9588_v36 }
 0x8df   :  { %10899 = vmatpush3.bf16.msra.mxu1 %v10898_v23  ;;  %v9591_v23 = vld [vmem:[%s15188_s7 + $0x118] sm:$0xff] }
 0x8e0   :  { %10901 = vmatprep.subr.bf16.mxu1 %v10900_v45  ;;  %v10918_v37 = vpack.c.bf16 %v9591_v23, %v9590_v30  ;;  %v9592_v45 = vld [vmem:[%s15188_s7 + $0x120] sm:$0xff] }
 0x8e3   :  { %10903 = vmatpush3.bf16.msra.mxu1 %v10902_v51 }
 0x8e4   :  { %10905 = vmatprep.subr.bf16.mxu1 %v10904_v44  ;;  %v9612_v44 = vld [vmem:[%s15188_s7 + $0x1c0] sm:$0xff] }
 0x8e7   :  { %10907 = vmatpush3.bf16.msra.mxu1 %v10906_v32  ;;  %v10926_v32 = vpack.c.bf16 %v9595_v14, %v9594_v13 }
 0x8e8   :  { %10909 = vmatprep.subr.bf16.mxu1 %v10908_v3  ;;  %v9614_v3 = vld [vmem:[%s15188_s7 + $0x1d0] sm:$0xff] }
 0x8eb   :  { %10911 = vmatpush3.bf16.msra.mxu1 %v10910_v0  ;;  %v10932_v0 = vpack.c.bf16 %v9615_v43, %v9614_v3 }
 0x8ec   :  { %10913 = vmatprep.subr.bf16.mxu1 %v10912_v49  ;;  %v9616_v49 = vld [vmem:[%s15188_s7 + $0x1e0] sm:$0xff] }
 0x91d   :  { %v9333_v11 = vpop.xlane.xlu0 %9332 }
 0x91e   :  { %v9334_v33 = vadd.f32 %v9333_v11, %v9328_v60 }
 0x920   :  { %9336 = vst.msk [vmem:[#allocation3] sm:$0x1] %vm129_vm0, %v9334_v33  ;;  %v9337_v33 = vld [vmem:[#allocation4] sm:$0xf] }
 0x921   :  { %v9347_v59 = vmul.f32 %v9346_v4, %v9337_v33 }
 0x927   :  { %v9527_v54 = vld [vmem:[#allocation3] sm:$0x1] }
 0x928   :  { %13051 = vrcp.f32 %v9527_v54  ;;  %v9607_v54 = vld [vmem:[%s15188_s7 + $0x198] sm:$0xff] }
 0x929   :  { %13053 = vpow2.f32 %v9541_v9  ;;  %v10916_v31 = vpack.c.bf16 %v9607_v54, %v9606_v6 }
 0x932   :  { %v13052_v29 = vpop.eup %13051 }
 0x933   :  { %9545 = vperm.xlu0 %12083, %v13052_v29   ;;  %v13054_v12 = vpop.eup %13053  ;;  %v10928_v29 = vpack.c.bf16 %v9613_v56, %v9612_v44 }
 0x961   :  { %v9414_v39 = vpop.f32.mrb[96].mxu1 }
 0x962   :  { %v9416_v38 = vpop.f32.mrb[97].mxu1 }
 0x963   :  { %v9494_v16 = vcombine.low %v9414_v39, %v9416_v38  ;;  %v9617_v39 = vld [vmem:[%s15188_s7 + $0x1e8] sm:$0xff]  ;;  %v10934_v38 = vpack.c.bf16 %v9599_v55, %v9598_v61 }
 0x965   :  { %v9502_v60 = vrot.slane %v9494_v16, %v14883_v34  ;;  %v10936_v16 = vpack.c.bf16 %v9617_v39, %v9616_v49 }
 0x9a1   :  { %v9485_v35 = vpop.f32.mrb[98].mxu1 }
 0x9a2   :  { %v9487_v57 = vpop.f32.mrb[99].mxu1 }
 0x9a3   :  { %v9495_v1 = vcombine.low %v9485_v35, %v9487_v57  ;;  %v10938_v35 = vpack.c.bf16 %v9601_v17, %v9600_v50  ;;  %v9602_v57 = vld [vmem:[%s15188_s7 + $0x170] sm:$0xff] }
 0x9a5   :  { %v9509_v11 = vrot.slane %v9495_v1, %v14883_v34  ;;  %v9603_v1 = vld [vmem:[%s15188_s7 + $0x178] sm:$0xff] }
 0x9a6   :  { %v10942_v4 = vpack.c.bf16 %v9603_v1, %v9602_v57 }
 0x9a7   :  { %v9510_v22 = vcombine.low %v9502_v60, %v9509_v11 }
 0x9a9   :  { %v9517_v21 = vrot.slane %v9510_v22, %v14883_v34 }
 0x9ab   :  { %v9519_v53 = vadd.f32 %v9517_v21, %v9347_v59 }
 0x9ad   :  { %9522 = vst.msk [vmem:[#allocation4] sm:$0xf] %vm14898_vm4, %v9519_v53 }
 0x9b2   :  { %v9546_v58 = vpop.permute.xlu0 %9545 }
 0x9b3   :  { %v9551_v25 = vrot.slane %v9546_v58, %v14530_v48 }
 0x9b4   :  { %v9554_v5 = vld [vmem:[#allocation4] sm:$0xf] }
 0x9b5   :  { %v9552_v52 = vmul.f32 %v13054_v12, %v9551_v25  ;;  %v15059_v34 = vmul.f32 %v9554_v5, %v9551_v25 }
 0x9b7   :  { %9553 = vst.msk [vmem:[#allocation19] sm:$0x3] %vm14888_vm3, %v9552_v52  ;;  %v9629_v7 = vrot.slane %v15059_v34, %v14535_v47  ;;  %v9625_v26 = vrot.slane %v15059_v34, %v14530_v48  ;;  %v9637_v15 = vrot.slane %v15059_v34, %v921_v10  ;;  %v9608_v47 = vld [vmem:[%s15188_s7 + $0x1a0] sm:$0xff]  ;;  %v9609_v48 = vld [vmem:[%s15188_s7 + $0x1a8] sm:$0xff]  ;;  %v9633_v60 = vrot.slane %v15059_v34, %v917_v2 }
 0x9b8   :  { %v10920_v19 = vpack.c.bf16 %v9609_v48, %v9608_v47  ;;  %v9593_v10 = vld [vmem:[%s15188_s7 + $0x128] sm:$0xff] }
 0x9b9   :  { %9706 = vmatprep.mubr.f32.mxu1 %v9629_v7  ;;  %v10922_v51 = vpack.c.bf16 %v9593_v10, %v9592_v45 }
 0x9ba   :  { %9707 = vmatmul.mubr.f32.vlgmr.msra.gmra.mrb[100].mxu1 %v9625_v26 }
 0x9bb   :  { %10915 = vmatpush3.bf16.msra.mxu1 %v10914_v20  ;;  %9776 = vmatprep.mubr.f32.mxu1 %v9637_v15 }
 0x9bc   :  { %10917 = vmatprep.subr.bf16.mxu1 %v10916_v31 }
 0x9bf   :  { %10919 = vmatpush3.bf16.msra.mxu1 %v10918_v37 }
 0x9c0   :  { %10921 = vmatprep.subr.bf16.mxu1 %v10920_v19 }
 0x9c3   :  { %10923 = vmatpush3.bf16.msra.mxu1 %v10922_v51 }
 0x9c4   :  { %10925 = vmatprep.subr.bf16.mxu1 %v10924_v40 }
 0x9c7   :  { %10927 = vmatpush3.bf16.msra.mxu1 %v10926_v32 }
 0x9c8   :  { %10929 = vmatprep.subr.bf16.mxu1 %v10928_v29 }
 0x9cb   :  { %10931 = vmatpush3.bf16.msra.mxu1 %v10930_v42 }
 0x9cc   :  { %10933 = vmatprep.subr.bf16.mxu1 %v10932_v0 }
 0x9cf   :  { %10935 = vmatpush3.bf16.msra.mxu1 %v10934_v38 }
 0x9d0   :  { %10937 = vmatprep.subr.bf16.mxu1 %v10936_v16 }
 0x9d3   :  { %10939 = vmatpush3.bf16.msra.mxu1 %v10938_v35 }
 0x9d4   :  { %10941 = vmatprep.subr.bf16.mxu1 %v10940_v24 }
 0x9d7   :  { %10943 = vmatpush3.bf16.msra.mxu1 %v10942_v4 }
 0x9da   :  { %9777 = vmatmul.mubr.f32.vlgmr.msra.gmra.mrb[102].mxu1 %v9633_v60 }
 0x9db   :  { %13220 = shalt.err (!%p13217_p4)
}
 0x9dc   :  { %s13221_s28 = scalar_lea.hbm %s15191_s10, 32 }
 0x9dd   :  { %p13222_p5 = scmp.ne.s32.totalorder %s15191_s10, %s13221_s28  ;;  %p13225_p6 = scmp.lt.u32.totalorder %s13221_s28, %s15191_s10 }
 0x9df   :  { %p13227_p7 = pnand %p13225_p6, %p13222_p5 }
 0x9e1   :  { %13230 = shalt.err (!%p13227_p7)
}
 0x9e2   :  { %9803 = dma.vmem_to_hbm [thread:$0]  %s9801_s24, 32, %s15191_s10, [#allocation20]   ;;  %v9620_v33 = vld [vmem:[#allocation17] sm:$0x1]  ;;  %vm9782_vm5 = vcmask 73728  }
 0x9e3   :  { %s13283_s12 = smov [#allocation18]  }
 0x9e4   :  { %s9790_s8 = sshll.u32 %s13283_s12, 4  ;;  %s9791_s8 = int_to_ptr.vmem [resolvable:$true] %s9790_s8 }
 0x9e5   :  { %s13231_s13 = scalar_lea.vmem %s9791_s8, 16  ;;  %s13235_s0 = scalar_lea.vmem %s9791_s8, 32 }
 0x9e6   :  { %p13232_p8 = scmp.ne.s32.totalorder %s9791_s8, %s13231_s13  ;;  %p13236_p9 = scmp.lt.s32.totalorder %s9791_s8, %s9791_s8 }
 0x9e7   :  { %p13237_p10 = scmp.lt.s32.totalorder %s13235_s0, %s13231_s13 }
 0x9e9   :  { %p13238_p11 = por %p13237_p10, %p13236_p9 }
 0x9eb   :  { %p13239_p12 = pnand %p13238_p11, %p13232_p8 }
 0xa8d   :  { %v10714_v46 = vpop.f32.mrb[100].mxu1 }
 0xa8e   :  { %v10715_v2 = vpop.f32.mrb[101].mxu1 }
 0xa8f   :  { %v10716_v11 = vadd.f32 %v10715_v2, %v10714_v46 }
 0xa91   :  { %v9709_v59 = vadd.f32 %v10716_v11, %v9620_v33 }
 0xaad   :  { %v10749_v9 = vpop.f32.mrb[102].mxu1 }
 0xaae   :  { %v10750_v22 = vpop.f32.mrb[103].mxu1 }
 0xaaf   :  { %v10751_v21 = vadd.f32 %v10750_v22, %v10749_v9 }
 0xab1   :  { %v9779_v53 = vadd.f32 %v10751_v21, %v9709_v59 }
 0xab3   :  { %9783 = vst.msk [vmem:[#allocation18] sm:$0x1] %vm9782_vm5, %v9779_v53 }
 0xab4   :  { %13242 = shalt.err (!%p13239_p12)
}
 0xab5   :  { %s13243_s14 = scalar_lea.hbm %s15190_s9, 16 }
 0xab6   :  { %p13244_p13 = scmp.ne.s32.totalorder %s15190_s9, %s13243_s14  ;;  %p13247_p0 = scmp.lt.u32.totalorder %s13243_s14, %s15190_s9 }
 0xab8   :  { %p13249_p1 = pnand %p13247_p0, %p13244_p13 }
 0xaba   :  { %13252 = shalt.err (!%p13249_p1)
}
 0xabb   :  { %9793 = dma.vmem_to_hbm [thread:$0]  %s9791_s8, 16, %s15190_s9, [#allocation8]  }
 0xabc   :  { %13261 = dma.done.wait [#allocation8], 16  }
 0xabd   :  { %13262 = vsyncadd [#allocation8], 4294967280 }
 0xabe   :  { %13263 = dma.done.wait [#allocation20], 32  }
 0xabf   :  { %13264 = vsyncadd [#allocation20], 4294967264 }
 0xac0   :  { %9810 = vsyncpa [#allocation7], 1 }
 0xac1   :  { %9811 = vsyncpa [#allocation10], 1 }
 0xac2   :  { %9812 = vsyncpa [#allocation13], 1 }
 0xac3   :  { %9813 = vsyncpa [#allocation16], 1 }
 0xac4   :  { %9814 = vsyncpa [#allocation8], 1 }
 0xac5   :  { %9815 = vsyncpa [#allocation20], 1 }

</bundles_post_ra>
